<compile_context>
chip_gen: v6e
topology: v6e:2x2x1
jax: 0.10.0
libtpu: 0.0.40
codegen_flags: <defaults>
</compile_context>

<pallas_src>
import math

import numpy as np

import jax
import jax.numpy as jnp
from jax import lax
from jax.experimental import pallas as pl
from jax.experimental.pallas import tpu as pltpu

_RMS_EPS = 1.1920928955078125e-07  # torch.finfo(float32).eps (F.rms_norm default)


def _rotary_tables(seq_len, head_dim):
    # Mirrors the PyTorch Rotary cache: tables are bf16-rounded, used in f32.
    inv_freq = 1.0 / (10000.0 ** (jnp.arange(0, head_dim, 2, dtype=jnp.float32)
                                  / head_dim))
    freqs = jnp.outer(jnp.arange(seq_len, dtype=jnp.float32), inv_freq)
    cos = jnp.cos(freqs).astype(jnp.bfloat16).astype(jnp.float32)
    sin = jnp.sin(freqs).astype(jnp.bfloat16).astype(jnp.float32)
    return cos, sin  # (T, head_dim // 2) each


# --------------------------------------------------------------------------
# kernel
# --------------------------------------------------------------------------
def _block_kernel(x_ref, cosq_ref, sinq_ref, cosk_ref, sink_ref, mhead_ref,
                  kmask_ref, vmask_ref, bias_ref,
                  wq_ref, wk_ref, wv_ref, wo_ref, wfc_ref, wp2_ref, o_ref):
    T, C = x_ref.shape[1], x_ref.shape[2]
    n_head = kmask_ref.shape[0] // T
    half = C // 2
    f32, bf16 = jnp.float32, jnp.bfloat16

    x = x_ref[0]                                        # (T, C) f32

    def rms_full(v):                                    # F.rms_norm over C (f32)
        return v * lax.rsqrt(jnp.mean(v * v, axis=-1, keepdims=True) + _RMS_EPS)

    def swap_halves(u):
        # rotate-half partner gather in the grouped-halves layout;
        # equivalent to pltpu.roll(u, C // 2, axis=-1).
        return jnp.concatenate([u[:, half:], u[:, :half]], axis=-1)

    # ---------------- attention branch ----------------
    h = rms_full(x)
    h_bf = h.astype(bf16)

    q = jnp.dot(h_bf, wq_ref[...], preferred_element_type=f32)   # grouped-halves layout
    k = jnp.dot(h_bf, wk_ref[...], preferred_element_type=f32)   # grouped-halves layout
    v = jnp.dot(h_bf, wv_ref[...], preferred_element_type=f32)   # original layout

    # per-head RMS-norm: block-diagonal (C, C) "head mean" matmul, f32 for precision
    mhead = mhead_ref[...]
    qn = q * lax.rsqrt(jnp.dot(q * q, mhead, preferred_element_type=f32) + _RMS_EPS)
    kn = k * lax.rsqrt(jnp.dot(k * k, mhead, preferred_element_type=f32) + _RMS_EPS)

    # RoPE, full lane width for all heads at once; 1/sqrt(hd) folded into q tables
    qr = qn * cosq_ref[...] + swap_halves(qn) * sinq_ref[...]
    kr = kn * cosk_ref[...] + swap_halves(kn) * sink_ref[...]

    q_bf = qr.astype(bf16)
    k_bf = kr.astype(bf16)
    v_bf = v.astype(bf16)

    # stacked-KV causal attention: head h lives in rows [h*T, (h+1)*T)
    kmask = kmask_ref[...]                              # (n_head*T, C) bf16, permuted heads
    vmask = vmask_ref[...]                              # (n_head*T, C) bf16, original heads
    k_stack = jnp.concatenate([k_bf] * n_head, axis=0) * kmask
    v_stack = jnp.concatenate([v_bf] * n_head, axis=0) * vmask

    # scores for all heads in one (T, n_head*T) matmul (scale already in q)
    s = lax.dot_general(q_bf, k_stack, (((1,), (1,)), ((), ())),
                        preferred_element_type=f32)
    s = s + bias_ref[...]                               # additive causal mask (0 / -1e30), f32

    # post-rms-norm scores are bounded (|s| <= sqrt(hd)), so a single global
    # row max is safe for every head segment.
    m = jnp.max(s, axis=-1, keepdims=True)
    e = jnp.exp(s - m)                                  # f32; masked entries -> 0
    e_bf = e.astype(bf16)

    y_un = jnp.dot(e_bf, v_stack, preferred_element_type=f32)    # (T, C) per-head numerators
    denom = jnp.dot(e_bf, vmask, preferred_element_type=f32)     # (T, C) per-head softmax sums
    y = y_un * pl.reciprocal(denom, approx=True)

    x1 = x + jnp.dot(y.astype(bf16), wo_ref[...], preferred_element_type=f32)

    # ---------------- MLP branch ----------------
    h2 = rms_full(x1).astype(bf16)
    mfc = jnp.dot(h2, wfc_ref[...], preferred_element_type=f32)
    mfc = jnp.square(jnp.maximum(mfc, 0.0))                       # relu(x)^2, f32
    mlp = jnp.dot(mfc.astype(bf16), wp2_ref[...], preferred_element_type=f32)

    o_ref[0] = (x1 + mlp).astype(o_ref.dtype)


# --------------------------------------------------------------------------
# wrapper: one-time parameter preparation (hoisted off the per-call path)
# --------------------------------------------------------------------------
def prepare_block_params(wq, wk, wv, wo, wfc, wp2, *, seq_len, n_head):
    """Pre-transpose / permute / cast all constants once (torch layout in)."""
    C = wq.shape[0]
    assert C % n_head == 0
    hd = C // n_head
    assert hd % 2 == 0
    d = hd // 2
    half = C // 2
    scale = 1.0 / math.sqrt(hd)                 # SDPA default scale
    bf16 = jnp.bfloat16

    cols = np.arange(C)
    # grouped-halves permutation: new column c <- old column of
    # (head=(c%half)//d, half=c//half, within=c%d)
    perm = ((cols % half) // d) * hd + (cols // half) * d + (cols % d)
    ph = (cols % half) // d                     # head of column c, permuted layout
    oh = cols // hd                             # head of column c, original layout

    cos, sin = _rotary_tables(seq_len, hd)      # (T, d), bf16-rounded, f32
    widx = cols % d
    sign = jnp.asarray(np.where(cols < half, 1.0, -1.0), jnp.float32)
    cos_full = cos[:, widx]                                       # (T, C)
    sin_full = sin[:, widx] * sign[None, :]                       # sign baked in
    cos_q = cos_full * scale                                      # fold 1/sqrt(hd) into q
    sin_q = sin_full * scale

    mhead = jnp.asarray((ph[:, None] == ph[None, :]).astype(np.float32) / hd)

    hrow = np.repeat(np.arange(n_head), seq_len)                  # (n_head*T,)
    kmask = jnp.asarray((ph[None, :] == hrow[:, None]).astype(np.float32), bf16)
    vmask = jnp.asarray((oh[None, :] == hrow[:, None]).astype(np.float32), bf16)

    jcol = np.tile(np.arange(seq_len), n_head)                    # (n_head*T,)
    bias = jnp.asarray(np.where(jcol[None, :] <= np.arange(seq_len)[:, None],
                                0.0, -1e30).astype(np.float32))   # (T, n_head*T)

    perm_j = jnp.asarray(perm)
    return dict(
        cos_q=cos_q, sin_q=sin_q, cos_k=cos_full, sin_k=sin_full,
        mhead=mhead, kmask=kmask, vmask=vmask, bias=bias,
        wq=wq.T[:, perm_j].astype(bf16), wk=wk.T[:, perm_j].astype(bf16),
        wv=wv.T.astype(bf16), wo=wo.T.astype(bf16),
        wfc=wfc.T.astype(bf16), wp2=wp2.T.astype(bf16))


def _resident(a):
    return pl.BlockSpec(a.shape, lambda b, _nd=a.ndim: (0,) * _nd)


def block_forward(x, p):
    """Pallas implementation of Block.forward(x) using prepared params `p`."""
    B, T, C = x.shape

    grid_spec = pltpu.PrefetchScalarGridSpec(
        num_scalar_prefetch=0,
        grid=(B,),
        in_specs=[
            pl.BlockSpec((1, T, C), lambda b: (b, 0, 0)),   # x (per batch)
            _resident(p["cos_q"]), _resident(p["sin_q"]),
            _resident(p["cos_k"]), _resident(p["sin_k"]),
            _resident(p["mhead"]),
            _resident(p["kmask"]), _resident(p["vmask"]),
            _resident(p["bias"]),
            _resident(p["wq"]), _resident(p["wk"]), _resident(p["wv"]),
            _resident(p["wo"]), _resident(p["wfc"]), _resident(p["wp2"]),
        ],
        out_specs=pl.BlockSpec((1, T, C), lambda b: (b, 0, 0)),
    )
    return pl.pallas_call(
        _block_kernel,
        out_shape=jax.ShapeDtypeStruct((B, T, C), x.dtype),
        grid_spec=grid_spec,
        compiler_params=pltpu.CompilerParams(
            dimension_semantics=("parallel",),
            vmem_limit_bytes=32 << 20),
    )(x, p["cos_q"], p["sin_q"], p["cos_k"], p["sin_k"], p["mhead"],
      p["kmask"], p["vmask"], p["bias"], p["wq"], p["wk"], p["wv"],
      p["wo"], p["wfc"], p["wp2"])


# --------------------------------------------------------------------------
# plain-JAX reference (faithful f32 mirror of the PyTorch Block)
# --------------------------------------------------------------------------
def _ref_block(x, wq, wk, wv, wo, wfc, wp2, n_head):
    B, T, C = x.shape
    hd = C // n_head
    d = hd // 2
    scale = 1.0 / math.sqrt(hd)
    cos, sin = _rotary_tables(T, hd)

    def rms(v):
        return v * lax.rsqrt(jnp.mean(v * v, axis=-1, keepdims=True) + _RMS_EPS)

    h = rms(x)
    q = (h @ wq.T).reshape(B, T, n_head, hd)
    k = (h @ wk.T).reshape(B, T, n_head, hd)
    v = (h @ wv.T).reshape(B, T, n_head, hd)
    q, k = rms(q), rms(k)

    cos_b = cos[None, :, None, :]
    sin_b = sin[None, :, None, :]

    def rope(u):
        u1, u2 = u[..., :d], u[..., d:]
        return jnp.concatenate([u1 * cos_b + u2 * sin_b,
                                -u1 * sin_b + u2 * cos_b], axis=-1)

    q, k = rope(q), rope(k)
    s = jnp.einsum('bqhd,bkhd->bhqk', q, k) * scale
    causal = jnp.tril(jnp.ones((T, T), dtype=bool))
    s = jnp.where(causal[None, None], s, -1e30)
    pattn = jax.nn.softmax(s, axis=-1)
    y = jnp.einsum('bhqk,bkhd->bqhd', pattn, v).reshape(B, T, C)
    x1 = x + y @ wo.T

    h2 = rms(x1)
    m = jnp.square(jnp.maximum(h2 @ wfc.T, 0.0)) @ wp2.T
    return x1 + m


if __name__ == "__main__":
    B, T, n_embd, n_head = 2, 128, 64, 4

    key = jax.random.PRNGKey(0)
    kx, k1, k2, k3, k4, k5, k6 = jax.random.split(key, 7)
    x = jax.random.normal(kx, (B, T, n_embd), dtype=jnp.float32)

    def linear_w(k, out_f, in_f):
        bound = 1.0 / math.sqrt(in_f)
        return jax.random.uniform(k, (out_f, in_f), jnp.float32, -bound, bound)

    wq = linear_w(k1, n_embd, n_embd)
    wk = linear_w(k2, n_embd, n_embd)
    wv = linear_w(k3, n_embd, n_embd)
    # NOTE: the PyTorch module zero-initialises both c_proj weights at init; we
    # use random weights so the test exercises both residual branches (forward
    # semantics are identical for any weight values).
    wo = linear_w(k4, n_embd, n_embd)
    wfc = linear_w(k5, 4 * n_embd, n_embd)
    wp2 = linear_w(k6, n_embd, 4 * n_embd)

    params = prepare_block_params(wq, wk, wv, wo, wfc, wp2,
                                  seq_len=T, n_head=n_head)
    fwd = jax.jit(block_forward)
    out = jax.block_until_ready(fwd(x, params))

    ref = _ref_block(x, wq, wk, wv, wo, wfc, wp2, n_head)

    assert out.shape == (B, T, n_embd)
    err = float(jnp.max(jnp.abs(out - ref)))
    # bf16 MXU operands (per performance review) vs. a pure-f32 reference.
    assert jnp.allclose(out, ref, atol=3e-2, rtol=3e-2), f"max abs err = {err:e}"
    print("KERNEL_OK")
</pallas_src>

<mosaic_0001>
module attributes {stable_mosaic.version = 11 : i64} {
  func.func @_block_kernel(%arg0: i32, %arg1: memref<1x128x64xf32, #tpu.memory_space<vmem>>, %arg2: memref<128x64xf32, #tpu.memory_space<vmem>>, %arg3: memref<128x64xf32, #tpu.memory_space<vmem>>, %arg4: memref<128x64xf32, #tpu.memory_space<vmem>>, %arg5: memref<128x64xf32, #tpu.memory_space<vmem>>, %arg6: memref<64x64xf32, #tpu.memory_space<vmem>>, %arg7: memref<512x64xbf16, #tpu.memory_space<vmem>>, %arg8: memref<512x64xbf16, #tpu.memory_space<vmem>>, %arg9: memref<128x512xf32, #tpu.memory_space<vmem>>, %arg10: memref<64x64xbf16, #tpu.memory_space<vmem>>, %arg11: memref<64x64xbf16, #tpu.memory_space<vmem>>, %arg12: memref<64x64xbf16, #tpu.memory_space<vmem>>, %arg13: memref<64x64xbf16, #tpu.memory_space<vmem>>, %arg14: memref<64x256xbf16, #tpu.memory_space<vmem>>, %arg15: memref<256x64xbf16, #tpu.memory_space<vmem>>, %arg16: memref<1x128x64xf32, #tpu.memory_space<vmem>>) attributes {dimension_semantics = [#tpu.dimension_semantics<parallel>], iteration_bounds = array<i64: 2>, scalar_prefetch = 0 : i64, scratch_operands = 0 : i64, tpu.core_type = #tpu.core_type<tc>, window_params = [{transform_indices = @transform_0, window_bounds = array<i64: 1, 128, 64>}, {pipeline_mode = #tpu.pipeline_mode<synchronous>, transform_indices = @transform_1, window_bounds = array<i64: 128, 64>}, {pipeline_mode = #tpu.pipeline_mode<synchronous>, transform_indices = @transform_2, window_bounds = array<i64: 128, 64>}, {pipeline_mode = #tpu.pipeline_mode<synchronous>, transform_indices = @transform_3, window_bounds = array<i64: 128, 64>}, {pipeline_mode = #tpu.pipeline_mode<synchronous>, transform_indices = @transform_4, window_bounds = array<i64: 128, 64>}, {pipeline_mode = #tpu.pipeline_mode<synchronous>, transform_indices = @transform_5, window_bounds = array<i64: 64, 64>}, {pipeline_mode = #tpu.pipeline_mode<synchronous>, transform_indices = @transform_6, window_bounds = array<i64: 512, 64>}, {pipeline_mode = #tpu.pipeline_mode<synchronous>, transform_indices = @transform_7, window_bounds = array<i64: 512, 64>}, {pipeline_mode = #tpu.pipeline_mode<synchronous>, transform_indices = @transform_8, window_bounds = array<i64: 128, 512>}, {pipeline_mode = #tpu.pipeline_mode<synchronous>, transform_indices = @transform_9, window_bounds = array<i64: 64, 64>}, {pipeline_mode = #tpu.pipeline_mode<synchronous>, transform_indices = @transform_10, window_bounds = array<i64: 64, 64>}, {pipeline_mode = #tpu.pipeline_mode<synchronous>, transform_indices = @transform_11, window_bounds = array<i64: 64, 64>}, {pipeline_mode = #tpu.pipeline_mode<synchronous>, transform_indices = @transform_12, window_bounds = array<i64: 64, 64>}, {pipeline_mode = #tpu.pipeline_mode<synchronous>, transform_indices = @transform_13, window_bounds = array<i64: 64, 256>}, {pipeline_mode = #tpu.pipeline_mode<synchronous>, transform_indices = @transform_14, window_bounds = array<i64: 256, 64>}, {transform_indices = @transform_15, window_bounds = array<i64: 1, 128, 64>}]} {
    %c0 = arith.constant 0 : index
    %c0_0 = arith.constant 0 : index
    %c0_1 = arith.constant 0 : index
    %0 = vector.load %arg1[%c0, %c0_0, %c0_1] : memref<1x128x64xf32, #tpu.memory_space<vmem>>, vector<1x128x64xf32>
    %1 = vector.shape_cast %0 : vector<1x128x64xf32> to vector<128x64xf32>
    %2 = arith.mulf %1, %1 : vector<128x64xf32>
    %cst = arith.constant dense<0.000000e+00> : vector<128xf32>
    %3 = vector.multi_reduction <add>, %2, %cst [1] : vector<128x64xf32> to vector<128xf32>
    %4 = vector.shape_cast %3 : vector<128xf32> to vector<128x1xf32>
    %cst_2 = arith.constant 6.400000e+01 : f32
    %5 = vector.broadcast %cst_2 : f32 to vector<128x1xf32>
    %6 = arith.divf %4, %5 : vector<128x1xf32>
    %cst_3 = arith.constant 1.1920929E-7 : f32
    %7 = vector.broadcast %cst_3 : f32 to vector<128x1xf32>
    %8 = arith.addf %6, %7 : vector<128x1xf32>
    %9 = math.rsqrt %8 : vector<128x1xf32>
    %10 = vector.broadcast %9 : vector<128x1xf32> to vector<128x64xf32>
    %11 = arith.mulf %1, %10 : vector<128x64xf32>
    %12 = arith.truncf %11 : vector<128x64xf32> to vector<128x64xbf16>
    %c0_4 = arith.constant 0 : index
    %c0_5 = arith.constant 0 : index
    %13 = vector.load %arg10[%c0_4, %c0_5] : memref<64x64xbf16, #tpu.memory_space<vmem>>, vector<64x64xbf16>
    %cst_6 = arith.constant dense<0.000000e+00> : vector<128x64xf32>
    %14 = tpu.matmul %12, %13, %cst_6 {dimension_numbers = #tpu.dot_dimension_numbers<[1], [0], [0], [1], [0, 0, 1, 1], [], []>} : vector<128x64xbf16>, vector<64x64xbf16>, vector<128x64xf32> -> vector<128x64xf32>
    %c0_7 = arith.constant 0 : index
    %c0_8 = arith.constant 0 : index
    %15 = vector.load %arg11[%c0_7, %c0_8] : memref<64x64xbf16, #tpu.memory_space<vmem>>, vector<64x64xbf16>
    %cst_9 = arith.constant dense<0.000000e+00> : vector<128x64xf32>
    %16 = tpu.matmul %12, %15, %cst_9 {dimension_numbers = #tpu.dot_dimension_numbers<[1], [0], [0], [1], [0, 0, 1, 1], [], []>} : vector<128x64xbf16>, vector<64x64xbf16>, vector<128x64xf32> -> vector<128x64xf32>
    %c0_10 = arith.constant 0 : index
    %c0_11 = arith.constant 0 : index
    %17 = vector.load %arg12[%c0_10, %c0_11] : memref<64x64xbf16, #tpu.memory_space<vmem>>, vector<64x64xbf16>
    %cst_12 = arith.constant dense<0.000000e+00> : vector<128x64xf32>
    %18 = tpu.matmul %12, %17, %cst_12 {dimension_numbers = #tpu.dot_dimension_numbers<[1], [0], [0], [1], [0, 0, 1, 1], [], []>} : vector<128x64xbf16>, vector<64x64xbf16>, vector<128x64xf32> -> vector<128x64xf32>
    %c0_13 = arith.constant 0 : index
    %c0_14 = arith.constant 0 : index
    %19 = vector.load %arg6[%c0_13, %c0_14] : memref<64x64xf32, #tpu.memory_space<vmem>>, vector<64x64xf32>
    %20 = arith.mulf %14, %14 : vector<128x64xf32>
    %cst_15 = arith.constant dense<0.000000e+00> : vector<128x64xf32>
    %21 = tpu.matmul %20, %19, %cst_15 {dimension_numbers = #tpu.dot_dimension_numbers<[1], [0], [0], [1], [0, 0, 1, 1], [], []>} : vector<128x64xf32>, vector<64x64xf32>, vector<128x64xf32> -> vector<128x64xf32>
    %cst_16 = arith.constant 1.1920929E-7 : f32
    %22 = vector.broadcast %cst_16 : f32 to vector<128x64xf32>
    %23 = arith.addf %21, %22 : vector<128x64xf32>
    %24 = math.rsqrt %23 : vector<128x64xf32>
    %25 = arith.mulf %14, %24 : vector<128x64xf32>
    %26 = arith.mulf %16, %16 : vector<128x64xf32>
    %cst_17 = arith.constant dense<0.000000e+00> : vector<128x64xf32>
    %27 = tpu.matmul %26, %19, %cst_17 {dimension_numbers = #tpu.dot_dimension_numbers<[1], [0], [0], [1], [0, 0, 1, 1], [], []>} : vector<128x64xf32>, vector<64x64xf32>, vector<128x64xf32> -> vector<128x64xf32>
    %cst_18 = arith.constant 1.1920929E-7 : f32
    %28 = vector.broadcast %cst_18 : f32 to vector<128x64xf32>
    %29 = arith.addf %27, %28 : vector<128x64xf32>
    %30 = math.rsqrt %29 : vector<128x64xf32>
    %31 = arith.mulf %16, %30 : vector<128x64xf32>
    %c0_19 = arith.constant 0 : index
    %c0_20 = arith.constant 0 : index
    %32 = vector.load %arg2[%c0_19, %c0_20] : memref<128x64xf32, #tpu.memory_space<vmem>>, vector<128x64xf32>
    %33 = arith.mulf %25, %32 : vector<128x64xf32>
    %34 = vector.extract_strided_slice %25 {offsets = [0, 32], sizes = [128, 32], strides = [1, 1]} : vector<128x64xf32> to vector<128x32xf32>
    %35 = vector.extract_strided_slice %25 {offsets = [0, 0], sizes = [128, 32], strides = [1, 1]} : vector<128x64xf32> to vector<128x32xf32>
    %36 = tpu.concatenate %34, %35 in 1 : vector<128x32xf32>, vector<128x32xf32> -> vector<128x64xf32>
    %c0_21 = arith.constant 0 : index
    %c0_22 = arith.constant 0 : index
    %37 = vector.load %arg3[%c0_21, %c0_22] : memref<128x64xf32, #tpu.memory_space<vmem>>, vector<128x64xf32>
    %38 = arith.mulf %36, %37 : vector<128x64xf32>
    %39 = arith.addf %33, %38 : vector<128x64xf32>
    %c0_23 = arith.constant 0 : index
    %c0_24 = arith.constant 0 : index
    %40 = vector.load %arg4[%c0_23, %c0_24] : memref<128x64xf32, #tpu.memory_space<vmem>>, vector<128x64xf32>
    %41 = arith.mulf %31, %40 : vector<128x64xf32>
    %42 = vector.extract_strided_slice %31 {offsets = [0, 32], sizes = [128, 32], strides = [1, 1]} : vector<128x64xf32> to vector<128x32xf32>
    %43 = vector.extract_strided_slice %31 {offsets = [0, 0], sizes = [128, 32], strides = [1, 1]} : vector<128x64xf32> to vector<128x32xf32>
    %44 = tpu.concatenate %42, %43 in 1 : vector<128x32xf32>, vector<128x32xf32> -> vector<128x64xf32>
    %c0_25 = arith.constant 0 : index
    %c0_26 = arith.constant 0 : index
    %45 = vector.load %arg5[%c0_25, %c0_26] : memref<128x64xf32, #tpu.memory_space<vmem>>, vector<128x64xf32>
    %46 = arith.mulf %44, %45 : vector<128x64xf32>
    %47 = arith.addf %41, %46 : vector<128x64xf32>
    %48 = arith.truncf %39 : vector<128x64xf32> to vector<128x64xbf16>
    %49 = arith.truncf %47 : vector<128x64xf32> to vector<128x64xbf16>
    %50 = arith.truncf %18 : vector<128x64xf32> to vector<128x64xbf16>
    %c0_27 = arith.constant 0 : index
    %c0_28 = arith.constant 0 : index
    %51 = vector.load %arg7[%c0_27, %c0_28] : memref<512x64xbf16, #tpu.memory_space<vmem>>, vector<512x64xbf16>
    %c0_29 = arith.constant 0 : index
    %c0_30 = arith.constant 0 : index
    %52 = vector.load %arg8[%c0_29, %c0_30] : memref<512x64xbf16, #tpu.memory_space<vmem>>, vector<512x64xbf16>
    %53 = tpu.concatenate %49, %49, %49, %49 in 0 : vector<128x64xbf16>, vector<128x64xbf16>, vector<128x64xbf16>, vector<128x64xbf16> -> vector<512x64xbf16>
    %54 = arith.mulf %53, %51 : vector<512x64xbf16>
    %55 = tpu.concatenate %50, %50, %50, %50 in 0 : vector<128x64xbf16>, vector<128x64xbf16>, vector<128x64xbf16>, vector<128x64xbf16> -> vector<512x64xbf16>
    %56 = arith.mulf %55, %52 : vector<512x64xbf16>
    %cst_31 = arith.constant dense<0.000000e+00> : vector<128x512xf32>
    %57 = tpu.matmul %48, %54, %cst_31 {dimension_numbers = #tpu.dot_dimension_numbers<[1], [1], [0], [0], [0, 0, 1, 0], [], []>} : vector<128x64xbf16>, vector<512x64xbf16>, vector<128x512xf32> -> vector<128x512xf32>
    %c0_32 = arith.constant 0 : index
    %c0_33 = arith.constant 0 : index
    %58 = vector.load %arg9[%c0_32, %c0_33] : memref<128x512xf32, #tpu.memory_space<vmem>>, vector<128x512xf32>
    %59 = arith.addf %57, %58 : vector<128x512xf32>
    %cst_34 = arith.constant dense<0xFF800000> : vector<128xf32>
    %60 = vector.multi_reduction <maximumf>, %59, %cst_34 [1] : vector<128x512xf32> to vector<128xf32>
    %61 = vector.shape_cast %60 : vector<128xf32> to vector<128x1xf32>
    %62 = vector.broadcast %61 : vector<128x1xf32> to vector<128x512xf32>
    %63 = arith.subf %59, %62 : vector<128x512xf32>
    %64 = math.exp %63 : vector<128x512xf32>
    %65 = arith.truncf %64 : vector<128x512xf32> to vector<128x512xbf16>
    %cst_35 = arith.constant dense<0.000000e+00> : vector<128x64xf32>
    %66 = tpu.matmul %65, %56, %cst_35 {dimension_numbers = #tpu.dot_dimension_numbers<[1], [0], [0], [1], [0, 0, 1, 1], [], []>} : vector<128x512xbf16>, vector<512x64xbf16>, vector<128x64xf32> -> vector<128x64xf32>
    %cst_36 = arith.constant dense<0.000000e+00> : vector<128x64xf32>
    %67 = tpu.matmul %65, %52, %cst_36 {dimension_numbers = #tpu.dot_dimension_numbers<[1], [0], [0], [1], [0, 0, 1, 1], [], []>} : vector<128x512xbf16>, vector<512x64xbf16>, vector<128x64xf32> -> vector<128x64xf32>
    %68 = tpu.reciprocal %67 {approx = true} : vector<128x64xf32> -> vector<128x64xf32>
    %69 = arith.mulf %66, %68 : vector<128x64xf32>
    %70 = arith.truncf %69 : vector<128x64xf32> to vector<128x64xbf16>
    %c0_37 = arith.constant 0 : index
    %c0_38 = arith.constant 0 : index
    %71 = vector.load %arg13[%c0_37, %c0_38] : memref<64x64xbf16, #tpu.memory_space<vmem>>, vector<64x64xbf16>
    %cst_39 = arith.constant dense<0.000000e+00> : vector<128x64xf32>
    %72 = tpu.matmul %70, %71, %cst_39 {dimension_numbers = #tpu.dot_dimension_numbers<[1], [0], [0], [1], [0, 0, 1, 1], [], []>} : vector<128x64xbf16>, vector<64x64xbf16>, vector<128x64xf32> -> vector<128x64xf32>
    %73 = arith.addf %1, %72 : vector<128x64xf32>
    %74 = arith.mulf %73, %73 : vector<128x64xf32>
    %cst_40 = arith.constant dense<0.000000e+00> : vector<128xf32>
    %75 = vector.multi_reduction <add>, %74, %cst_40 [1] : vector<128x64xf32> to vector<128xf32>
    %76 = vector.shape_cast %75 : vector<128xf32> to vector<128x1xf32>
    %cst_41 = arith.constant 6.400000e+01 : f32
    %77 = vector.broadcast %cst_41 : f32 to vector<128x1xf32>
    %78 = arith.divf %76, %77 : vector<128x1xf32>
    %cst_42 = arith.constant 1.1920929E-7 : f32
    %79 = vector.broadcast %cst_42 : f32 to vector<128x1xf32>
    %80 = arith.addf %78, %79 : vector<128x1xf32>
    %81 = math.rsqrt %80 : vector<128x1xf32>
    %82 = vector.broadcast %81 : vector<128x1xf32> to vector<128x64xf32>
    %83 = arith.mulf %73, %82 : vector<128x64xf32>
    %84 = arith.truncf %83 : vector<128x64xf32> to vector<128x64xbf16>
    %c0_43 = arith.constant 0 : index
    %c0_44 = arith.constant 0 : index
    %85 = vector.load %arg14[%c0_43, %c0_44] : memref<64x256xbf16, #tpu.memory_space<vmem>>, vector<64x256xbf16>
    %cst_45 = arith.constant dense<0.000000e+00> : vector<128x256xf32>
    %86 = tpu.matmul %84, %85, %cst_45 {dimension_numbers = #tpu.dot_dimension_numbers<[1], [0], [0], [1], [0, 0, 1, 1], [], []>} : vector<128x64xbf16>, vector<64x256xbf16>, vector<128x256xf32> -> vector<128x256xf32>
    %cst_46 = arith.constant 0.000000e+00 : f32
    %87 = vector.broadcast %cst_46 : f32 to vector<128x256xf32>
    %88 = arith.maximumf %86, %87 : vector<128x256xf32>
    %89 = arith.mulf %88, %88 : vector<128x256xf32>
    %90 = arith.truncf %89 : vector<128x256xf32> to vector<128x256xbf16>
    %c0_47 = arith.constant 0 : index
    %c0_48 = arith.constant 0 : index
    %91 = vector.load %arg15[%c0_47, %c0_48] : memref<256x64xbf16, #tpu.memory_space<vmem>>, vector<256x64xbf16>
    %cst_49 = arith.constant dense<0.000000e+00> : vector<128x64xf32>
    %92 = tpu.matmul %90, %91, %cst_49 {dimension_numbers = #tpu.dot_dimension_numbers<[1], [0], [0], [1], [0, 0, 1, 1], [], []>} : vector<128x256xbf16>, vector<256x64xbf16>, vector<128x64xf32> -> vector<128x64xf32>
    %93 = arith.addf %73, %92 : vector<128x64xf32>
    %c0_50 = arith.constant 0 : index
    %c0_51 = arith.constant 0 : index
    %c0_52 = arith.constant 0 : index
    %94 = vector.load %arg16[%c0_50, %c0_51, %c0_52] : memref<1x128x64xf32, #tpu.memory_space<vmem>>, vector<1x128x64xf32>
    %95 = vector.shape_cast %94 : vector<1x128x64xf32> to vector<128x64xf32>
    %96 = vector.shape_cast %93 : vector<128x64xf32> to vector<1x128x64xf32>
    tpu.vector_store %arg16[%c0_50, %c0_51, %c0_52], %96 {strides = array<i32>} : memref<1x128x64xf32, #tpu.memory_space<vmem>>, vector<1x128x64xf32>,
    return
  }
  func.func @transform_0(%arg0: i32) -> (i32, i32, i32) {
    %c0_i32 = arith.constant 0 : i32
    %c0_i32_0 = arith.constant 0 : i32
    %c0_i32_1 = arith.constant 0 : i32
    return %arg0, %c0_i32, %c0_i32_0 : i32, i32, i32
  }
  func.func @transform_1(%arg0: i32) -> (i32, i32) {
    %c0_i32 = arith.constant 0 : i32
    %c0_i32_0 = arith.constant 0 : i32
    %c0_i32_1 = arith.constant 0 : i32
    return %c0_i32, %c0_i32_0 : i32, i32
  }
  func.func @transform_2(%arg0: i32) -> (i32, i32) {
    %c0_i32 = arith.constant 0 : i32
    %c0_i32_0 = arith.constant 0 : i32
    %c0_i32_1 = arith.constant 0 : i32
    return %c0_i32, %c0_i32_0 : i32, i32
  }
  func.func @transform_3(%arg0: i32) -> (i32, i32) {
    %c0_i32 = arith.constant 0 : i32
    %c0_i32_0 = arith.constant 0 : i32
    %c0_i32_1 = arith.constant 0 : i32
    return %c0_i32, %c0_i32_0 : i32, i32
  }
  func.func @transform_4(%arg0: i32) -> (i32, i32) {
    %c0_i32 = arith.constant 0 : i32
    %c0_i32_0 = arith.constant 0 : i32
    %c0_i32_1 = arith.constant 0 : i32
    return %c0_i32, %c0_i32_0 : i32, i32
  }
  func.func @transform_5(%arg0: i32) -> (i32, i32) {
    %c0_i32 = arith.constant 0 : i32
    %c0_i32_0 = arith.constant 0 : i32
    %c0_i32_1 = arith.constant 0 : i32
    return %c0_i32, %c0_i32_0 : i32, i32
  }
  func.func @transform_6(%arg0: i32) -> (i32, i32) {
    %c0_i32 = arith.constant 0 : i32
    %c0_i32_0 = arith.constant 0 : i32
    %c0_i32_1 = arith.constant 0 : i32
    return %c0_i32, %c0_i32_0 : i32, i32
  }
  func.func @transform_7(%arg0: i32) -> (i32, i32) {
    %c0_i32 = arith.constant 0 : i32
    %c0_i32_0 = arith.constant 0 : i32
    %c0_i32_1 = arith.constant 0 : i32
    return %c0_i32, %c0_i32_0 : i32, i32
  }
  func.func @transform_8(%arg0: i32) -> (i32, i32) {
    %c0_i32 = arith.constant 0 : i32
    %c0_i32_0 = arith.constant 0 : i32
    %c0_i32_1 = arith.constant 0 : i32
    return %c0_i32, %c0_i32_0 : i32, i32
  }
  func.func @transform_9(%arg0: i32) -> (i32, i32) {
    %c0_i32 = arith.constant 0 : i32
    %c0_i32_0 = arith.constant 0 : i32
    %c0_i32_1 = arith.constant 0 : i32
    return %c0_i32, %c0_i32_0 : i32, i32
  }
  func.func @transform_10(%arg0: i32) -> (i32, i32) {
    %c0_i32 = arith.constant 0 : i32
    %c0_i32_0 = arith.constant 0 : i32
    %c0_i32_1 = arith.constant 0 : i32
    return %c0_i32, %c0_i32_0 : i32, i32
  }
  func.func @transform_11(%arg0: i32) -> (i32, i32) {
    %c0_i32 = arith.constant 0 : i32
    %c0_i32_0 = arith.constant 0 : i32
    %c0_i32_1 = arith.constant 0 : i32
    return %c0_i32, %c0_i32_0 : i32, i32
  }
  func.func @transform_12(%arg0: i32) -> (i32, i32) {
    %c0_i32 = arith.constant 0 : i32
    %c0_i32_0 = arith.constant 0 : i32
    %c0_i32_1 = arith.constant 0 : i32
    return %c0_i32, %c0_i32_0 : i32, i32
  }
  func.func @transform_13(%arg0: i32) -> (i32, i32) {
    %c0_i32 = arith.constant 0 : i32
    %c0_i32_0 = arith.constant 0 : i32
    %c0_i32_1 = arith.constant 0 : i32
    return %c0_i32, %c0_i32_0 : i32, i32
  }
  func.func @transform_14(%arg0: i32) -> (i32, i32) {
    %c0_i32 = arith.constant 0 : i32
    %c0_i32_0 = arith.constant 0 : i32
    %c0_i32_1 = arith.constant 0 : i32
    return %c0_i32, %c0_i32_0 : i32, i32
  }
  func.func @transform_15(%arg0: i32) -> (i32, i32, i32) {
    %c0_i32 = arith.constant 0 : i32
    %c0_i32_0 = arith.constant 0 : i32
    %c0_i32_1 = arith.constant 0 : i32
    return %arg0, %c0_i32, %c0_i32_0 : i32, i32, i32
  }
}

</mosaic_0001>

<bundles_post_ra>
// kernel: block_forward.1
= control target key start
LH: loop header
LB: loop body
LE: loop exit
PB: predicated region body
PF: predicated region fallthrough
CT: control target
= control target key end

     0   :  { %s6013_s18 = smov 0   ;;  %s8184_s0 = inlined_call_operand.vmem [shape: f32[2,128,64], index: 0, kind: input, shape index: {}]   ;;  %s8185_s1 = inlined_call_operand.vmem [shape: f32[128,64], index: 1, kind: input, shape index: {}]   ;;  %s8186_s2 = inlined_call_operand.vmem [shape: f32[128,64], index: 2, kind: input, shape index: {}]   ;;  %s8187_s3 = inlined_call_operand.vmem [shape: f32[128,64], index: 3, kind: input, shape index: {}]   ;;  %s8188_s4 = inlined_call_operand.vmem [shape: f32[128,64], index: 4, kind: input, shape index: {}]   ;;  %s8189_s5 = inlined_call_operand.vmem [shape: f32[64,64], index: 5, kind: input, shape index: {}]   ;;  %s8190_s6 = inlined_call_operand.vmem [shape: bf16[512,64], index: 6, kind: input, shape index: {}]   ;;  %s8191_s7 = inlined_call_operand.vmem [shape: bf16[512,64], index: 7, kind: input, shape index: {}]   ;;  %s8192_s8 = inlined_call_operand.vmem [shape: f32[128,512], index: 8, kind: input, shape index: {}]   ;;  %s8193_s9 = inlined_call_operand.vmem [shape: bf16[64,64], index: 9, kind: input, shape index: {}]   ;;  %s8194_s10 = inlined_call_operand.vmem [shape: bf16[64,64], index: 10, kind: input, shape index: {}]   ;;  %s8195_s11 = inlined_call_operand.vmem [shape: bf16[64,64], index: 11, kind: input, shape index: {}]   ;;  %s8196_s12 = inlined_call_operand.vmem [shape: bf16[64,64], index: 12, kind: input, shape index: {}]   ;;  %s8197_s13 = inlined_call_operand.vmem [shape: bf16[64,256], index: 13, kind: input, shape index: {}]   ;;  %s8198_s14 = inlined_call_operand.vmem [shape: bf16[256,64], index: 14, kind: input, shape index: {}]   ;;  %s8199_s15 = inlined_call_operand.vmem [shape: f32[2,128,64], index: 15, kind: output, shape index: {}]  }
   0x1 LB: > { %s4592_s19 = sadd.s32 4294967295, %s5928_s18   ;;  %p4596_p0 = scmp.ge.s32.totalorder %s5928_s18, 1  ;;  %s5928_s18 = sphi %s6013_s18, %s25_s18  }
   0x2   : > { %p437_p1 = scmp.lt.s32.totalorder %s5928_s18, 3 }
   0x4   : > { %p438_p2 = pnand %p4596_p0, %p437_p1 }
   0x6   : > { %441 = sbr.rel (%p438_p2) target bundleno = 2314 (0x90a), region = 80 }
   0xb   : > { %p485_p3 = scmp.lt.s32.totalorder %s4592_s19, 1  ;;  %vm528_vm0 = vcmask 523264   ;;  %v5480_v46 = vld [vmem:[%s8193_s9 + $0x18] sm:$0xff]   ;;  %v5482_v50 = vld [vmem:[%s8193_s9 + $0x10] sm:$0xff]   ;;  %v5484_v52 = vld [vmem:[%s8193_s9 + $0x8] sm:$0xff]   ;;  %s5930_s16 = smov 96  }
   0xc   : > { %v5481_v47 = vld [vmem:[%s8194_s10 + $0x18] sm:$0xff]   ;;  %5277 = vmatprep.subr.bf16.mxu0 %v5480_v46  ;;  %v5483_v51 = vld [vmem:[%s8194_s10 + $0x10] sm:$0xff]   ;;  %v5485_v53 = vld [vmem:[%s8194_s10 + $0x8] sm:$0xff]   ;;  %s5931_s17 = smov 32   ;;  %vm1695_vm1 = vcmask 261120  }
   0xd   : > { %s8257_s19 = smov (!%p485_p3, %s4592_s19), 1  ;;  %5301 = vmatprep.subr.bf16.mxu1 %v5481_v47  ;;  %5278 = vmatpush3.bf16.msra.mxu0 %v5480_v46  ;;  %v5486_v54 = vld [vmem:[%s8193_s9] sm:$0xff]   ;;  %v6154_v56 = vld [vmem:[%s8195_s11 + $0x18] sm:$0xff]  }
   0xe   : > { %s4795_s20 = sshll.u32 %s8257_s19, 7  ;;  %5302 = vmatpush3.bf16.msra.mxu1 %v5481_v47  ;;  %5279 = vmatprep.subr.bf16.mxu0 %v5482_v50  ;;  %v5487_v55 = vld [vmem:[%s8194_s10] sm:$0xff]   ;;  %v6160_v57 = vld [vmem:[%s8189_s5 + $0x38] sm:$0xff] }
   0xf   : > { %s6029_s23 = scalar_lea.vmem %s8184_s0, %s4795_s20  ;;  %5303 = vmatprep.subr.bf16.mxu1 %v5483_v51 }
  0x10   : > { %v6032_v0 = vld [vmem:[%s6029_s23 + $0x10] sm:$0xff]  ;;  %v6035_v1 = vld [vmem:[%s6029_s23] sm:$0xff]  ;;  %v6038_v2 = vld [vmem:[%s6029_s23 + $0x18] sm:$0xff] }
  0x11   : > { %v514_v3 = vmul.f32 %v6032_v0, %v6032_v0  ;;  %v512_v4 = vmul.f32 %v6035_v1, %v6035_v1  ;;  %v515_v5 = vmul.f32 %v6038_v2, %v6038_v2  ;;  %v6047_v6 = vld [vmem:[%s6029_s23 + $0x8] sm:$0xff]  ;;  %v6053_v8 = vld [vmem:[%s6029_s23 + $0x20] sm:$0xff]  ;;  %v6060_v11 = vld [vmem:[%s6029_s23 + $0x38] sm:$0xff]  ;;  %5280 = vmatpush3.bf16.msra.mxu0 %v5482_v50 }
  0x12   : > { %v6050_v7 = vld [vmem:[%s6029_s23 + $0x28] sm:$0xff]  ;;  %v513_v9 = vmul.f32 %v6047_v6, %v6047_v6  ;;  %v6063_v12 = vld [vmem:[%s6029_s23 + $0x30] sm:$0xff]  ;;  %v516_v16 = vmul.f32 %v6053_v8, %v6053_v8  ;;  %v519_v17 = vmul.f32 %v6060_v11, %v6060_v11  ;;  %v6075_v18 = vld [vmem:[%s6029_s23 + $0x40] sm:$0xff]  ;;  %5304 = vmatpush3.bf16.msra.mxu1 %v5483_v51  ;;  %5281 = vmatprep.subr.bf16.mxu0 %v5484_v52 }
  0x13   : > { %v517_v10 = vmul.f32 %v6050_v7, %v6050_v7  ;;  %v6066_v13 = vld [vmem:[%s6029_s23 + $0x48] sm:$0xff]  ;;  %v535_v14 = vsel %vm528_vm0, %v514_v3, 0.0  ;;  %v529_v15 = vsel %vm528_vm0, %v512_v4, 0.0  ;;  %v6078_v19 = vld [vmem:[%s6029_s23 + $0x58] sm:$0xff]  ;;  %v6081_v20 = vld [vmem:[%s6029_s23 + $0x50] sm:$0xff]  ;;  %v538_v21 = vsel %vm528_vm0, %v515_v5, 0.0  ;;  %5305 = vmatprep.subr.bf16.mxu1 %v5485_v53 }
  0x14   : > { %536 = vadd.xlane.f32.xlu1 %v535_v14  ;;  %530 = vadd.xlane.f32.xlu0 %v529_v15  ;;  %v518_v22 = vmul.f32 %v6063_v12, %v6063_v12  ;;  %v532_v23 = vsel %vm528_vm0, %v513_v9, 0.0  ;;  %v521_v24 = vmul.f32 %v6066_v13, %v6066_v13  ;;  %v520_v25 = vmul.f32 %v6075_v18, %v6075_v18  ;;  %v6104_v36 = vld [vmem:[%s6029_s23 + $0x68] sm:$0xff]  ;;  %v6107_v37 = vld [vmem:[%s6029_s23 + $0x60] sm:$0xff]  ;;  %v6110_v38 = vld [vmem:[%s6029_s23 + $0x78] sm:$0xff] }
  0x15   : > { %v523_v26 = vmul.f32 %v6078_v19, %v6078_v19  ;;  %v522_v27 = vmul.f32 %v6081_v20, %v6081_v20  ;;  %v544_v28 = vsel %vm528_vm0, %v517_v10, 0.0  ;;  %v541_v29 = vsel %vm528_vm0, %v516_v16, 0.0  ;;  %v6113_v39 = vld [vmem:[%s6029_s23 + $0x70] sm:$0xff]  ;;  %5282 = vmatpush3.bf16.msra.mxu0 %v5484_v52 }
  0x16   : > { %v550_v30 = vsel %vm528_vm0, %v519_v17, 0.0  ;;  %v547_v31 = vsel %vm528_vm0, %v518_v22, 0.0  ;;  %v556_v32 = vsel %vm528_vm0, %v521_v24, 0.0  ;;  %v553_v33 = vsel %vm528_vm0, %v520_v25, 0.0  ;;  %5306 = vmatpush3.bf16.msra.mxu1 %v5485_v53  ;;  %5283 = vmatprep.subr.bf16.mxu0 %v5486_v54 }
  0x17   : > { %v562_v34 = vsel %vm528_vm0, %v523_v26, 0.0  ;;  %v559_v35 = vsel %vm528_vm0, %v522_v27, 0.0  ;;  %v525_v40 = vmul.f32 %v6104_v36, %v6104_v36  ;;  %v524_v41 = vmul.f32 %v6107_v37, %v6107_v37  ;;  %5307 = vmatprep.subr.bf16.mxu1 %v5487_v55 }
  0x18   : > { %539 = vadd.xlane.f32.xlu1 %v538_v21  ;;  %533 = vadd.xlane.f32.xlu0 %v532_v23  ;;  %v527_v44 = vmul.f32 %v6110_v38, %v6110_v38  ;;  %v526_v45 = vmul.f32 %v6113_v39, %v6113_v39 }
  0x19   : > { %v568_v42 = vsel %vm528_vm0, %v525_v40, 0.0  ;;  %v565_v43 = vsel %vm528_vm0, %v524_v41, 0.0  ;;  %5284 = vmatpush3.bf16.msra.mxu0 %v5486_v54 }
  0x1a   : > { %v574_v48 = vsel %vm528_vm0, %v527_v44, 0.0  ;;  %v571_v49 = vsel %vm528_vm0, %v526_v45, 0.0  ;;  %5308 = vmatpush3.bf16.msra.mxu1 %v5487_v55  ;;  %5325 = vmatprep.subr.bf16.mxu0 %v6154_v56 }
  0x1b   : > { %5349 = vmatprep.subr.mxu1 %v6160_v57 }
  0x1c   : > { %545 = vadd.xlane.f32.xlu1 %v544_v28  ;;  %542 = vadd.xlane.f32.xlu0 %v541_v29 }
  0x20   : > { %551 = vadd.xlane.f32.xlu1 %v550_v30  ;;  %548 = vadd.xlane.f32.xlu0 %v547_v31 }
  0x24   : > { %557 = vadd.xlane.f32.xlu1 %v556_v32  ;;  %554 = vadd.xlane.f32.xlu0 %v553_v33 }
  0x28   : > { %563 = vadd.xlane.f32.xlu1 %v562_v34  ;;  %560 = vadd.xlane.f32.xlu0 %v559_v35 }
  0x2c   : > { %569 = vadd.xlane.f32.xlu1 %v568_v42  ;;  %566 = vadd.xlane.f32.xlu0 %v565_v43 }
  0x30   : > { %575 = vadd.xlane.f32.xlu1 %v574_v48  ;;  %572 = vadd.xlane.f32.xlu0 %v571_v49 }
  0x9d   : > { %v537_v58 = vpop.xlane.xlu1 %536  ;;  %v531_v59 = vpop.xlane.xlu0 %530 }
  0x9e   : > { %v580_v60 = vmul.f32 0.015625, %v537_v58  ;;  %v578_v61 = vmul.f32 0.015625, %v531_v59 }
  0xa0   : > { %v596_v62 = vadd.f32 1.1920929e-07, %v580_v60  ;;  %v594_v63 = vadd.f32 1.1920929e-07, %v578_v61 }
  0xa1   : > { %v540_v3 = vpop.xlane.xlu1 %539  ;;  %v534_v4 = vpop.xlane.xlu0 %533 }
  0xa2   : > { %v581_v5 = vmul.f32 0.015625, %v540_v3  ;;  %v579_v9 = vmul.f32 0.015625, %v534_v4  ;;  %5588 = vrsqrt.f32 %v596_v62 }
  0xa3   : > { %5590 = vrsqrt.f32 %v594_v63 }
  0xa4   : > { %v597_v10 = vadd.f32 1.1920929e-07, %v581_v5  ;;  %v595_v14 = vadd.f32 1.1920929e-07, %v579_v9  ;;  %v6183_v9 = vld [vmem:[%s8189_s5 + $0x30] sm:$0xff] }
  0xa5   : > { %v546_v15 = vpop.xlane.xlu1 %545  ;;  %v543_v16 = vpop.xlane.xlu0 %542 }
  0xa6   : > { %5592 = vrsqrt.f32 %v597_v10  ;;  %v583_v17 = vmul.f32 0.015625, %v546_v15  ;;  %v582_v21 = vmul.f32 0.015625, %v543_v16 }
  0xa7   : > { %5594 = vrsqrt.f32 %v595_v14 }
  0xa8   : > { %v599_v22 = vadd.f32 1.1920929e-07, %v583_v17  ;;  %v598_v23 = vadd.f32 1.1920929e-07, %v582_v21 }
  0xa9   : > { %v552_v24 = vpop.xlane.xlu1 %551  ;;  %v549_v25 = vpop.xlane.xlu0 %548 }
  0xaa   : > { %5596 = vrsqrt.f32 %v599_v22  ;;  %v585_v26 = vmul.f32 0.015625, %v552_v24  ;;  %v584_v27 = vmul.f32 0.015625, %v549_v25  ;;  %v5490_v22 = vld [vmem:[%s8195_s11 + $0x8] sm:$0xff]  }
  0xab   : > { %5598 = vrsqrt.f32 %v598_v23  ;;  %v6200_v23 = vld [vmem:[%s8189_s5 + $0x28] sm:$0xff] }
  0xac   : > { %v601_v28 = vadd.f32 1.1920929e-07, %v585_v26  ;;  %v600_v29 = vadd.f32 1.1920929e-07, %v584_v27 }
  0xad   : > { %v558_v30 = vpop.xlane.xlu1 %557  ;;  %v555_v31 = vpop.xlane.xlu0 %554 }
  0xae   : > { %5600 = vrsqrt.f32 %v601_v28  ;;  %v587_v32 = vmul.f32 0.015625, %v558_v30  ;;  %v586_v33 = vmul.f32 0.015625, %v555_v31 }
  0xaf   : > { %5602 = vrsqrt.f32 %v600_v29  ;;  %v5589_v40 = vpop.eup %5588  ;;  %v1064_v29 = vld [vmem:[%s8189_s5 + $0x18] sm:$0xff] }
  0xb0   : > { %v603_v34 = vadd.f32 1.1920929e-07, %v587_v32  ;;  %v602_v35 = vadd.f32 1.1920929e-07, %v586_v33  ;;  %v5591_v43 = vpop.eup %5590  ;;  %v628_v50 = vmul.f32 %v5589_v40, %v6032_v0 }
  0xb1   : > { %v564_v41 = vpop.xlane.xlu1 %563  ;;  %v561_v42 = vpop.xlane.xlu0 %560  ;;  %v626_v54 = vmul.f32 %v5591_v43, %v6035_v1  ;;  %v5489_v1 = vld [vmem:[%s8195_s11 + $0x10] sm:$0xff]  }
  0xb2   : > { %5604 = vrsqrt.f32 %v603_v34  ;;  %v589_v44 = vmul.f32 0.015625, %v564_v41  ;;  %v588_v45 = vmul.f32 0.015625, %v561_v42 }
  0xb3   : > { %v5593_v46 = vpop.eup %5592  ;;  %5606 = vrsqrt.f32 %v602_v35 }
  0xb4   : > { %v5595_v47 = vpop.eup %5594  ;;  %v605_v48 = vadd.f32 1.1920929e-07, %v589_v44  ;;  %v604_v49 = vadd.f32 1.1920929e-07, %v588_v45  ;;  %v629_v51 = vmul.f32 %v5593_v46, %v6038_v2 }
  0xb5   : > { %v570_v52 = vpop.xlane.xlu1 %569  ;;  %v567_v53 = vpop.xlane.xlu0 %566  ;;  %v627_v55 = vmul.f32 %v5595_v47, %v6047_v6 }
  0xb6   : > { %5608 = vrsqrt.f32 %v605_v48  ;;  %v591_v58 = vmul.f32 0.015625, %v570_v52  ;;  %v590_v59 = vmul.f32 0.015625, %v567_v53  ;;  %v6167_v60 = vpack.c.bf16 %v629_v51, %v628_v50 }
  0xb7   : > { %v5597_v61 = vpop.eup %5596  ;;  %5610 = vrsqrt.f32 %v604_v49  ;;  %v6169_v62 = vpack.c.bf16 %v627_v55, %v626_v54 }
  0xb8   : > { %v5599_v63 = vpop.eup %5598  ;;  %v607_v3 = vadd.f32 1.1920929e-07, %v591_v58  ;;  %v606_v0 = vadd.f32 1.1920929e-07, %v590_v59  ;;  %v631_v2 = vmul.f32 %v5597_v61, %v6050_v7 }
  0xb9   : > { %5285 = vmatprep.mubr.msk.bf16.mxu0 %vm528_vm0, %v6169_v62  ;;  %5309 = vmatprep.mubr.msk.bf16.mxu1 %vm528_vm0, %v6169_v62  ;;  %v576_v6 = vpop.xlane.xlu1 %575  ;;  %v573_v4 = vpop.xlane.xlu0 %572  ;;  %v630_v5 = vmul.f32 %v5599_v63, %v6053_v8 }
  0xba   : > { %5612 = vrsqrt.f32 %v607_v3  ;;  %5286 = vmatmul.mubr.msk.bf16.vlgmr.msra.gmra.mxu0 %vm528_vm0, %v6167_v60  ;;  %5310 = vmatmul.mubr.msk.bf16.vlgmr.msra.gmra.mxu1 %vm528_vm0, %v6167_v60  ;;  %v593_v7 = vmul.f32 0.015625, %v576_v6  ;;  %v592_v10 = vmul.f32 0.015625, %v573_v4 }
  0xbb   : > { %v5601_v14 = vpop.eup %5600  ;;  %5614 = vrsqrt.f32 %v606_v0  ;;  %v6189_v15 = vpack.c.bf16 %v631_v2, %v630_v5  ;;  %5326 = vmatpush3.bf16.msra.mxu0 %v6154_v56  ;;  %5350 = vmatpush3.msra.mxu1 %v6160_v57  ;;  %v1065_v56 = vld [vmem:[%s8189_s5 + $0x20] sm:$0xff] }
  0xbc   : > { %v5603_v8 = vpop.eup %5602  ;;  %v609_v16 = vadd.f32 1.1920929e-07, %v593_v7  ;;  %v608_v17 = vadd.f32 1.1920929e-07, %v592_v10  ;;  %v633_v21 = vmul.f32 %v5601_v14, %v6060_v11  ;;  %5327 = vmatprep.subr.bf16.mxu0 %v5489_v1  ;;  %5351 = vmatprep.subr.mxu1 %v6183_v9 }
  0xbd   : > { %5289 = vmatprep.mubr.msk.bf16.mxu0 %vm528_vm0, %v6189_v15  ;;  %5313 = vmatprep.mubr.msk.bf16.mxu1 %vm528_vm0, %v6189_v15  ;;  %v632_v11 = vmul.f32 %v5603_v8, %v6063_v12  ;;  %v5491_v12 = vld [vmem:[%s8195_s11] sm:$0xff]  }
  0xbe   : > { %5616 = vrsqrt.f32 %v609_v16  ;;  %5352 = vmatpush3.msra.mxu1 %v6183_v9 }
  0xbf   : > { %v5605_v24 = vpop.eup %5604  ;;  %5618 = vrsqrt.f32 %v608_v17  ;;  %v645_v25 = vpack.c.bf16 %v633_v21, %v632_v11  ;;  %5328 = vmatpush3.bf16.msra.mxu0 %v5489_v1  ;;  %5353 = vmatprep.subr.mxu1 %v6200_v23 }
  0xc0   : > { %v5607_v26 = vpop.eup %5606  ;;  %v635_v27 = vmul.f32 %v5605_v24, %v6066_v13  ;;  %5329 = vmatprep.subr.bf16.mxu0 %v5490_v22  ;;  %5354 = vmatpush3.msra.mxu1 %v6200_v23 }
  0xc1   : > { %v634_v28 = vmul.f32 %v5607_v26, %v6075_v18  ;;  %5355 = vmatprep.subr.mxu1 %v1065_v56  ;;  %v1063_v18 = vld [vmem:[%s8189_s5 + $0x10] sm:$0xff] }
  0xc2   : > { %5290 = vmatmul.mubr.msk.bf16.gmra.mxu0 %vm528_vm0, %v645_v25  ;;  %5314 = vmatmul.mubr.msk.bf16.gmra.mxu1 %vm528_vm0, %v645_v25 }
  0xc3   : > { %v5609_v30 = vpop.eup %5608  ;;  %v646_v13 = vpack.c.bf16 %v635_v27, %v634_v28  ;;  %5330 = vmatpush3.bf16.msra.mxu0 %v5490_v22  ;;  %5356 = vmatpush3.msra.mxu1 %v1065_v56 }
  0xc4   : > { %v5611_v31 = vpop.eup %5610  ;;  %v637_v32 = vmul.f32 %v5609_v30, %v6078_v19  ;;  %5331 = vmatprep.subr.bf16.mxu0 %v5491_v12  ;;  %5357 = vmatprep.subr.mxu1 %v1064_v29 }
  0xc5   : > { %5293 = vmatprep.mubr.msk.bf16.mxu0 %vm528_vm0, %v646_v13  ;;  %5317 = vmatprep.mubr.msk.bf16.mxu1 %vm528_vm0, %v646_v13  ;;  %v636_v33 = vmul.f32 %v5611_v31, %v6081_v20 }
  0xc6   : > { %5358 = vmatpush3.msra.mxu1 %v1064_v29 }
  0xc7   : > { %v5613_v34 = vpop.eup %5612  ;;  %v647_v35 = vpack.c.bf16 %v637_v32, %v636_v33  ;;  %5332 = vmatpush3.bf16.msra.mxu0 %v5491_v12  ;;  %5359 = vmatprep.subr.mxu1 %v1063_v18 }
  0xc8   : > { %v5615_v40 = vpop.eup %5614  ;;  %v639_v19 = vmul.f32 %v5613_v34, %v6104_v36  ;;  %5389 = vmatprep.subr.mxu0 %v6160_v57  ;;  %5360 = vmatpush3.msra.mxu1 %v1063_v18 }
  0xc9   : > { %v638_v41 = vmul.f32 %v5615_v40, %v6107_v37  ;;  %v1062_v37 = vld [vmem:[%s8189_s5 + $0x8] sm:$0xff] }
  0xca   : > { %5294 = vmatmul.mubr.msk.bf16.gmra.mxu0 %vm528_vm0, %v647_v35  ;;  %5318 = vmatmul.mubr.msk.bf16.gmra.mxu1 %vm528_vm0, %v647_v35 }
  0xcb   : > { %v5617_v42 = vpop.eup %5616  ;;  %v648_v43 = vpack.c.bf16 %v639_v19, %v638_v41  ;;  %5361 = vmatprep.subr.mxu1 %v1062_v37 }
  0xcc   : > { %v5619_v20 = vpop.eup %5618  ;;  %v641_v44 = vmul.f32 %v5617_v42, %v6110_v38  ;;  %5362 = vmatpush3.msra.mxu1 %v1062_v37  ;;  %v1061_v38 = vld [vmem:[%s8189_s5] sm:$0xff] }
  0xcd   : > { %5297 = vmatprep.mubr.msk.bf16.mxu0 %vm528_vm0, %v648_v43  ;;  %5321 = vmatprep.mubr.msk.bf16.mxu1 %vm528_vm0, %v648_v43  ;;  %v640_v36 = vmul.f32 %v5619_v20, %v6113_v39 }
  0xce   : > { %5363 = vmatprep.subr.mxu1 %v1061_v38 }
  0xcf   : > { %v649_v45 = vpack.c.bf16 %v641_v44, %v640_v36  ;;  %5364 = vmatpush3.msra.mxu1 %v1061_v38 }
  0xd2   : > { %5298 = vmatmul.mubr.msk.bf16.gmra.mxu0 %vm528_vm0, %v649_v45  ;;  %5322 = vmatmul.mubr.msk.bf16.gmra.mxu1 %vm528_vm0, %v649_v45 }
  0xd3   : > { %5333 = vmatprep.mubr.msk.bf16.mxu0 %vm528_vm0, %v6169_v62 }
  0xda   : > { %5334 = vmatmul.mubr.msk.bf16.vlgmr.msra.gmra.mxu0 %vm528_vm0, %v6167_v60 }
  0xdb   : > { %5337 = vmatprep.mubr.msk.bf16.mxu0 %vm528_vm0, %v6189_v15  ;;  %5390 = vmatpush3.msra.mxu0 %v6160_v57 }
  0xdc   : > { %5391 = vmatprep.subr.mxu0 %v6183_v9 }
  0xdd   : > { %5392 = vmatpush3.msra.mxu0 %v6183_v9 }
  0xde   : > { %5393 = vmatprep.subr.mxu0 %v6200_v23 }
  0xdf   : > { %5394 = vmatpush3.msra.mxu0 %v6200_v23 }
  0xe0   : > { %5395 = vmatprep.subr.mxu0 %v1065_v56 }
  0xe1   : > { %5396 = vmatpush3.msra.mxu0 %v1065_v56 }
  0xe2   : > { %5338 = vmatmul.mubr.msk.bf16.gmra.mxu0 %vm528_vm0, %v645_v25  ;;  %5397 = vmatprep.subr.mxu0 %v1064_v29 }
  0xe3   : > { %5341 = vmatprep.mubr.msk.bf16.mxu0 %vm528_vm0, %v646_v13  ;;  %5398 = vmatpush3.msra.mxu0 %v1064_v29 }
  0xe4   : > { %5399 = vmatprep.subr.mxu0 %v1063_v18 }
  0xe5   : > { %5400 = vmatpush3.msra.mxu0 %v1063_v18 }
  0xe6   : > { %5401 = vmatprep.subr.mxu0 %v1062_v37 }
  0xe7   : > { %5402 = vmatpush3.msra.mxu0 %v1062_v37 }
  0xe8   : > { %5403 = vmatprep.subr.mxu0 %v1061_v38 }
  0xe9   : > { %5404 = vmatpush3.msra.mxu0 %v1061_v38 }
  0xea   : > { %5342 = vmatmul.mubr.msk.bf16.gmra.mxu0 %vm528_vm0, %v647_v35 }
  0xeb   : > { %5345 = vmatprep.mubr.msk.bf16.mxu0 %vm528_vm0, %v648_v43 }
  0xf2   : > { %5346 = vmatmul.mubr.msk.bf16.gmra.mxu0 %vm528_vm0, %v649_v45 }
 0x17a   : > { %v6264_v39 = vpop.f32.mrf.mxu0  ;;  %v6266_v57 = vpop.f32.mrf.mxu1 }
 0x17b   : > { %v1071_v58 = vmul.f32 %v6264_v39, %v6264_v39  ;;  %v1312_v59 = vmul.f32 %v6266_v57, %v6266_v57 }
 0x17c   : > { %v6268_v46 = vpop.f32.mrf.mxu0  ;;  %v6270_v47 = vpop.f32.mrf.mxu1 }
 0x17d   : > { %v1069_v48 = vmul.f32 %v6268_v46, %v6268_v46  ;;  %v1310_v49 = vmul.f32 %v6270_v47, %v6270_v47 }
 0x17e   : > { %v6276_v50 = vpop.f32.mrf.mxu0  ;;  %v6278_v51 = vpop.f32.mrf.mxu1 }
 0x17f   : > { %5365 = vmatprep.mubr.msk.f32.mxu1 %vm528_vm0, %v1069_v48  ;;  %5405 = vmatprep.mubr.msk.f32.mxu0 %vm528_vm0, %v1310_v49  ;;  %v1072_v3 = vmul.f32 %v6276_v50, %v6276_v50  ;;  %v1313_v0 = vmul.f32 %v6278_v51, %v6278_v51 }
 0x180   : > { %v6282_v52 = vpop.f32.mrf.mxu0  ;;  %v6284_v53 = vpop.f32.mrf.mxu1 }
 0x181   : > { %v1070_v54 = vmul.f32 %v6282_v52, %v6282_v52  ;;  %v1311_v55 = vmul.f32 %v6284_v53, %v6284_v53 }
 0x182   : > { %v6294_v60 = vpop.f32.mrf.mxu0  ;;  %v6296_v61 = vpop.f32.mrf.mxu1 }
 0x183   : > { %5366 = vmatmul.mubr.msk.f32.vlgmr.msra.gmra.mxu1 %vm528_vm0, %v1070_v54  ;;  %5406 = vmatmul.mubr.msk.f32.vlgmr.msra.gmra.mxu0 %vm528_vm0, %v1311_v55  ;;  %v1075_v14 = vmul.f32 %v6294_v60, %v6294_v60  ;;  %v1316_v15 = vmul.f32 %v6296_v61, %v6296_v61 }
 0x184   : > { %v6300_v62 = vpop.f32.mrf.mxu0  ;;  %v6302_v63 = vpop.f32.mrf.mxu1  ;;  %5368 = vmatprep.mubr.msk.f32.mxu1 %vm528_vm0, %v1071_v58  ;;  %5408 = vmatprep.mubr.msk.f32.mxu0 %vm528_vm0, %v1312_v59 }
 0x185   : > { %v1073_v2 = vmul.f32 %v6300_v62, %v6300_v62  ;;  %v1314_v1 = vmul.f32 %v6302_v63, %v6302_v63 }
 0x186   : > { %v6314_v6 = vpop.f32.mrf.mxu0  ;;  %v6316_v4 = vpop.f32.mrf.mxu1 }
 0x187   : > { %5369 = vmatmul.mubr.msk.f32.gmra.mxu1 %vm528_vm0, %v1072_v3  ;;  %5409 = vmatmul.mubr.msk.f32.gmra.mxu0 %vm528_vm0, %v1313_v0  ;;  %v1076_v22 = vmul.f32 %v6314_v6, %v6314_v6  ;;  %v1317_v23 = vmul.f32 %v6316_v4, %v6316_v4 }
 0x188   : > { %v6320_v5 = vpop.f32.mrf.mxu0  ;;  %v6322_v9 = vpop.f32.mrf.mxu1  ;;  %5371 = vmatprep.mubr.msk.f32.mxu1 %vm528_vm0, %v1073_v2  ;;  %5411 = vmatprep.mubr.msk.f32.mxu0 %vm528_vm0, %v1314_v1 }
 0x189   : > { %v1074_v7 = vmul.f32 %v6320_v5, %v6320_v5  ;;  %v1315_v10 = vmul.f32 %v6322_v9, %v6322_v9 }
 0x18a   : > { %v6334_v8 = vpop.f32.mrf.mxu0  ;;  %v6336_v16 = vpop.f32.mrf.mxu1 }
 0x18b   : > { %5372 = vmatmul.mubr.msk.f32.gmra.mxu1 %vm528_vm0, %v1074_v7  ;;  %5412 = vmatmul.mubr.msk.f32.gmra.mxu0 %vm528_vm0, %v1315_v10  ;;  %v1079_v29 = vmul.f32 %v6334_v8, %v6334_v8  ;;  %v1320_v30 = vmul.f32 %v6336_v16, %v6336_v16 }
 0x18c   : > { %v6340_v17 = vpop.f32.mrf.mxu0  ;;  %v6342_v21 = vpop.f32.mrf.mxu1  ;;  %5374 = vmatprep.mubr.msk.f32.mxu1 %vm528_vm0, %v1075_v14  ;;  %5414 = vmatprep.mubr.msk.f32.mxu0 %vm528_vm0, %v1316_v15 }
 0x18d   : > { %v1077_v11 = vmul.f32 %v6340_v17, %v6340_v17  ;;  %v1318_v56 = vmul.f32 %v6342_v21, %v6342_v21 }
 0x18e   : > { %v6354_v24 = vpop.f32.mrf.mxu0  ;;  %v6356_v25 = vpop.f32.mrf.mxu1 }
 0x18f   : > { %5375 = vmatmul.mubr.msk.f32.gmra.mxu1 %vm528_vm0, %v1076_v22  ;;  %5415 = vmatmul.mubr.msk.f32.gmra.mxu0 %vm528_vm0, %v1317_v23  ;;  %v1080_v33 = vmul.f32 %v6354_v24, %v6354_v24  ;;  %v1321_v34 = vmul.f32 %v6356_v25, %v6356_v25 }
 0x190   : > { %v6360_v26 = vpop.f32.mrf.mxu0  ;;  %v6362_v27 = vpop.f32.mrf.mxu1  ;;  %5377 = vmatprep.mubr.msk.f32.mxu1 %vm528_vm0, %v1077_v11  ;;  %5417 = vmatprep.mubr.msk.f32.mxu0 %vm528_vm0, %v1318_v56 }
 0x191   : > { %v1078_v12 = vmul.f32 %v6360_v26, %v6360_v26  ;;  %v1319_v28 = vmul.f32 %v6362_v27, %v6362_v27 }
 0x192   : > { %v6374_v13 = vpop.f32.mrf.mxu0  ;;  %v6376_v31 = vpop.f32.mrf.mxu1 }
 0x193   : > { %5378 = vmatmul.mubr.msk.f32.gmra.mxu1 %vm528_vm0, %v1078_v12  ;;  %5418 = vmatmul.mubr.msk.f32.gmra.mxu0 %vm528_vm0, %v1319_v28  ;;  %v1083_v36 = vmul.f32 %v6374_v13, %v6374_v13  ;;  %v1324_v45 = vmul.f32 %v6376_v31, %v6376_v31 }
 0x194   : > { %v6380_v32 = vpop.f32.mrf.mxu0  ;;  %v6382_v18 = vpop.f32.mrf.mxu1  ;;  %5380 = vmatprep.mubr.msk.f32.mxu1 %vm528_vm0, %v1079_v29  ;;  %5420 = vmatprep.mubr.msk.f32.mxu0 %vm528_vm0, %v1320_v30 }
 0x195   : > { %v1081_v35 = vmul.f32 %v6380_v32, %v6380_v32  ;;  %v1322_v40 = vmul.f32 %v6382_v18, %v6382_v18 }
 0x196   : > { %v6394_v19 = vpop.f32.mrf.mxu0  ;;  %v6396_v41 = vpop.f32.mrf.mxu1 }
 0x197   : > { %5381 = vmatmul.mubr.msk.f32.gmra.mxu1 %vm528_vm0, %v1080_v33  ;;  %5421 = vmatmul.mubr.msk.f32.gmra.mxu0 %vm528_vm0, %v1321_v34  ;;  %v1084_v48 = vmul.f32 %v6394_v19, %v6394_v19  ;;  %v1325_v49 = vmul.f32 %v6396_v41, %v6396_v41 }
 0x198   : > { %v6400_v42 = vpop.f32.mrf.mxu0  ;;  %v6402_v43 = vpop.f32.mrf.mxu1  ;;  %5383 = vmatprep.mubr.msk.f32.mxu1 %vm528_vm0, %v1081_v35  ;;  %5423 = vmatprep.mubr.msk.f32.mxu0 %vm528_vm0, %v1322_v40 }
 0x199   : > { %v1082_v20 = vmul.f32 %v6400_v42, %v6400_v42  ;;  %v1323_v44 = vmul.f32 %v6402_v43, %v6402_v43 }
 0x19a   : > { %v5335_v37 = vpop.f32.mrf.mxu0 }
 0x19b   : > { %5384 = vmatmul.mubr.msk.f32.gmra.mxu1 %vm528_vm0, %v1082_v20  ;;  %5424 = vmatmul.mubr.msk.f32.gmra.mxu0 %vm528_vm0, %v1323_v44 }
 0x19c   : > { %v6416_v38 = vpop.f32.mrf.mxu0  ;;  %5386 = vmatprep.mubr.msk.f32.mxu1 %vm528_vm0, %v1083_v36  ;;  %5426 = vmatprep.mubr.msk.f32.mxu0 %vm528_vm0, %v1324_v45 }
 0x19d   : > { %8216 = vst [vmem:[#allocation2_spill] sm:$0xff] %v6416_v38 }
 0x19e   : > { %v5336_v54 = vpop.f32.mrf.mxu0 }
 0x19f   : > { %v6424_v55 = vpack.c.bf16 %v5336_v54, %v5335_v37  ;;  %5387 = vmatmul.mubr.msk.f32.gmra.mxu1 %vm528_vm0, %v1084_v48  ;;  %5427 = vmatmul.mubr.msk.f32.gmra.mxu0 %vm528_vm0, %v1325_v49 }
 0x1a0   : > { %v6428_v58 = vpop.f32.mrf.mxu0 }
 0x1a1   : > { %8217 = vst [vmem:[#allocation3_spill] sm:$0xff] %v6424_v55  ;;  %8218 = vst [vmem:[#allocation4_spill] sm:$0xff] %v6428_v58 }
 0x1a2   : > { %v5339_v59 = vpop.f32.mrf.mxu0 }
 0x1a4   : > { %v6430_v3 = vpop.f32.mrf.mxu0 }
 0x1a5   : > { %8219 = vst [vmem:[#allocation5_spill] sm:$0xff] %v6430_v3 }
 0x1a6   : > { %v5340_v0 = vpop.f32.mrf.mxu0 }
 0x1a7   : > { %v6432_v2 = vpack.c.bf16 %v5340_v0, %v5339_v59 }
 0x1a8   : > { %v6434_v1 = vpop.f32.mrf.mxu0 }
 0x1a9   : > { %8220 = vst [vmem:[#allocation6_spill] sm:$0xff] %v6432_v2  ;;  %8221 = vst [vmem:[#allocation7_spill] sm:$0xff] %v6434_v1 }
 0x1aa   : > { %v5343_v7 = vpop.f32.mrf.mxu0 }
 0x1ac   : > { %v6436_v10 = vpop.f32.mrf.mxu0 }
 0x1ae   : > { %v5344_v14 = vpop.f32.mrf.mxu0 }
 0x1af   : > { %v6438_v15 = vpack.c.bf16 %v5344_v14, %v5343_v7 }
 0x1b0   : > { %v6440_v22 = vpop.f32.mrf.mxu0 }
 0x1b2   : > { %v5347_v23 = vpop.f32.mrf.mxu0 }
 0x1b4   : > { %v6442_v11 = vpop.f32.mrf.mxu0 }
 0x1b6   : > { %v5348_v56 = vpop.f32.mrf.mxu0 }
 0x1b7   : > { %v6444_v12 = vpack.c.bf16 %v5348_v56, %v5347_v23 }
 0x1b8   : > { %v6446_v28 = vpop.f32.mrf.mxu0 }
 0x243   : > { %v6448_v29 = vpop.f32.mrf.mxu0 }
 0x245   : > { %v6450_v30 = vpop.f32.mrf.mxu0 }
 0x247   : > { %v6452_v33 = vpop.f32.mrf.mxu0 }
 0x249   : > { %v6454_v34 = vpop.f32.mrf.mxu0 }
 0x24b   : > { %v5413_v35 = vpop.f32.mrf.mxu0 }
 0x24d   : > { %v1460_v40 = vpop.f32.mrf.mxu0 }
 0x24f   : > { %v5416_v20 = vpop.f32.mrf.mxu0 }
 0x251   : > { %v1470_v44 = vpop.f32.mrf.mxu0 }
 0x253   : > { %v5419_v36 = vpop.f32.mrf.mxu0 }
 0x255   : > { %v1480_v45 = vpop.f32.mrf.mxu0 }
 0x256   : > { %v1481_v3 = vadd.f32 1.1920929e-07, %v1480_v45 }
 0x257   : > { %v5422_v37 = vpop.f32.mrf.mxu0 }
 0x258   : > { %v1496_v38 = vadd.f32 1.1920929e-07, %v5422_v37  ;;  %v1451_v37 = vadd.f32 1.1920929e-07, %v6454_v34  ;;  %v1456_v34 = vadd.f32 1.1920929e-07, %v6452_v33 }
 0x259   : > { %v1490_v48 = vpop.f32.mrf.mxu0 }
 0x25a   : > { %v1491_v55 = vadd.f32 1.1920929e-07, %v1490_v48 }
 0x25b   : > { %v5425_v49 = vpop.f32.mrf.mxu0 }
 0x25c   : > { %v1506_v56 = vadd.f32 1.1920929e-07, %v5425_v49  ;;  %v1441_v49 = vadd.f32 1.1920929e-07, %v6450_v30 }
 0x25d   : > { %v1500_v54 = vpop.f32.mrf.mxu0 }
 0x25e   : > { %v1501_v23 = vadd.f32 1.1920929e-07, %v1500_v54 }
 0x25f   : > { %v5428_v59 = vpop.f32.mrf.mxu0 }
 0x260   : > { %v1516_v0 = vadd.f32 1.1920929e-07, %v5428_v59 }
 0x261   : > { %v1510_v7 = vpop.f32.mrf.mxu0 }
 0x262   : > { %v1511_v14 = vadd.f32 1.1920929e-07, %v1510_v7  ;;  %5620 = vrsqrt.f32 %v1516_v0  ;;  %v5367_v0 = vpop.f32.mrf.mxu1  ;;  %v1446_v7 = vadd.f32 1.1920929e-07, %v6448_v29 }
 0x264   : > { %5622 = vrsqrt.f32 %v1511_v14  ;;  %v1199_v30 = vpop.f32.mrf.mxu1 }
 0x265   : > { %5624 = vrsqrt.f32 %v1501_v23  ;;  %v1200_v23 = vadd.f32 1.1920929e-07, %v1199_v30 }
 0x266   : > { %5626 = vrsqrt.f32 %v1506_v56  ;;  %v5370_v56 = vpop.f32.mrf.mxu1 }
 0x267   : > { %5628 = vrsqrt.f32 %v1491_v55  ;;  %v1486_v55 = vadd.f32 1.1920929e-07, %v5419_v36  ;;  %v1461_v36 = vadd.f32 1.1920929e-07, %v1460_v40 }
 0x268   : > { %5630 = vrsqrt.f32 %v1496_v38 }
 0x269   : > { %5632 = vrsqrt.f32 %v1481_v3 }
 0x26a   : > { %5634 = vrsqrt.f32 %v1486_v55  ;;  %v1205_v55 = vadd.f32 1.1920929e-07, %v5367_v0 }
 0x26f   : > { %v5621_v58 = vpop.eup %5620 }
 0x270   : > { %v6457_v2 = vmul.f32 %v5621_v58, %v6396_v41 }
 0x271   : > { %v5623_v1 = vpop.eup %5622 }
 0x272   : > { %1838 = vrot.lane.b32.xlu1 %v6457_v2, %s5930_s16  ;;  %v6462_v54 = vmul.f32 %v5623_v1, %v6376_v31  ;;  %v5625_v59 = vpop.eup %5624  ;;  %v1471_v31 = vadd.f32 1.1920929e-07, %v1470_v44  ;;  %v1476_v1 = vadd.f32 1.1920929e-07, %v5416_v20  ;;  %v1466_v20 = vadd.f32 1.1920929e-07, %v5413_v35 }
 0x273   : > { %v6469_v41 = vmul.f32 %v5625_v59, %v6382_v18  ;;  %v5627_v58 = vpop.eup %5626  ;;  %v1209_v59 = vpop.f32.mrf.mxu1 }
 0x274   : > { %1836 = vrot.lane.b32.xlu0 %v6462_v54, %s5930_s16  ;;  %v5629_v38 = vpop.eup %5628  ;;  %v6478_v3 = vmul.f32 %v5627_v58, %v6402_v43  ;;  %5636 = vrsqrt.f32 %v1471_v31  ;;  %v1210_v31 = vadd.f32 1.1920929e-07, %v1209_v59 }
 0x275   : > { %v6483_v18 = vmul.f32 %v5629_v38, %v6336_v16  ;;  %v5631_v44 = vpop.eup %5630  ;;  %5638 = vrsqrt.f32 %v1476_v1 }
 0x276   : > { %1886 = vrot.lane.b32.xlu1 %v6457_v2, %s5931_s17  ;;  %v5633_v45 = vpop.eup %5632  ;;  %v6492_v43 = vmul.f32 %v5631_v44, %v6356_v25  ;;  %5640 = vrsqrt.f32 %v1461_v36  ;;  %v1215_v36 = vadd.f32 1.1920929e-07, %v5370_v56 }
 0x277   : > { %v6497_v16 = vmul.f32 %v5633_v45, %v6342_v21  ;;  %v5635_v40 = vpop.eup %5634  ;;  %5642 = vrsqrt.f32 %v1466_v20 }
 0x278   : > { %1832 = vrot.lane.b32.xlu0 %v6469_v41, %s5930_s16  ;;  %v6507_v25 = vmul.f32 %v5635_v40, %v6362_v27  ;;  %5644 = vrsqrt.f32 %v1451_v37 }
 0x279   : > { %5646 = vrsqrt.f32 %v1456_v34 }
 0x27a   : > { %1884 = vrot.lane.b32.xlu1 %v6462_v54, %s5931_s17  ;;  %5648 = vrsqrt.f32 %v1441_v49 }
 0x27b   : > { %5650 = vrsqrt.f32 %v1446_v7 }
 0x27c   : > { %1880 = vrot.lane.b32.xlu0 %v6469_v41, %s5931_s17  ;;  %5652 = vrsqrt.f32 %v1200_v23 }
 0x27d   : > { %5654 = vrsqrt.f32 %v1205_v55 }
 0x27e   : > { %1834 = vrot.lane.b32.xlu1 %v6478_v3, %s5930_s16  ;;  %5656 = vrsqrt.f32 %v1210_v31 }
 0x27f   : > { %5658 = vrsqrt.f32 %v1215_v36 }
 0x280   : > { %1828 = vrot.lane.b32.xlu0 %v6483_v18, %s5930_s16 }
 0x281   : > { %v5637_v48 = vpop.eup %5636 }
 0x282   : > { %1882 = vrot.lane.b32.xlu1 %v6478_v3, %s5931_s17  ;;  %v6512_v21 = vmul.f32 %v5637_v48, %v6296_v61  ;;  %v5639_v35 = vpop.eup %5638 }
 0x283   : > { %v5641_v27 = vpop.eup %5640  ;;  %v6523_v61 = vmul.f32 %v5639_v35, %v6316_v4 }
 0x284   : > { %1876 = vrot.lane.b32.xlu0 %v6483_v18, %s5931_s17  ;;  %v6528_v33 = vmul.f32 %v5641_v27, %v6302_v63  ;;  %v5643_v14 = vpop.eup %5642 }
 0x285   : > { %v5645_v4 = vpop.eup %5644  ;;  %v6538_v63 = vmul.f32 %v5643_v14, %v6322_v9  ;;  %v5373_v9 = vpop.f32.mrf.mxu1 }
 0x286   : > { %1830 = vrot.lane.b32.xlu1 %v6492_v43, %s5930_s16  ;;  %v6543_v29 = vmul.f32 %v5645_v4, %v6266_v57  ;;  %v5647_v58 = vpop.eup %5646  ;;  %v1225_v34 = vadd.f32 1.1920929e-07, %v5373_v9 }
 0x287   : > { %v5649_v38 = vpop.eup %5648  ;;  %v6552_v1 = vmul.f32 %v5647_v58, %v6278_v51  ;;  %v1219_v44 = vpop.f32.mrf.mxu1 }
 0x288   : > { %1824 = vrot.lane.b32.xlu0 %v6497_v16, %s5930_s16  ;;  %v6557_v57 = vmul.f32 %v5649_v38, %v6270_v47  ;;  %v5651_v45 = vpop.eup %5650  ;;  %v1220_v20 = vadd.f32 1.1920929e-07, %v1219_v44 }
 0x289   : > { %v5653_v40 = vpop.eup %5652  ;;  %v5376_v51 = vpop.f32.mrf.mxu1  ;;  %v6566_v37 = vmul.f32 %v5651_v45, %v6284_v53 }
 0x28a   : > { %1878 = vrot.lane.b32.xlu1 %v6492_v43, %s5931_s17  ;;  %5660 = vrsqrt.f32 %v1220_v20  ;;  %v6571_v47 = vmul.f32 %v5653_v40, %v6268_v46  ;;  %v5655_v35 = vpop.eup %5654  ;;  %v1235_v7 = vadd.f32 1.1920929e-07, %v5376_v51 }
 0x28b   : > { %v1229_v48 = vpop.f32.mrf.mxu1  ;;  %v5657_v27 = vpop.eup %5656  ;;  %5662 = vrsqrt.f32 %v1225_v34  ;;  %v6580_v0 = vmul.f32 %v5655_v35, %v6282_v52 }
 0x28c   : > { %1872 = vrot.lane.b32.xlu0 %v6497_v16, %s5931_s17  ;;  %v1230_v49 = vadd.f32 1.1920929e-07, %v1229_v48  ;;  %v6585_v46 = vmul.f32 %v5657_v27, %v6264_v39  ;;  %v5659_v14 = vpop.eup %5658 }
 0x28d   : > { %v5379_v53 = vpop.f32.mrf.mxu1  ;;  %v6594_v56 = vmul.f32 %v5659_v14, %v6276_v50 }
 0x28e   : > { %1826 = vrot.lane.b32.xlu1 %v6507_v25, %s5930_s16  ;;  %5664 = vrsqrt.f32 %v1230_v49  ;;  %v1245_v55 = vadd.f32 1.1920929e-07, %v5379_v53 }
 0x28f   : > { %v1239_v30 = vpop.f32.mrf.mxu1  ;;  %5666 = vrsqrt.f32 %v1235_v7 }
 0x290   : > { %1820 = vrot.lane.b32.xlu0 %v6512_v21, %s5930_s16  ;;  %v1240_v23 = vadd.f32 1.1920929e-07, %v1239_v30 }
 0x291   : > { %v5382_v52 = vpop.f32.mrf.mxu1 }
 0x292   : > { %1874 = vrot.lane.b32.xlu1 %v6507_v25, %s5931_s17  ;;  %5668 = vrsqrt.f32 %v1240_v23  ;;  %v1255_v36 = vadd.f32 1.1920929e-07, %v5382_v52 }
 0x293   : > { %v1249_v59 = vpop.f32.mrf.mxu1  ;;  %5670 = vrsqrt.f32 %v1245_v55 }
 0x294   : > { %1868 = vrot.lane.b32.xlu0 %v6512_v21, %s5931_s17  ;;  %v1250_v31 = vadd.f32 1.1920929e-07, %v1249_v59 }
 0x295   : > { %v5385_v50 = vpop.f32.mrf.mxu1 }
 0x296   : > { %1822 = vrot.lane.b32.xlu1 %v6523_v61, %s5930_s16  ;;  %5672 = vrsqrt.f32 %v1250_v31  ;;  %v1265_v34 = vadd.f32 1.1920929e-07, %v5385_v50  ;;  %v1934_v50 = vld [vmem:[%s8188_s4 + $0x70] sm:$0xff] }
 0x297   : > { %v5661_v4 = vpop.eup %5660  ;;  %v1259_v44 = vpop.f32.mrf.mxu1  ;;  %5674 = vrsqrt.f32 %v1255_v36 }
 0x298   : > { %1816 = vrot.lane.b32.xlu0 %v6528_v33, %s5930_s16  ;;  %v6599_v39 = vmul.f32 %v5661_v4, %v6300_v62  ;;  %v5663_v58 = vpop.eup %5662  ;;  %v1260_v20 = vadd.f32 1.1920929e-07, %v1259_v44 }
 0x299   : > { %v6608_v9 = vmul.f32 %v5663_v58, %v6320_v5  ;;  %v5388_v5 = vpop.f32.mrf.mxu1  ;;  %v1935_v58 = vld [vmem:[%s8188_s4 + $0x78] sm:$0xff] }
 0x29a   : > { %1870 = vrot.lane.b32.xlu1 %v6523_v61, %s5931_s17  ;;  %5676 = vrsqrt.f32 %v1260_v20  ;;  %v1275_v53 = vadd.f32 1.1920929e-07, %v5388_v5 }
 0x29b   : > { %v5665_v38 = vpop.eup %5664  ;;  %v1269_v48 = vpop.f32.mrf.mxu1  ;;  %5678 = vrsqrt.f32 %v1265_v34 }
 0x29c   : > { %1864 = vrot.lane.b32.xlu0 %v6528_v33, %s5931_s17  ;;  %v6613_v62 = vmul.f32 %v5665_v38, %v6294_v60  ;;  %v5667_v45 = vpop.eup %5666  ;;  %v1270_v49 = vadd.f32 1.1920929e-07, %v1269_v48  ;;  %v1774_v38 = vld [vmem:[%s8187_s3 + $0x70] sm:$0xff] }
 0x29d   : > { %v6622_v51 = vmul.f32 %v5667_v45, %v6314_v6  ;;  %v1790_v5 = vmul.f32 %v1774_v38, %v6462_v54  ;;  %v5493_v54 = vld [vmem:[%s8190_s6 + $0xf8] sm:$0xff]  }
 0x29e   : > { %1818 = vrot.lane.b32.xlu1 %v6538_v63, %s5930_s16  ;;  %5680 = vrsqrt.f32 %v1270_v49 }
 0x29f   : > { %v5669_v40 = vpop.eup %5668  ;;  %5682 = vrsqrt.f32 %v1275_v53 }
 0x2a0   : > { %1812 = vrot.lane.b32.xlu0 %v6543_v29, %s5930_s16  ;;  %v6627_v60 = vmul.f32 %v5669_v40, %v6340_v17  ;;  %v5671_v35 = vpop.eup %5670 }
 0x2a1   : > { %v6636_v6 = vmul.f32 %v5671_v35, %v6360_v26  ;;  %v1932_v35 = vld [vmem:[%s8188_s4 + $0x60] sm:$0xff] }
 0x2a2   : > { %1866 = vrot.lane.b32.xlu1 %v6538_v63, %s5931_s17 }
 0x2a3   : > { %v5673_v27 = vpop.eup %5672 }
 0x2a4   : > { %1860 = vrot.lane.b32.xlu0 %v6543_v29, %s5931_s17  ;;  %v6641_v17 = vmul.f32 %v5673_v27, %v6334_v8  ;;  %v5675_v30 = vpop.eup %5674 }
 0x2a5   : > { %v6650_v26 = vmul.f32 %v5675_v30, %v6354_v24  ;;  %v5494_v30 = vld [vmem:[%s8190_s6 + $0x38] sm:$0xff]  }
 0x2a6   : > { %1814 = vrot.lane.b32.xlu1 %v6552_v1, %s5930_s16 }
 0x2a7   : > { %v5677_v7 = vpop.eup %5676 }
 0x2a8   : > { %1808 = vrot.lane.b32.xlu0 %v6557_v57, %s5930_s16  ;;  %v6655_v8 = vmul.f32 %v5677_v7, %v6380_v32  ;;  %v5679_v14 = vpop.eup %5678  ;;  %v5495_v7 = vld [vmem:[%s8190_s6 + $0xb8] sm:$0xff]  }
 0x2a9   : > { %v6664_v24 = vmul.f32 %v5679_v14, %v6400_v42 }
 0x2aa   : > { %1862 = vrot.lane.b32.xlu1 %v6552_v1, %s5931_s17 }
 0x2ab   : > { %v5681_v23 = vpop.eup %5680 }
 0x2ac   : > { %1856 = vrot.lane.b32.xlu0 %v6557_v57, %s5931_s17  ;;  %v6669_v52 = vmul.f32 %v5681_v23, %v6374_v13  ;;  %v5683_v55 = vpop.eup %5682  ;;  %v1775_v13 = vld [vmem:[%s8187_s3 + $0x78] sm:$0xff] }
 0x2ad   : > { %v6691_v45 = vmul.f32 %v5683_v55, %v6394_v19  ;;  %v1791_v40 = vmul.f32 %v1775_v13, %v6457_v2  ;;  %v5492_v19 = vld [vmem:[%s8190_s6 + $0x78] sm:$0xff]   ;;  %v1933_v55 = vld [vmem:[%s8188_s4 + $0x68] sm:$0xff] }
 0x2ae   : > { %1810 = vrot.lane.b32.xlu1 %v6566_v37, %s5930_s16 }
 0x2b0   : > { %1599 = vrot.lane.b32.xlu0 %v6571_v47, %s5930_s16 }
 0x2b2   : > { %1858 = vrot.lane.b32.xlu1 %v6566_v37, %s5931_s17 }
 0x2b4   : > { %1647 = vrot.lane.b32.xlu0 %v6571_v47, %s5931_s17 }
 0x2b6   : > { %1601 = vrot.lane.b32.xlu1 %v6580_v0, %s5930_s16 }
 0x2b8   : > { %1603 = vrot.lane.b32.xlu0 %v6585_v46, %s5930_s16 }
 0x2ba   : > { %1649 = vrot.lane.b32.xlu1 %v6580_v0, %s5931_s17 }
 0x2bc   : > { %1651 = vrot.lane.b32.xlu0 %v6585_v46, %s5931_s17 }
 0x2be   : > { %1605 = vrot.lane.b32.xlu1 %v6594_v56, %s5930_s16 }
 0x2c0   : > { %1607 = vrot.lane.b32.xlu0 %v6599_v39, %s5930_s16 }
 0x2c2   : > { %1653 = vrot.lane.b32.xlu1 %v6594_v56, %s5931_s17 }
 0x2c4   : > { %1655 = vrot.lane.b32.xlu0 %v6599_v39, %s5931_s17 }
 0x2c6   : > { %1609 = vrot.lane.b32.xlu1 %v6608_v9, %s5930_s16 }
 0x2c8   : > { %1611 = vrot.lane.b32.xlu0 %v6613_v62, %s5930_s16 }
 0x2ca   : > { %1657 = vrot.lane.b32.xlu1 %v6608_v9, %s5931_s17 }
 0x2cc   : > { %1659 = vrot.lane.b32.xlu0 %v6613_v62, %s5931_s17 }
 0x2ce   : > { %1613 = vrot.lane.b32.xlu1 %v6622_v51, %s5930_s16 }
 0x2d0   : > { %1615 = vrot.lane.b32.xlu0 %v6627_v60, %s5930_s16 }
 0x2d2   : > { %1661 = vrot.lane.b32.xlu1 %v6622_v51, %s5931_s17 }
 0x2d4   : > { %1663 = vrot.lane.b32.xlu0 %v6627_v60, %s5931_s17 }
 0x2d6   : > { %1617 = vrot.lane.b32.xlu1 %v6636_v6, %s5930_s16 }
 0x2d8   : > { %1619 = vrot.lane.b32.xlu0 %v6641_v17, %s5930_s16 }
 0x2da   : > { %1665 = vrot.lane.b32.xlu1 %v6636_v6, %s5931_s17 }
 0x2dc   : > { %1667 = vrot.lane.b32.xlu0 %v6641_v17, %s5931_s17 }
 0x2de   : > { %1621 = vrot.lane.b32.xlu1 %v6650_v26, %s5930_s16 }
 0x2e0   : > { %1623 = vrot.lane.b32.xlu0 %v6655_v8, %s5930_s16 }
 0x2e2   : > { %1669 = vrot.lane.b32.xlu1 %v6650_v26, %s5931_s17 }
 0x2e4   : > { %v1839_v4 = vpop.permute.xlu1 %1838  ;;  %1671 = vrot.lane.b32.xlu0 %v6655_v8, %s5931_s17 }
 0x2e6   : > { %1625 = vrot.lane.b32.xlu1 %v6664_v24, %s5930_s16  ;;  %v1837_v32 = vpop.permute.xlu0 %1836 }
 0x2e8   : > { %v1887_v59 = vpop.permute.xlu1 %1886  ;;  %1627 = vrot.lane.b32.xlu0 %v6669_v52, %s5930_s16 }
 0x2e9   : > { %v1919_v42 = vsel %vm1695_vm1, %v1839_v4, %v1887_v59  ;;  %v1773_v4 = vld [vmem:[%s8187_s3 + $0x68] sm:$0xff] }
 0x2ea   : > { %1673 = vrot.lane.b32.xlu1 %v6664_v24, %s5931_s17  ;;  %v1833_v31 = vpop.permute.xlu0 %1832  ;;  %v1951_v44 = vmul.f32 %v1935_v58, %v1919_v42 }
 0x2ec   : > { %v1885_v36 = vpop.permute.xlu1 %1884  ;;  %1675 = vrot.lane.b32.xlu0 %v6669_v52, %s5931_s17  ;;  %v1967_v49 = vadd.f32 %v1951_v44, %v1791_v40 }
 0x2ed   : > { %v1918_v20 = vsel %vm1695_vm1, %v1837_v32, %v1885_v36  ;;  %v1772_v32 = vld [vmem:[%s8187_s3 + $0x60] sm:$0xff] }
 0x2ee   : > { %v1950_v48 = vmul.f32 %v1934_v50, %v1918_v20  ;;  %1629 = vrot.lane.b32.xlu1 %v6691_v45, %s5930_s16  ;;  %v1881_v34 = vpop.permute.xlu0 %1880  ;;  %v1789_v50 = vmul.f32 %v1773_v4, %v6478_v3  ;;  %v1788_v36 = vmul.f32 %v1772_v32, %v6469_v41  ;;  %v5496_v41 = vld [vmem:[%s8190_s6 + $0x70] sm:$0xff]   ;;  %v1931_v4 = vld [vmem:[%s8188_s4 + $0x58] sm:$0xff]  ;;  %s8131_s16 = scalar_lea.vmem %s8199_s15, %s4795_s20 }
 0x2ef   : > { %v1916_v53 = vsel %vm1695_vm1, %v1833_v31, %v1881_v34  ;;  %v1930_v34 = vld [vmem:[%s8188_s4 + $0x50] sm:$0xff] }
 0x2f0   : > { %v1966_v27 = vadd.f32 %v1950_v48, %v1790_v5  ;;  %v1835_v2 = vpop.permute.xlu1 %1834  ;;  %v1948_v59 = vmul.f32 %v1932_v35, %v1916_v53  ;;  %v5498_v53 = vld [vmem:[%s8190_s6 + $0x30] sm:$0xff]  }
 0x2f2   : > { %v1983_v14 = vpack.c.bf16 %v1967_v49, %v1966_v27  ;;  %1677 = vrot.lane.b32.xlu1 %v6691_v45, %s5931_s17  ;;  %v1829_v23 = vpop.permute.xlu0 %1828  ;;  %v1964_v3 = vadd.f32 %v1948_v59, %v1788_v36  ;;  %v5497_v27 = vld [vmem:[%s8190_s6 + $0xf0] sm:$0xff]  }
 0x2f4   : > { %v1883_v58 = vpop.permute.xlu1 %1882  ;;  %v2327_v42 = vmul.bf16 %v5492_v19, %v1983_v14  ;;  %v2343_v31 = vmul.bf16 %v5493_v54, %v1983_v14  ;;  %v2319_v13 = vmul.bf16 %v5494_v30, %v1983_v14  ;;  %v2335_v38 = vmul.bf16 %v5495_v7, %v1983_v14  ;;  %v1771_v7 = vld [vmem:[%s8187_s3 + $0x58] sm:$0xff]  ;;  %v1770_v14 = vld [vmem:[%s8187_s3 + $0x50] sm:$0xff] }
 0x2f5   : > { %v1917_v44 = vsel %vm1695_vm1, %v1835_v2, %v1883_v58  ;;  %v5499_v2 = vld [vmem:[%s8190_s6 + $0xb0] sm:$0xff]  }
 0x2f6   : > { %v1949_v20 = vmul.f32 %v1933_v55, %v1917_v44  ;;  %5453 = vmatprep.subr.msk.bf16.mxu1 %vm528_vm0, %v2327_v42  ;;  %5461 = vmatprep.subr.msk.bf16.mxu0 %vm528_vm0, %v2343_v31  ;;  %v1877_v40 = vpop.permute.xlu0 %1876  ;;  %v2678_v5 = vsel %vm528_vm0, %v2319_v13, 0  ;;  %v2726_v48 = vsel %vm528_vm0, %v2335_v38, 0  ;;  %v1787_v31 = vmul.f32 %v1771_v7, %v6492_v43 }
 0x2f7   : > { %4882 = vmatpush3.bf16.xpose.msra.mxu1 %v2678_v5  ;;  %4914 = vmatpush3.bf16.xpose.msra.mxu0 %v2726_v48  ;;  %v1914_v19 = vsel %vm1695_vm1, %v1829_v23, %v1877_v40  ;;  %v1786_v38 = vmul.f32 %v1770_v14, %v6483_v18  ;;  %v1928_v40 = vld [vmem:[%s8188_s4 + $0x40] sm:$0xff]  ;;  %v5500_v18 = vld [vmem:[%s8190_s6 + $0x68] sm:$0xff]  }
 0x2f8   : > { %v1965_v35 = vadd.f32 %v1949_v20, %v1789_v50  ;;  %v1831_v49 = vpop.permute.xlu1 %1830  ;;  %v1946_v23 = vmul.f32 %v1930_v34, %v1914_v19 }
 0x2fa   : > { %v1982_v54 = vpack.c.bf16 %v1965_v35, %v1964_v3  ;;  %v1825_v30 = vpop.permute.xlu0 %1824  ;;  %v1962_v43 = vadd.f32 %v1946_v23, %v1786_v38  ;;  %v5502_v3 = vld [vmem:[%s8190_s6 + $0x28] sm:$0xff]   ;;  %v1926_v38 = vld [vmem:[%s8188_s4 + $0x30] sm:$0xff] }
 0x2fb   : > { %v5503_v35 = vld [vmem:[%s8190_s6 + $0xa8] sm:$0xff]  }
 0x2fc   : > { %v1879_v32 = vpop.permute.xlu1 %1878  ;;  %v2326_v59 = vmul.bf16 %v5496_v41, %v1982_v54  ;;  %v2342_v55 = vmul.bf16 %v5497_v27, %v1982_v54  ;;  %v2318_v58 = vmul.bf16 %v5498_v53, %v1982_v54  ;;  %v2334_v42 = vmul.bf16 %v5499_v2, %v1982_v54  ;;  %v5501_v41 = vld [vmem:[%s8190_s6 + $0xe8] sm:$0xff]   ;;  %v1768_v53 = vld [vmem:[%s8187_s3 + $0x40] sm:$0xff] }
 0x2fd   : > { %v1915_v13 = vsel %vm1695_vm1, %v1831_v49, %v1879_v32  ;;  %v1769_v27 = vld [vmem:[%s8187_s3 + $0x48] sm:$0xff] }
 0x2fe   : > { %v1947_v50 = vmul.f32 %v1931_v4, %v1915_v13  ;;  %5454 = vmatprep.subr.msk.bf16.mxu1 %vm528_vm0, %v2326_v59  ;;  %5462 = vmatprep.subr.msk.bf16.mxu0 %vm528_vm0, %v2342_v55  ;;  %v1873_v44 = vpop.permute.xlu0 %1872  ;;  %v2675_v36 = vsel %vm528_vm0, %v2318_v58, 0  ;;  %v2723_v20 = vsel %vm528_vm0, %v2334_v42, 0  ;;  %v1929_v54 = vld [vmem:[%s8188_s4 + $0x48] sm:$0xff]  ;;  %v1785_v32 = vmul.f32 %v1769_v27, %v6507_v25 }
 0x2ff   : > { %4884 = vmatpush3.bf16.xpose.msra.mxu1 %v2675_v36  ;;  %4916 = vmatpush3.bf16.xpose.msra.mxu0 %v2723_v20  ;;  %v1912_v48 = vsel %vm1695_vm1, %v1825_v30, %v1873_v44  ;;  %v1784_v55 = vmul.f32 %v1768_v53, %v6497_v16  ;;  %v5504_v16 = vld [vmem:[%s8190_s6 + $0x60] sm:$0xff]  }
 0x300   : > { %v1963_v5 = vadd.f32 %v1947_v50, %v1787_v31  ;;  %v1827_v34 = vpop.permute.xlu1 %1826  ;;  %v1944_v2 = vmul.f32 %v1928_v40, %v1912_v48  ;;  %v5505_v20 = vld [vmem:[%s8190_s6 + $0xe0] sm:$0xff]   ;;  %v1767_v48 = vld [vmem:[%s8187_s3 + $0x38] sm:$0xff] }
 0x301   : > { %v5506_v40 = vld [vmem:[%s8190_s6 + $0x20] sm:$0xff]  }
 0x302   : > { %v1981_v19 = vpack.c.bf16 %v1963_v5, %v1962_v43  ;;  %v1821_v49 = vpop.permute.xlu0 %1820  ;;  %v1960_v25 = vadd.f32 %v1944_v2, %v1784_v55  ;;  %v1783_v2 = vmul.f32 %v1767_v48, %v6523_v61 }
 0x304   : > { %v1875_v30 = vpop.permute.xlu1 %1874  ;;  %v2325_v7 = vmul.bf16 %v5500_v18, %v1981_v19  ;;  %v2341_v14 = vmul.bf16 %v5501_v41, %v1981_v19  ;;  %v2317_v23 = vmul.bf16 %v5502_v3, %v1981_v19  ;;  %v2333_v4 = vmul.bf16 %v5503_v35, %v1981_v19  ;;  %v5507_v18 = vld [vmem:[%s8190_s6 + $0xa0] sm:$0xff]   ;;  %v1927_v3 = vld [vmem:[%s8188_s4 + $0x38] sm:$0xff] }
 0x305   : > { %v1913_v59 = vsel %vm1695_vm1, %v1827_v34, %v1875_v30  ;;  %v1766_v34 = vld [vmem:[%s8187_s3 + $0x30] sm:$0xff] }
 0x306   : > { %v1945_v58 = vmul.f32 %v1929_v54, %v1913_v59  ;;  %5455 = vmatprep.subr.msk.bf16.mxu1 %vm528_vm0, %v2325_v7  ;;  %5463 = vmatprep.subr.msk.bf16.mxu0 %vm528_vm0, %v2341_v14  ;;  %v1869_v42 = vpop.permute.xlu0 %1868  ;;  %v2672_v31 = vsel %vm528_vm0, %v2317_v23, 0  ;;  %v2720_v13 = vsel %vm528_vm0, %v2333_v4, 0  ;;  %v1782_v30 = vmul.f32 %v1766_v34, %v6512_v21  ;;  %v5508_v21 = vld [vmem:[%s8190_s6 + $0x58] sm:$0xff]  }
 0x307   : > { %4886 = vmatpush3.bf16.xpose.msra.mxu1 %v2672_v31  ;;  %4918 = vmatpush3.bf16.xpose.msra.mxu0 %v2720_v13  ;;  %v1910_v44 = vsel %vm1695_vm1, %v1821_v49, %v1869_v42  ;;  %v5509_v42 = vld [vmem:[%s8190_s6 + $0xd8] sm:$0xff]  }
 0x308   : > { %v1961_v50 = vadd.f32 %v1945_v58, %v1785_v32  ;;  %v1823_v36 = vpop.permute.xlu1 %1822  ;;  %v1942_v41 = vmul.f32 %v1926_v38, %v1910_v44  ;;  %v1924_v32 = vld [vmem:[%s8188_s4 + $0x20] sm:$0xff]  ;;  %v5510_v31 = vld [vmem:[%s8190_s6 + $0x18] sm:$0xff]  }
 0x309   : > { %v5511_v13 = vld [vmem:[%s8190_s6 + $0x98] sm:$0xff]  }
 0x30a   : > { %v1980_v43 = vpack.c.bf16 %v1961_v50, %v1960_v25  ;;  %v1817_v5 = vpop.permute.xlu0 %1816  ;;  %v1958_v61 = vadd.f32 %v1942_v41, %v1782_v30  ;;  %v1765_v25 = vld [vmem:[%s8187_s3 + $0x28] sm:$0xff]  ;;  %v1764_v50 = vld [vmem:[%s8187_s3 + $0x20] sm:$0xff]  ;;  %v5513_v30 = vld [vmem:[%s8190_s6 + $0xd0] sm:$0xff]  }
 0x30b   : > { %v1781_v48 = vmul.f32 %v1765_v25, %v6538_v63  ;;  %v1780_v41 = vmul.f32 %v1764_v50, %v6528_v33  ;;  %v5512_v33 = vld [vmem:[%s8190_s6 + $0x50] sm:$0xff]  }
 0x30c   : > { %v1871_v35 = vpop.permute.xlu1 %1870  ;;  %v2324_v19 = vmul.bf16 %v5504_v16, %v1980_v43  ;;  %v2340_v49 = vmul.bf16 %v5505_v20, %v1980_v43  ;;  %v2316_v27 = vmul.bf16 %v5506_v40, %v1980_v43  ;;  %v2332_v53 = vmul.bf16 %v5507_v18, %v1980_v43 }
 0x30d   : > { %v1911_v54 = vsel %vm1695_vm1, %v1823_v36, %v1871_v35  ;;  %v1925_v36 = vld [vmem:[%s8188_s4 + $0x28] sm:$0xff] }
 0x30e   : > { %v1943_v7 = vmul.f32 %v1927_v3, %v1911_v54  ;;  %5456 = vmatprep.subr.msk.bf16.mxu1 %vm528_vm0, %v2324_v19  ;;  %5464 = vmatprep.subr.msk.bf16.mxu0 %vm528_vm0, %v2340_v49  ;;  %v1865_v14 = vpop.permute.xlu0 %1864  ;;  %v2669_v23 = vsel %vm528_vm0, %v2316_v27, 0  ;;  %v2717_v4 = vsel %vm528_vm0, %v2332_v53, 0  ;;  %v1922_v27 = vld [vmem:[%s8188_s4 + $0x10] sm:$0xff] }
 0x30f   : > { %4888 = vmatpush3.bf16.xpose.msra.mxu1 %v2669_v23  ;;  %4920 = vmatpush3.bf16.xpose.msra.mxu0 %v2717_v4  ;;  %v1908_v55 = vsel %vm1695_vm1, %v1817_v5, %v1865_v14  ;;  %v5515_v14 = vld [vmem:[%s8190_s6 + $0x90] sm:$0xff]  }
 0x310   : > { %v1959_v59 = vadd.f32 %v1943_v7, %v1783_v2  ;;  %v1819_v58 = vpop.permute.xlu1 %1818  ;;  %v1940_v44 = vmul.f32 %v1924_v32, %v1908_v55  ;;  %v5514_v7 = vld [vmem:[%s8190_s6 + $0x10] sm:$0xff]   ;;  %v1763_v32 = vld [vmem:[%s8187_s3 + $0x18] sm:$0xff] }
 0x312   : > { %v1979_v38 = vpack.c.bf16 %v1959_v59, %v1958_v61  ;;  %v1813_v16 = vpop.permute.xlu0 %1812  ;;  %v1956_v63 = vadd.f32 %v1940_v44, %v1780_v41  ;;  %v1923_v59 = vld [vmem:[%s8188_s4 + $0x18] sm:$0xff]  ;;  %v5519_v41 = vld [vmem:[%s8190_s6 + $0x88] sm:$0xff]  }
 0x314   : > { %v1867_v20 = vpop.permute.xlu1 %1866  ;;  %v2323_v40 = vmul.bf16 %v5508_v21, %v1979_v38  ;;  %v2339_v18 = vmul.bf16 %v5509_v42, %v1979_v38  ;;  %v2315_v43 = vmul.bf16 %v5510_v31, %v1979_v38  ;;  %v2331_v5 = vmul.bf16 %v5511_v13, %v1979_v38  ;;  %v1762_v21 = vld [vmem:[%s8187_s3 + $0x10] sm:$0xff] }
 0x315   : > { %v1909_v34 = vsel %vm1695_vm1, %v1819_v58, %v1867_v20  ;;  %v1779_v38 = vmul.f32 %v1763_v32, %v6552_v1  ;;  %v1778_v25 = vmul.f32 %v1762_v21, %v6543_v29  ;;  %v5516_v29 = vld [vmem:[%s8190_s6 + $0x48] sm:$0xff]  }
 0x316   : > { %v1941_v3 = vmul.f32 %v1925_v36, %v1909_v34  ;;  %5457 = vmatprep.subr.msk.bf16.mxu1 %vm528_vm0, %v2323_v40  ;;  %5465 = vmatprep.subr.msk.bf16.mxu0 %vm528_vm0, %v2339_v18  ;;  %v1861_v35 = vpop.permute.xlu0 %1860  ;;  %v2666_v19 = vsel %vm528_vm0, %v2315_v43, 0  ;;  %v2714_v49 = vsel %vm528_vm0, %v2331_v5, 0  ;;  %v1920_v40 = vld [vmem:[%s8188_s4] sm:$0xff]  ;;  %v5518_v34 = vld [vmem:[%s8190_s6 + $0x8] sm:$0xff]  }
 0x317   : > { %4890 = vmatpush3.bf16.xpose.msra.mxu1 %v2666_v19  ;;  %4922 = vmatpush3.bf16.xpose.msra.mxu0 %v2714_v49  ;;  %v1906_v2 = vsel %vm1695_vm1, %v1813_v16, %v1861_v35  ;;  %v1761_v19 = vld [vmem:[%s8187_s3 + $0x8] sm:$0xff]  ;;  %v1760_v49 = vld [vmem:[%s8187_s3] sm:$0xff] }
 0x318   : > { %v1957_v53 = vadd.f32 %v1941_v3, %v1781_v48  ;;  %v1815_v54 = vpop.permute.xlu1 %1814  ;;  %v1938_v61 = vmul.f32 %v1922_v27, %v1906_v2  ;;  %v5517_v48 = vld [vmem:[%s8190_s6 + $0xc8] sm:$0xff]  }
 0x31a   : > { %v1978_v23 = vpack.c.bf16 %v1957_v53, %v1956_v63  ;;  %v1809_v4 = vpop.permute.xlu0 %1808  ;;  %v1954_v1 = vadd.f32 %v1938_v61, %v1778_v25  ;;  %v6948_v25 = vld [vmem:[%s8191_s7 + $0xf8] sm:$0xff]  }
 0x31c   : > { %v1863_v55 = vpop.permute.xlu1 %1862  ;;  %v2322_v58 = vmul.bf16 %v5512_v33, %v1978_v23  ;;  %v2338_v42 = vmul.bf16 %v5513_v30, %v1978_v23  ;;  %v2314_v31 = vmul.bf16 %v5514_v7, %v1978_v23  ;;  %v2330_v13 = vmul.bf16 %v5515_v14, %v1978_v23  ;;  %v1921_v33 = vld [vmem:[%s8188_s4 + $0x8] sm:$0xff] }
 0x31d   : > { %v1907_v16 = vsel %vm1695_vm1, %v1815_v54, %v1863_v55  ;;  %v1777_v7 = vmul.f32 %v1761_v19, %v6566_v37  ;;  %v1776_v23 = vmul.f32 %v1760_v49, %v6557_v57  ;;  %v5520_v57 = vld [vmem:[%s8190_s6 + $0x40] sm:$0xff]  }
 0x31e   : > { %v1939_v50 = vmul.f32 %v1923_v59, %v1907_v16  ;;  %5458 = vmatprep.subr.msk.bf16.mxu1 %vm528_vm0, %v2322_v58  ;;  %5466 = vmatprep.subr.msk.bf16.mxu0 %vm528_vm0, %v2338_v42  ;;  %v1857_v44 = vpop.permute.xlu0 %1856  ;;  %v2663_v36 = vsel %vm528_vm0, %v2314_v31, 0  ;;  %v2711_v20 = vsel %vm528_vm0, %v2330_v13, 0  ;;  %v1712_v59 = vld [vmem:[%s8186_s2] sm:$0xff]  ;;  %v6943_v16 = vld [vmem:[%s8191_s7 + $0x78] sm:$0xff]  }
 0x31f   : > { %4892 = vmatpush3.bf16.xpose.msra.mxu1 %v2663_v36  ;;  %4924 = vmatpush3.bf16.xpose.msra.mxu0 %v2711_v20  ;;  %v1904_v43 = vsel %vm1695_vm1, %v1809_v4, %v1857_v44  ;;  %v5521_v31 = vld [vmem:[%s8190_s6 + $0xc0] sm:$0xff]   ;;  %v1552_v36 = vld [vmem:[%s8185_s1 + $0x8] sm:$0xff] }
 0x320   : > { %v1955_v18 = vadd.f32 %v1939_v50, %v1779_v38  ;;  %v1811_v5 = vpop.permute.xlu1 %1810  ;;  %v1936_v27 = vmul.f32 %v1920_v40, %v1904_v43  ;;  %v5522_v13 = vld [vmem:[%s8190_s6] sm:$0xff]  }
 0x321   : > { %v5523_v38 = vld [vmem:[%s8190_s6 + $0x80] sm:$0xff]  }
 0x322   : > { %v1977_v3 = vpack.c.bf16 %v1955_v18, %v1954_v1  ;;  %v1600_v35 = vpop.permute.xlu0 %1599  ;;  %v1952_v37 = vadd.f32 %v1936_v27, %v1776_v23  ;;  %v1551_v20 = vld [vmem:[%s8185_s1] sm:$0xff]  ;;  %v5528_v23 = vld [vmem:[%s8191_s7 + $0x70] sm:$0xff]  }
 0x323   : > { %v1567_v19 = vmul.f32 %v1551_v20, %v6571_v47  ;;  %v5526_v47 = vld [vmem:[%s8191_s7 + $0x38] sm:$0xff]  }
 0x324   : > { %v1859_v63 = vpop.permute.xlu1 %1858  ;;  %v2321_v53 = vmul.bf16 %v5516_v29, %v1977_v3  ;;  %v2337_v2 = vmul.bf16 %v5517_v48, %v1977_v3  ;;  %v2313_v54 = vmul.bf16 %v5518_v34, %v1977_v3  ;;  %v2329_v30 = vmul.bf16 %v5519_v41, %v1977_v3  ;;  %v1713_v29 = vld [vmem:[%s8186_s2 + $0x8] sm:$0xff] }
 0x325   : > { %v1905_v14 = vsel %vm1695_vm1, %v1811_v5, %v1859_v63  ;;  %v1568_v34 = vmul.f32 %v1552_v36, %v6580_v0  ;;  %v2551_v3 = vmul.bf16 %v6943_v16, %v6444_v12 }
 0x326   : > { %v1937_v4 = vmul.f32 %v1921_v33, %v1905_v14  ;;  %5459 = vmatprep.subr.msk.bf16.mxu1 %vm528_vm0, %v2321_v53  ;;  %5467 = vmatprep.subr.msk.bf16.mxu0 %vm528_vm0, %v2337_v2  ;;  %v1648_v32 = vpop.permute.xlu0 %1647  ;;  %v2660_v21 = vsel %vm528_vm0, %v2313_v54, 0  ;;  %v2708_v61 = vsel %vm528_vm0, %v2329_v30, 0  ;;  %v5527_v54 = vld [vmem:[%s8191_s7 + $0xb8] sm:$0xff]   ;;  %v1990_v30 = vpack.c.bf16 %v6446_v28, %v6442_v11  ;;  %v1553_v11 = vld [vmem:[%s8185_s1 + $0x10] sm:$0xff] }
 0x327   : > { %4894 = vmatpush3.bf16.xpose.msra.mxu1 %v2660_v21  ;;  %4926 = vmatpush3.bf16.xpose.msra.mxu0 %v2708_v61  ;;  %v1696_v58 = vsel %vm1695_vm1, %v1600_v35, %v1648_v32  ;;  %v2567_v35 = vmul.bf16 %v6948_v25, %v6444_v12  ;;  %v1554_v28 = vld [vmem:[%s8185_s1 + $0x18] sm:$0xff] }
 0x328   : > { %v1953_v55 = vadd.f32 %v1937_v4, %v1777_v7  ;;  %v1602_v42 = vpop.permute.xlu1 %1601  ;;  %v1728_v40 = vmul.f32 %v1712_v59, %v1696_v58  ;;  %v1714_v7 = vld [vmem:[%s8186_s2 + $0x10] sm:$0xff]  ;;  %v1715_v61 = vld [vmem:[%s8186_s2 + $0x18] sm:$0xff]  ;;  %v2559_v58 = vmul.bf16 %v5527_v54, %v6444_v12 }
 0x329   : > { %v5529_v4 = vld [vmem:[%s8191_s7 + $0xf0] sm:$0xff]  }
 0x32a   : > { %v1976_v50 = vpack.c.bf16 %v1953_v55, %v1952_v37  ;;  %v1604_v44 = vpop.permute.xlu0 %1603  ;;  %v1744_v63 = vadd.f32 %v1728_v40, %v1567_v19  ;;  %v2543_v37 = vmul.bf16 %v5526_v47, %v6444_v12  ;;  %v5532_v12 = vld [vmem:[%s8191_s7 + $0x68] sm:$0xff]  }
 0x32b   : > { %v5533_v40 = vld [vmem:[%s8191_s7 + $0xe8] sm:$0xff]  }
 0x32c   : > { %v1650_v1 = vpop.permute.xlu1 %1649  ;;  %v2320_v18 = vmul.bf16 %v5520_v57, %v1976_v50  ;;  %v2336_v43 = vmul.bf16 %v5521_v31, %v1976_v50  ;;  %v2312_v5 = vmul.bf16 %v5522_v13, %v1976_v50  ;;  %v2328_v48 = vmul.bf16 %v5523_v38, %v1976_v50  ;;  %v5530_v13 = vld [vmem:[%s8191_s7 + $0x30] sm:$0xff]  }
 0x32d   : > { %v1697_v41 = vsel %vm1695_vm1, %v1602_v42, %v1650_v1  ;;  %v2550_v42 = vmul.bf16 %v5528_v23, %v1990_v30  ;;  %v2566_v31 = vmul.bf16 %v5529_v4, %v1990_v30  ;;  %v5531_v38 = vld [vmem:[%s8191_s7 + $0xb0] sm:$0xff]   ;;  %v1569_v50 = vmul.f32 %v1553_v11, %v6585_v46  ;;  %v5539_v23 = vld [vmem:[%s8191_s7 + $0xa0] sm:$0xff]   ;;  %v5540_v11 = vld [vmem:[%s8191_s7 + $0x58] sm:$0xff]  }
 0x32e   : > { %v1729_v49 = vmul.f32 %v1713_v29, %v1697_v41  ;;  %v1652_v27 = vpop.permute.xlu0 %1651  ;;  %5460 = vmatprep.subr.msk.bf16.mxu1 %vm528_vm0, %v2320_v18  ;;  %5468 = vmatprep.subr.msk.bf16.mxu0 %vm528_vm0, %v2336_v43  ;;  %v2657_v33 = vsel %vm528_vm0, %v2312_v5, 0  ;;  %v2705_v0 = vsel %vm528_vm0, %v2328_v48, 0  ;;  %v5535_v18 = vld [vmem:[%s8191_s7 + $0xa8] sm:$0xff]   ;;  %v1988_v43 = vpack.c.bf16 %v6440_v22, %v6436_v10  ;;  %v1716_v5 = vld [vmem:[%s8186_s2 + $0x20] sm:$0xff] }
 0x32f   : > { %4896 = vmatpush3.bf16.xpose.msra.mxu1 %v2657_v33  ;;  %4928 = vmatpush3.bf16.xpose.msra.mxu0 %v2705_v0  ;;  %v1698_v14 = vsel %vm1695_vm1, %v1604_v44, %v1652_v27  ;;  %v1570_v44 = vmul.f32 %v1554_v28, %v6594_v56  ;;  %v5534_v56 = vld [vmem:[%s8191_s7 + $0x28] sm:$0xff]   ;;  %v2558_v41 = vmul.bf16 %v5531_v38, %v1990_v30  ;;  %v1555_v10 = vld [vmem:[%s8185_s1 + $0x20] sm:$0xff]  ;;  %v5541_v28 = vld [vmem:[%s8191_s7 + $0xd8] sm:$0xff]  }
 0x330   : > { %v1745_v53 = vadd.f32 %v1729_v49, %v1568_v34  ;;  %v1606_v2 = vpop.permute.xlu1 %1605  ;;  %4945 = vmatprep.subr.bf16.mxu1 %v2551_v3  ;;  %5009 = vmatprep.subr.bf16.mxu0 %v2567_v35  ;;  %v1730_v59 = vmul.f32 %v1714_v7, %v1698_v14  ;;  %v2542_v34 = vmul.bf16 %v5530_v13, %v1990_v30  ;;  %v5536_v3 = vld [vmem:[%s8191_s7 + $0x60] sm:$0xff]   ;;  %v1556_v22 = vld [vmem:[%s8185_s1 + $0x28] sm:$0xff] }
 0x331   : > { %v5537_v35 = vld [vmem:[%s8191_s7 + $0xe0] sm:$0xff]   ;;  %v1717_v27 = vld [vmem:[%s8186_s2 + $0x28] sm:$0xff]  ;;  %v2549_v33 = vmul.bf16 %v5532_v12, %v6438_v15  ;;  %v2565_v0 = vmul.bf16 %v5533_v40, %v6438_v15  ;;  %v2557_v47 = vmul.bf16 %v5535_v18, %v6438_v15  ;;  %v2548_v30 = vmul.bf16 %v5536_v3, %v1988_v43  ;;  %v1557_v12 = vld [vmem:[%s8185_s1 + $0x30] sm:$0xff] }
 0x332   : > { %v1968_v32 = vpack.c.bf16 %v1745_v53, %v1744_v63  ;;  %v1608_v21 = vpop.permute.xlu0 %1607  ;;  %v1746_v29 = vadd.f32 %v1730_v59, %v1569_v50  ;;  %v2564_v7 = vmul.bf16 %v5537_v35, %v1988_v43  ;;  %v5538_v14 = vld [vmem:[%s8191_s7 + $0x20] sm:$0xff]   ;;  %v1571_v4 = vmul.f32 %v1555_v10, %v6599_v39  ;;  %v5544_v50 = vld [vmem:[%s8191_s7 + $0x50] sm:$0xff]   ;;  %v1558_v40 = vld [vmem:[%s8185_s1 + $0x38] sm:$0xff] }
 0x333   : > { %v2540_v13 = vmul.bf16 %v5538_v14, %v1988_v43  ;;  %v2556_v38 = vmul.bf16 %v5539_v23, %v1988_v43  ;;  %v5546_v35 = vld [vmem:[%s8191_s7 + $0x10] sm:$0xff]   ;;  %v1574_v10 = vmul.f32 %v1558_v40, %v6622_v51  ;;  %v5550_v51 = vld [vmem:[%s8191_s7 + $0x8] sm:$0xff]  }
 0x334   : > { %v1654_v57 = vpop.permute.xlu1 %1653  ;;  %4897 = vmatprep.mubr.msk.bf16.mxu1 %vm528_vm0, %v1968_v32  ;;  %4929 = vmatprep.mubr.msk.bf16.mxu0 %vm528_vm0, %v1968_v32 }
 0x335   : > { %v1699_v55 = vsel %vm1695_vm1, %v1606_v2, %v1654_v57  ;;  %v2541_v2 = vmul.bf16 %v5534_v56, %v6438_v15  ;;  %v5543_v57 = vld [vmem:[%s8191_s7 + $0x98] sm:$0xff]  }
 0x336   : > { %v1731_v36 = vmul.f32 %v1715_v61, %v1699_v55  ;;  %v1656_v20 = vpop.permute.xlu0 %1655  ;;  %4898 = vmatmul.mubr.msk.bf16.vlgmr.msra.gmra.mxu1 %vm528_vm0, %v1968_v32  ;;  %4930 = vmatmul.mubr.msk.bf16.vlgmr.msra.gmra.mxu0 %vm528_vm0, %v1968_v32  ;;  %v1572_v32 = vmul.f32 %v1556_v22, %v6608_v9  ;;  %v5542_v9 = vld [vmem:[%s8191_s7 + $0x18] sm:$0xff]   ;;  %v8223_v55 = vld [vmem:[#allocation7_spill] sm:$0xff] }
 0x337   : > { %4946 = vmatpush3.bf16.msra.mxu1 %v2543_v37  ;;  %5010 = vmatpush3.bf16.msra.mxu0 %v2559_v58  ;;  %v1700_v48 = vsel %vm1695_vm1, %v1608_v21, %v1656_v20  ;;  %v8222_v37 = vld [vmem:[#allocation5_spill] sm:$0xff] }
 0x338   : > { %v1747_v46 = vadd.f32 %v1731_v36, %v1570_v44  ;;  %v1610_v1 = vpop.permute.xlu1 %1609  ;;  %4947 = vmatprep.subr.bf16.mxu1 %v2550_v42  ;;  %5011 = vmatprep.subr.bf16.mxu0 %v2566_v31  ;;  %v1732_v63 = vmul.f32 %v1716_v5, %v1700_v48  ;;  %v1986_v58 = vpack.c.bf16 %v8223_v55, %v8222_v37  ;;  %v1718_v42 = vld [vmem:[%s8186_s2 + $0x30] sm:$0xff] }
 0x339   : > { %v5545_v44 = vld [vmem:[%s8191_s7 + $0xd0] sm:$0xff]  }
 0x33a   : > { %v1969_v19 = vpack.c.bf16 %v1747_v46, %v1746_v29  ;;  %v1612_v49 = vpop.permute.xlu0 %1611  ;;  %v1748_v61 = vadd.f32 %v1732_v63, %v1571_v4  ;;  %v1719_v29 = vld [vmem:[%s8186_s2 + $0x38] sm:$0xff]  ;;  %v8224_v46 = vld [vmem:[#allocation6_spill] sm:$0xff]  ;;  %v2562_v3 = vmul.bf16 %v5545_v44, %v1986_v58  ;;  %v2538_v23 = vmul.bf16 %v5546_v35, %v1986_v58 }
 0x33b   : > { %4948 = vmatpush3.bf16.msra.mxu1 %v2542_v34  ;;  %5012 = vmatpush3.bf16.msra.mxu0 %v2558_v41  ;;  %v2563_v56 = vmul.bf16 %v5541_v28, %v8224_v46  ;;  %v2539_v5 = vmul.bf16 %v5542_v9, %v8224_v46  ;;  %v2555_v48 = vmul.bf16 %v5543_v57, %v8224_v46  ;;  %v1559_v28 = vld [vmem:[%s8185_s1 + $0x40] sm:$0xff] }
 0x33c   : > { %v1658_v53 = vpop.permute.xlu1 %1657  ;;  %4899 = vmatprep.mubr.msk.bf16.mxu1 %vm528_vm0, %v1969_v19  ;;  %4931 = vmatprep.mubr.msk.bf16.mxu0 %vm528_vm0, %v1969_v19  ;;  %v2546_v41 = vmul.bf16 %v5544_v50, %v1986_v58  ;;  %v5554_v50 = vld [vmem:[%s8191_s7] sm:$0xff]  }
 0x33d   : > { %v1701_v54 = vsel %vm1695_vm1, %v1610_v1, %v1658_v53  ;;  %4949 = vmatprep.subr.bf16.mxu1 %v2549_v33  ;;  %5013 = vmatprep.subr.bf16.mxu0 %v2565_v0  ;;  %v2547_v1 = vmul.bf16 %v5540_v11, %v8224_v46  ;;  %v5548_v33 = vld [vmem:[%s8191_s7 + $0x48] sm:$0xff]   ;;  %v5555_v44 = vld [vmem:[%s8191_s7 + $0x80] sm:$0xff]  }
 0x33e   : > { %v1733_v21 = vmul.f32 %v1717_v27, %v1701_v54  ;;  %v1660_v15 = vpop.permute.xlu0 %1659  ;;  %4900 = vmatmul.mubr.msk.bf16.gmra.mxu1 %vm528_vm0, %v1969_v19  ;;  %4932 = vmatmul.mubr.msk.bf16.gmra.mxu0 %vm528_vm0, %v1969_v19  ;;  %v5547_v19 = vld [vmem:[%s8191_s7 + $0x90] sm:$0xff]   ;;  %v5549_v0 = vld [vmem:[%s8191_s7 + $0xc8] sm:$0xff]  }
 0x33f   : > { %4950 = vmatpush3.bf16.msra.mxu1 %v2541_v2  ;;  %5014 = vmatpush3.bf16.msra.mxu0 %v2557_v47  ;;  %v1702_v31 = vsel %vm1695_vm1, %v1612_v49, %v1660_v15  ;;  %v1573_v49 = vmul.f32 %v1557_v12, %v6613_v62  ;;  %v5551_v2 = vld [vmem:[%s8191_s7 + $0x88] sm:$0xff]   ;;  %v8225_v47 = vld [vmem:[#allocation2_spill] sm:$0xff]  ;;  %v8226_v54 = vld [vmem:[#allocation4_spill] sm:$0xff]  ;;  %v2554_v4 = vmul.bf16 %v5547_v19, %v1986_v58 }
 0x340   : > { %v1749_v39 = vadd.f32 %v1733_v21, %v1572_v32  ;;  %v1614_v59 = vpop.permute.xlu1 %1613  ;;  %4951 = vmatprep.subr.bf16.mxu1 %v2548_v30  ;;  %5015 = vmatprep.subr.bf16.mxu0 %v2564_v7  ;;  %v1734_v18 = vmul.f32 %v1718_v42, %v1702_v31  ;;  %v1984_v30 = vpack.c.bf16 %v8226_v54, %v8225_v47  ;;  %v1720_v7 = vld [vmem:[%s8186_s2 + $0x40] sm:$0xff] }
 0x341   : > { %v5552_v32 = vld [vmem:[%s8191_s7 + $0x40] sm:$0xff]  }
 0x342   : > { %v1970_v36 = vpack.c.bf16 %v1749_v39, %v1748_v61  ;;  %v1616_v20 = vpop.permute.xlu0 %1615  ;;  %v1750_v63 = vadd.f32 %v1734_v18, %v1573_v49  ;;  %v5553_v21 = vld [vmem:[%s8191_s7 + $0xc0] sm:$0xff]   ;;  %v1560_v61 = vld [vmem:[%s8185_s1 + $0x48] sm:$0xff]  ;;  %v2552_v18 = vmul.bf16 %v5555_v44, %v1984_v30 }
 0x343   : > { %4952 = vmatpush3.bf16.msra.mxu1 %v2540_v13  ;;  %5016 = vmatpush3.bf16.msra.mxu0 %v2556_v38  ;;  %v1721_v39 = vld [vmem:[%s8186_s2 + $0x48] sm:$0xff]  ;;  %v2544_v13 = vmul.bf16 %v5552_v32, %v1984_v30  ;;  %v2560_v38 = vmul.bf16 %v5553_v21, %v1984_v30 }
 0x344   : > { %v1662_v43 = vpop.permute.xlu1 %1661  ;;  %4901 = vmatprep.mubr.msk.bf16.mxu1 %vm528_vm0, %v1970_v36  ;;  %4933 = vmatprep.mubr.msk.bf16.mxu0 %vm528_vm0, %v1970_v36 }
 0x345   : > { %v1703_v34 = vsel %vm1695_vm1, %v1614_v59, %v1662_v43  ;;  %4953 = vmatprep.subr.bf16.mxu1 %v2547_v1  ;;  %5017 = vmatprep.subr.bf16.mxu0 %v2563_v56  ;;  %v8227_v59 = vld [vmem:[#allocation3_spill] sm:$0xff]  ;;  %v1722_v56 = vld [vmem:[%s8186_s2 + $0x50] sm:$0xff] }
 0x346   : > { %v1735_v22 = vmul.f32 %v1719_v29, %v1703_v34  ;;  %v1664_v27 = vpop.permute.xlu0 %1663  ;;  %4902 = vmatmul.mubr.msk.bf16.gmra.mxu1 %vm528_vm0, %v1970_v36  ;;  %4934 = vmatmul.mubr.msk.bf16.gmra.mxu0 %vm528_vm0, %v1970_v36  ;;  %v2545_v9 = vmul.bf16 %v5548_v33, %v8227_v59  ;;  %v2561_v57 = vmul.bf16 %v5549_v0, %v8227_v59  ;;  %v1562_v34 = vld [vmem:[%s8185_s1 + $0x58] sm:$0xff] }
 0x347   : > { %4954 = vmatpush3.bf16.msra.mxu1 %v2539_v5  ;;  %5018 = vmatpush3.bf16.msra.mxu0 %v2555_v48  ;;  %v1704_v14 = vsel %vm1695_vm1, %v1616_v20, %v1664_v27  ;;  %v2537_v58 = vmul.bf16 %v5550_v51, %v8227_v59  ;;  %v2553_v42 = vmul.bf16 %v5551_v2, %v8227_v59  ;;  %v1561_v48 = vld [vmem:[%s8185_s1 + $0x50] sm:$0xff]  ;;  %v1725_v51 = vld [vmem:[%s8186_s2 + $0x68] sm:$0xff] }
 0x348   : > { %v1751_v62 = vadd.f32 %v1735_v22, %v1574_v10  ;;  %v1618_v53 = vpop.permute.xlu1 %1617  ;;  %4955 = vmatprep.subr.bf16.mxu1 %v2546_v41  ;;  %5019 = vmatprep.subr.bf16.mxu0 %v2562_v3  ;;  %v1736_v37 = vmul.f32 %v1720_v7, %v1704_v14  ;;  %v1575_v36 = vmul.f32 %v1559_v28, %v6627_v60  ;;  %v1723_v41 = vld [vmem:[%s8186_s2 + $0x58] sm:$0xff] }
 0x349   : > { %v1576_v20 = vmul.f32 %v1560_v61, %v6636_v6  ;;  %v2536_v6 = vmul.bf16 %v5554_v50, %v1984_v30  ;;  %v1577_v49 = vmul.f32 %v1561_v48, %v6641_v17  ;;  %v1578_v10 = vmul.f32 %v1562_v34, %v6650_v26  ;;  %v1563_v17 = vld [vmem:[%s8185_s1 + $0x60] sm:$0xff]  ;;  %v1564_v26 = vld [vmem:[%s8185_s1 + $0x68] sm:$0xff]  ;;  %v1727_v61 = vld [vmem:[%s8186_s2 + $0x78] sm:$0xff] }
 0x34a   : > { %v1971_v15 = vpack.c.bf16 %v1751_v62, %v1750_v63  ;;  %v1620_v11 = vpop.permute.xlu0 %1619  ;;  %v1752_v29 = vadd.f32 %v1736_v37, %v1575_v36  ;;  %v1724_v62 = vld [vmem:[%s8186_s2 + $0x60] sm:$0xff]  ;;  %v1579_v30 = vmul.f32 %v1563_v17, %v6655_v8  ;;  %v1580_v7 = vmul.f32 %v1564_v26, %v6664_v24  ;;  %v1565_v8 = vld [vmem:[%s8185_s1 + $0x70] sm:$0xff]  ;;  %v1566_v24 = vld [vmem:[%s8185_s1 + $0x78] sm:$0xff] }
 0x34b   : > { %4956 = vmatpush3.bf16.msra.mxu1 %v2538_v23  ;;  %5020 = vmatpush3.bf16.msra.mxu0 %v2554_v4  ;;  %v1582_v37 = vmul.f32 %v1566_v24, %v6691_v45  ;;  %v2570_v50 = vld [vmem:[%s8192_s8 + $0x10] sm:$0xff]  ;;  %v2583_v24 = vld [vmem:[%s8192_s8 + $0x78] sm:$0xff] }
 0x34c   : > { %v1666_v55 = vpop.permute.xlu1 %1665  ;;  %4903 = vmatprep.mubr.msk.bf16.mxu1 %vm528_vm0, %v1971_v15  ;;  %4935 = vmatprep.mubr.msk.bf16.mxu0 %vm528_vm0, %v1971_v15 }
 0x34d   : > { %v1705_v31 = vsel %vm1695_vm1, %v1618_v53, %v1666_v55  ;;  %4957 = vmatprep.subr.bf16.mxu1 %v2545_v9  ;;  %5021 = vmatprep.subr.bf16.mxu0 %v2561_v57  ;;  %v1581_v57 = vmul.f32 %v1565_v8, %v6669_v52  ;;  %v2568_v52 = vld [vmem:[%s8192_s8] sm:$0xff] }
 0x34e   : > { %v1737_v12 = vmul.f32 %v1721_v39, %v1705_v31  ;;  %v1668_v40 = vpop.permute.xlu0 %1667  ;;  %4904 = vmatmul.mubr.msk.bf16.gmra.mxu1 %vm528_vm0, %v1971_v15  ;;  %4936 = vmatmul.mubr.msk.bf16.gmra.mxu0 %vm528_vm0, %v1971_v15  ;;  %v1726_v15 = vld [vmem:[%s8186_s2 + $0x70] sm:$0xff] }
 0x34f   : > { %4958 = vmatpush3.bf16.msra.mxu1 %v2537_v58  ;;  %5022 = vmatpush3.bf16.msra.mxu0 %v2553_v42  ;;  %v1706_v60 = vsel %vm1695_vm1, %v1620_v11, %v1668_v40  ;;  %v2571_v40 = vld [vmem:[%s8192_s8 + $0x18] sm:$0xff] }
 0x350   : > { %v1753_v46 = vadd.f32 %v1737_v12, %v1576_v20  ;;  %v1622_v1 = vpop.permute.xlu1 %1621  ;;  %4959 = vmatprep.subr.bf16.mxu1 %v2544_v13  ;;  %5023 = vmatprep.subr.bf16.mxu0 %v2560_v38  ;;  %v1738_v3 = vmul.f32 %v1722_v56, %v1706_v60  ;;  %v2569_v38 = vld [vmem:[%s8192_s8 + $0x8] sm:$0xff] }
 0x351   : > { %v2573_v56 = vld [vmem:[%s8192_s8 + $0x28] sm:$0xff] }
 0x352   : > { %v1972_v43 = vpack.c.bf16 %v1753_v46, %v1752_v29  ;;  %v1624_v5 = vpop.permute.xlu0 %1623  ;;  %v1754_v33 = vadd.f32 %v1738_v3, %v1577_v49  ;;  %v2572_v29 = vld [vmem:[%s8192_s8 + $0x20] sm:$0xff] }
 0x353   : > { %4960 = vmatpush3.bf16.msra.mxu1 %v2536_v6  ;;  %5024 = vmatpush3.bf16.msra.mxu0 %v2552_v18  ;;  %v2574_v18 = vld [vmem:[%s8192_s8 + $0x30] sm:$0xff] }
 0x354   : > { %v1670_v35 = vpop.permute.xlu1 %1669  ;;  %4905 = vmatprep.mubr.msk.bf16.mxu1 %vm528_vm0, %v1972_v43  ;;  %4937 = vmatprep.mubr.msk.bf16.mxu0 %vm528_vm0, %v1972_v43 }
 0x355   : > { %v1707_v19 = vsel %vm1695_vm1, %v1622_v1, %v1670_v35  ;;  %5073 = vmatprep.subr.bf16.mxu1 %v6943_v16  ;;  %5137 = vmatprep.subr.bf16.mxu0 %v6948_v25  ;;  %v2575_v35 = vld [vmem:[%s8192_s8 + $0x38] sm:$0xff] }
 0x356   : > { %v1739_v22 = vmul.f32 %v1723_v41, %v1707_v19  ;;  %v1672_v27 = vpop.permute.xlu0 %1671  ;;  %4906 = vmatmul.mubr.msk.bf16.gmra.mxu1 %vm528_vm0, %v1972_v43  ;;  %4938 = vmatmul.mubr.msk.bf16.gmra.mxu0 %vm528_vm0, %v1972_v43  ;;  %v2576_v19 = vld [vmem:[%s8192_s8 + $0x40] sm:$0xff] }
 0x357   : > { %v1708_v16 = vsel %vm1695_vm1, %v1624_v5, %v1672_v27 }
 0x358   : > { %v1755_v0 = vadd.f32 %v1739_v22, %v1578_v10  ;;  %v1626_v63 = vpop.permute.xlu1 %1625  ;;  %v1740_v2 = vmul.f32 %v1724_v62, %v1708_v16  ;;  %v2577_v22 = vld [vmem:[%s8192_s8 + $0x48] sm:$0xff] }
 0x35a   : > { %v1973_v25 = vpack.c.bf16 %v1755_v0, %v1754_v33  ;;  %v1628_v53 = vpop.permute.xlu0 %1627  ;;  %v1756_v4 = vadd.f32 %v1740_v2, %v1579_v30  ;;  %v2580_v2 = vld [vmem:[%s8192_s8 + $0x60] sm:$0xff]  ;;  %v2581_v30 = vld [vmem:[%s8192_s8 + $0x68] sm:$0xff] }
 0x35c   : > { %v1674_v47 = vpop.permute.xlu1 %1673  ;;  %4907 = vmatprep.mubr.msk.bf16.mxu1 %vm528_vm0, %v1973_v25  ;;  %4939 = vmatprep.mubr.msk.bf16.mxu0 %vm528_vm0, %v1973_v25 }
 0x35d   : > { %v1709_v54 = vsel %vm1695_vm1, %v1626_v63, %v1674_v47  ;;  %v2578_v63 = vld [vmem:[%s8192_s8 + $0x50] sm:$0xff] }
 0x35e   : > { %v1741_v14 = vmul.f32 %v1725_v51, %v1709_v54  ;;  %v1676_v23 = vpop.permute.xlu0 %1675  ;;  %4908 = vmatmul.mubr.msk.bf16.gmra.mxu1 %vm528_vm0, %v1973_v25  ;;  %4940 = vmatmul.mubr.msk.bf16.gmra.mxu0 %vm528_vm0, %v1973_v25  ;;  %v2579_v51 = vld [vmem:[%s8192_s8 + $0x58] sm:$0xff] }
 0x35f   : > { %v1710_v11 = vsel %vm1695_vm1, %v1628_v53, %v1676_v23 }
 0x360   : > { %v1757_v32 = vadd.f32 %v1741_v14, %v1580_v7  ;;  %v1630_v21 = vpop.permute.xlu1 %1629  ;;  %v1742_v39 = vmul.f32 %v1726_v15, %v1710_v11 }
 0x362   : > { %v1974_v28 = vpack.c.bf16 %v1757_v32, %v1756_v4  ;;  %v1758_v58 = vadd.f32 %v1742_v39, %v1581_v57  ;;  %v2582_v4 = vld [vmem:[%s8192_s8 + $0x70] sm:$0xff] }
 0x364   : > { %v1678_v59 = vpop.permute.xlu1 %1677  ;;  %4909 = vmatprep.mubr.msk.bf16.mxu1 %vm528_vm0, %v1974_v28  ;;  %4941 = vmatprep.mubr.msk.bf16.mxu0 %vm528_vm0, %v1974_v28 }
 0x365   : > { %v1711_v9 = vsel %vm1695_vm1, %v1630_v21, %v1678_v59 }
 0x366   : > { %v1743_v55 = vmul.f32 %v1727_v61, %v1711_v9  ;;  %4910 = vmatmul.mubr.msk.bf16.gmra.mxu1 %vm528_vm0, %v1974_v28  ;;  %4942 = vmatmul.mubr.msk.bf16.gmra.mxu0 %vm528_vm0, %v1974_v28  ;;  %v2584_v61 = vld [vmem:[%s8192_s8 + $0x80] sm:$0xff]  ;;  %v2585_v9 = vld [vmem:[%s8192_s8 + $0x88] sm:$0xff] }
 0x368   : > { %v1759_v42 = vadd.f32 %v1743_v55, %v1582_v37 }
 0x36a   : > { %v1975_v31 = vpack.c.bf16 %v1759_v42, %v1758_v58  ;;  %v2586_v58 = vld [vmem:[%s8192_s8 + $0x90] sm:$0xff] }
 0x36c   : > { %4911 = vmatprep.mubr.msk.bf16.mxu1 %vm528_vm0, %v1975_v31  ;;  %4943 = vmatprep.mubr.msk.bf16.mxu0 %vm528_vm0, %v1975_v31 }
 0x36e   : > { %4912 = vmatmul.mubr.msk.bf16.gmra.mxu1 %vm528_vm0, %v1975_v31  ;;  %4944 = vmatmul.mubr.msk.bf16.gmra.mxu0 %vm528_vm0, %v1975_v31 }
 0x3f6   : > { %v2786_v45 = vpop.f32.mrf.mxu1  ;;  %v2899_v13 = vpop.f32.mrf.mxu0 }
 0x3f7   : > { %v7237_v20 = vadd.f32 %v2786_v45, %v2568_v52  ;;  %v7250_v60 = vadd.f32 %v2899_v13, %v2570_v50  ;;  %v2587_v50 = vld [vmem:[%s8192_s8 + $0x98] sm:$0xff] }
 0x3f8   : > { %v2788_v44 = vpop.f32.mrf.mxu1  ;;  %v2901_v36 = vpop.f32.mrf.mxu0 }
 0x3f9   : > { %v7239_v12 = vadd.f32 %v2788_v44, %v2569_v38  ;;  %v7257_v48 = vadd.f32 %v2901_v36, %v2571_v40  ;;  %v2588_v44 = vld [vmem:[%s8192_s8 + $0xa0] sm:$0xff] }
 0x3fa   : > { %v2790_v46 = vpop.f32.mrf.mxu1  ;;  %v2903_v1 = vpop.f32.mrf.mxu0 }
 0x3fb   : > { %v2978_v6 = vmax.f32 %v7237_v20, %v7239_v12  ;;  %v7259_v34 = vadd.f32 %v2790_v46, %v2572_v29  ;;  %v7273_v27 = vadd.f32 %v2903_v1, %v2574_v18  ;;  %v2589_v29 = vld [vmem:[%s8192_s8 + $0xa8] sm:$0xff] }
 0x3fc   : > { %v2792_v43 = vpop.f32.mrf.mxu1  ;;  %v2905_v5 = vpop.f32.mrf.mxu0 }
 0x3fd   : > { %v7261_v41 = vadd.f32 %v2792_v43, %v2573_v56  ;;  %v2979_v3 = vmax.f32 %v2978_v6, %v7250_v60  ;;  %v7281_v25 = vadd.f32 %v2905_v5, %v2575_v35  ;;  %v2590_v6 = vld [vmem:[%s8192_s8 + $0xb0] sm:$0xff] }
 0x3fe   : > { %v2796_v49 = vpop.f32.mrf.mxu1  ;;  %v2909_v10 = vpop.f32.mrf.mxu0 }
 0x3ff   : > { %v2983_v33 = vmax.f32 %v7259_v34, %v7261_v41  ;;  %v2980_v0 = vmax.f32 %v2979_v3, %v7257_v48  ;;  %v7283_v53 = vadd.f32 %v2796_v49, %v2576_v19  ;;  %v7297_v7 = vadd.f32 %v2909_v10, %v2578_v63  ;;  %v2591_v49 = vld [vmem:[%s8192_s8 + $0xb8] sm:$0xff]  ;;  %v2592_v10 = vld [vmem:[%s8192_s8 + $0xc0] sm:$0xff] }
 0x400   : > { %v2798_v62 = vpop.f32.mrf.mxu1  ;;  %v2911_v16 = vpop.f32.mrf.mxu0 }
 0x401   : > { %v7285_v17 = vadd.f32 %v2798_v62, %v2577_v22  ;;  %2981 = vmax.xlane.f32.xlu0 %v2980_v0  ;;  %v2984_v26 = vmax.f32 %v2983_v33, %v7273_v27  ;;  %v7305_v15 = vadd.f32 %v2911_v16, %v2579_v51  ;;  %v2593_v0 = vld [vmem:[%s8192_s8 + $0xc8] sm:$0xff] }
 0x402   : > { %v2800_v47 = vpop.f32.mrf.mxu1  ;;  %v2913_v54 = vpop.f32.mrf.mxu0 }
 0x403   : > { %v2988_v14 = vmax.f32 %v7283_v53, %v7285_v17  ;;  %v2985_v23 = vmax.f32 %v2984_v26, %v7281_v25  ;;  %v7307_v11 = vadd.f32 %v2800_v47, %v2580_v2  ;;  %v7321_v57 = vadd.f32 %v2913_v54, %v2582_v4  ;;  %v2594_v26 = vld [vmem:[%s8192_s8 + $0xd0] sm:$0xff]  ;;  %v2596_v4 = vld [vmem:[%s8192_s8 + $0xe0] sm:$0xff] }
 0x404   : > { %v2802_v32 = vpop.f32.mrf.mxu1  ;;  %v2915_v21 = vpop.f32.mrf.mxu0 }
 0x405   : > { %v7309_v28 = vadd.f32 %v2802_v32, %v2581_v30  ;;  %2986 = vmax.xlane.f32.xlu1 %v2985_v23  ;;  %v2989_v8 = vmax.f32 %v2988_v14, %v7297_v7  ;;  %v7329_v52 = vadd.f32 %v2915_v21, %v2583_v24  ;;  %v2595_v23 = vld [vmem:[%s8192_s8 + $0xd8] sm:$0xff] }
 0x406   : > { %v2806_v39 = vpop.f32.mrf.mxu1  ;;  %v2919_v59 = vpop.f32.mrf.mxu0 }
 0x407   : > { %v2993_v37 = vmax.f32 %v7307_v11, %v7309_v28  ;;  %v2990_v55 = vmax.f32 %v2989_v8, %v7305_v15  ;;  %v7331_v45 = vadd.f32 %v2806_v39, %v2584_v61  ;;  %v7345_v46 = vadd.f32 %v2919_v59, %v2586_v58  ;;  %v2597_v8 = vld [vmem:[%s8192_s8 + $0xe8] sm:$0xff]  ;;  %v2598_v59 = vld [vmem:[%s8192_s8 + $0xf0] sm:$0xff] }
 0x408   : > { %v2808_v42 = vpop.f32.mrf.mxu1  ;;  %v2921_v31 = vpop.f32.mrf.mxu0 }
 0x409   : > { %v7333_v13 = vadd.f32 %v2808_v42, %v2585_v9  ;;  %2991 = vmax.xlane.f32.xlu0 %v2990_v55  ;;  %v2994_v38 = vmax.f32 %v2993_v37, %v7321_v57  ;;  %v7353_v5 = vadd.f32 %v2921_v31, %v2587_v50  ;;  %v2600_v50 = vld [vmem:[%s8192_s8 + $0x100] sm:$0xff] }
 0x40a   : > { %v2810_v36 = vpop.f32.mrf.mxu1  ;;  %v2923_v40 = vpop.f32.mrf.mxu0 }
 0x40b   : > { %v2998_v1 = vmax.f32 %v7331_v45, %v7333_v13  ;;  %v2995_v56 = vmax.f32 %v2994_v38, %v7329_v52  ;;  %v7355_v3 = vadd.f32 %v2810_v36, %v2588_v44  ;;  %v7369_v63 = vadd.f32 %v2923_v40, %v2590_v6  ;;  %v2599_v38 = vld [vmem:[%s8192_s8 + $0xf8] sm:$0xff]  ;;  %v2601_v40 = vld [vmem:[%s8192_s8 + $0x108] sm:$0xff]  ;;  %v2602_v6 = vld [vmem:[%s8192_s8 + $0x110] sm:$0xff] }
 0x40c   : > { %v2812_v18 = vpop.f32.mrf.mxu1  ;;  %v2925_v43 = vpop.f32.mrf.mxu0 }
 0x40d   : > { %v7357_v35 = vadd.f32 %v2812_v18, %v2589_v29  ;;  %2996 = vmax.xlane.f32.xlu0 %v2995_v56  ;;  %v2999_v19 = vmax.f32 %v2998_v1, %v7345_v46  ;;  %v7377_v47 = vadd.f32 %v2925_v43, %v2591_v49 }
 0x40e   : > { %v2816_v22 = vpop.f32.mrf.mxu1  ;;  %v2929_v33 = vpop.f32.mrf.mxu0 }
 0x40f   : > { %v3003_v62 = vmax.f32 %v7355_v3, %v7357_v35  ;;  %v3000_v16 = vmax.f32 %v2999_v19, %v7353_v5  ;;  %v7379_v54 = vadd.f32 %v2816_v22, %v2592_v10  ;;  %v7393_v24 = vadd.f32 %v2929_v33, %v2594_v26  ;;  %v2603_v33 = vld [vmem:[%s8192_s8 + $0x118] sm:$0xff]  ;;  %v2605_v26 = vld [vmem:[%s8192_s8 + $0x128] sm:$0xff] }
 0x410   : > { %v2818_v51 = vpop.f32.mrf.mxu1  ;;  %v2931_v2 = vpop.f32.mrf.mxu0 }
 0x411   : > { %v7381_v30 = vadd.f32 %v2818_v51, %v2593_v0  ;;  %3001 = vmax.xlane.f32.xlu0 %v3000_v16  ;;  %v3004_v14 = vmax.f32 %v3003_v62, %v7369_v63  ;;  %v7401_v55 = vadd.f32 %v2931_v2, %v2595_v23  ;;  %v2604_v0 = vld [vmem:[%s8192_s8 + $0x120] sm:$0xff]  ;;  %v2606_v23 = vld [vmem:[%s8192_s8 + $0x130] sm:$0xff] }
 0x412   : > { %v2820_v32 = vpop.f32.mrf.mxu1  ;;  %v2933_v21 = vpop.f32.mrf.mxu0 }
 0x413   : > { %v3008_v61 = vmax.f32 %v7379_v54, %v7381_v30  ;;  %v3005_v39 = vmax.f32 %v3004_v14, %v7377_v47  ;;  %v7403_v58 = vadd.f32 %v2820_v32, %v2596_v4  ;;  %v7417_v29 = vadd.f32 %v2933_v21, %v2598_v59  ;;  %v2607_v59 = vld [vmem:[%s8192_s8 + $0x138] sm:$0xff] }
 0x414   : > { %v2822_v9 = vpop.f32.mrf.mxu1  ;;  %v2935_v37 = vpop.f32.mrf.mxu0 }
 0x415   : > { %v7405_v42 = vadd.f32 %v2822_v9, %v2597_v8  ;;  %3006 = vmax.xlane.f32.xlu1 %v3005_v39  ;;  %v3009_v31 = vmax.f32 %v3008_v61, %v7393_v24  ;;  %v7425_v19 = vadd.f32 %v2935_v37, %v2599_v38  ;;  %v2608_v9 = vld [vmem:[%s8192_s8 + $0x140] sm:$0xff]  ;;  %v2609_v38 = vld [vmem:[%s8192_s8 + $0x148] sm:$0xff] }
 0x416   : > { %v2826_v44 = vpop.f32.mrf.mxu1  ;;  %v2939_v36 = vpop.f32.mrf.mxu0 }
 0x417   : > { %v3013_v1 = vmax.f32 %v7403_v58, %v7405_v42  ;;  %v3010_v56 = vmax.f32 %v3009_v31, %v7401_v55  ;;  %v7427_v49 = vadd.f32 %v2826_v44, %v2600_v50  ;;  %v7441_v51 = vadd.f32 %v2939_v36, %v2602_v6 }
 0x418   : > { %v2828_v18 = vpop.f32.mrf.mxu1  ;;  %v2941_v43 = vpop.f32.mrf.mxu0 }
 0x419   : > { %v7429_v10 = vadd.f32 %v2828_v18, %v2601_v40  ;;  %3011 = vmax.xlane.f32.xlu0 %v3010_v56  ;;  %v3014_v22 = vmax.f32 %v3013_v1, %v7417_v29  ;;  %v7449_v21 = vadd.f32 %v2941_v43, %v2603_v33  ;;  %v2610_v40 = vld [vmem:[%s8192_s8 + $0x150] sm:$0xff]  ;;  %v2611_v33 = vld [vmem:[%s8192_s8 + $0x158] sm:$0xff] }
 0x41a   : > { %v2830_v62 = vpop.f32.mrf.mxu1  ;;  %v2943_v16 = vpop.f32.mrf.mxu0 }
 0x41b   : > { %v3018_v2 = vmax.f32 %v7427_v49, %v7429_v10  ;;  %v3015_v14 = vmax.f32 %v3014_v22, %v7425_v19  ;;  %v7451_v8 = vadd.f32 %v2830_v62, %v2604_v0  ;;  %v7465_v50 = vadd.f32 %v2943_v16, %v2606_v23  ;;  %v2612_v0 = vld [vmem:[%s8192_s8 + $0x160] sm:$0xff] }
 0x41c   : > { %v2832_v4 = vpop.f32.mrf.mxu1  ;;  %v2945_v32 = vpop.f32.mrf.mxu0 }
 0x41d   : > { %v7453_v61 = vadd.f32 %v2832_v4, %v2605_v26  ;;  %3016 = vmax.xlane.f32.xlu1 %v3015_v14  ;;  %v3019_v39 = vmax.f32 %v3018_v2, %v7441_v51  ;;  %v7473_v6 = vadd.f32 %v2945_v32, %v2607_v59  ;;  %v2613_v26 = vld [vmem:[%s8192_s8 + $0x168] sm:$0xff]  ;;  %v2614_v4 = vld [vmem:[%s8192_s8 + $0x170] sm:$0xff] }
 0x41e   : > { %v2836_v37 = vpop.f32.mrf.mxu1  ;;  %v2949_v31 = vpop.f32.mrf.mxu0 }
 0x41f   : > { %v3023_v44 = vmax.f32 %v7451_v8, %v7453_v61  ;;  %v3020_v36 = vmax.f32 %v3019_v39, %v7449_v21  ;;  %v7475_v18 = vadd.f32 %v2836_v37, %v2608_v9  ;;  %v7489_v2 = vadd.f32 %v2949_v31, %v2610_v40 }
 0x420   : > { %v2838_v1 = vpop.f32.mrf.mxu1  ;;  %v2951_v56 = vpop.f32.mrf.mxu0 }
 0x421   : > { %v7477_v43 = vadd.f32 %v2838_v1, %v2609_v38  ;;  %3021 = vmax.xlane.f32.xlu0 %v3020_v36  ;;  %v3024_v22 = vmax.f32 %v3023_v44, %v7465_v50  ;;  %v7497_v59 = vadd.f32 %v2951_v56, %v2611_v33  ;;  %v2615_v38 = vld [vmem:[%s8192_s8 + $0x178] sm:$0xff]  ;;  %v2616_v44 = vld [vmem:[%s8192_s8 + $0x180] sm:$0xff]  ;;  %v2617_v1 = vld [vmem:[%s8192_s8 + $0x188] sm:$0xff] }
 0x422   : > { %v2840_v62 = vpop.f32.mrf.mxu1  ;;  %v2953_v16 = vpop.f32.mrf.mxu0 }
 0x423   : > { %v3028_v14 = vmax.f32 %v7475_v18, %v7477_v43  ;;  %v3025_v23 = vmax.f32 %v3024_v22, %v7473_v6  ;;  %8228 = vst [vmem:[#allocation5_spill] sm:$0xff] %v7497_v59  ;;  %v7499_v9 = vadd.f32 %v2840_v62, %v2612_v0  ;;  %v7513_v56 = vadd.f32 %v2953_v16, %v2614_v4  ;;  %v2618_v0 = vld [vmem:[%s8192_s8 + $0x190] sm:$0xff]  ;;  %v2619_v4 = vld [vmem:[%s8192_s8 + $0x198] sm:$0xff] }
 0x424   : > { %v2842_v32 = vpop.f32.mrf.mxu1  ;;  %v2955_v39 = vpop.f32.mrf.mxu0 }
 0x425   : > { %8229 = vst [vmem:[#allocation7_spill] sm:$0xff] %v7499_v9  ;;  %v7501_v37 = vadd.f32 %v2842_v32, %v2613_v26  ;;  %3026 = vmax.xlane.f32.xlu1 %v3025_v23  ;;  %v3029_v31 = vmax.f32 %v3028_v14, %v7489_v2  ;;  %8231 = vst [vmem:[#allocation2_spill] sm:$0xff] %v7513_v56  ;;  %v7521_v14 = vadd.f32 %v2955_v39, %v2615_v38  ;;  %v2621_v39 = vld [vmem:[%s8192_s8 + $0x1a8] sm:$0xff] }
 0x426   : > { %v2846_v36 = vpop.f32.mrf.mxu1  ;;  %v2959_v40 = vpop.f32.mrf.mxu0 }
 0x427   : > { %8230 = vst [vmem:[#allocation6_spill] sm:$0xff] %v7501_v37  ;;  %v3033_v22 = vmax.f32 %v7499_v9, %v7501_v37  ;;  %v3030_v33 = vmax.f32 %v3029_v31, %v7497_v59  ;;  %8232 = vst [vmem:[#allocation4_spill] sm:$0xff] %v7521_v14  ;;  %v7523_v23 = vadd.f32 %v2846_v36, %v2616_v44  ;;  %v2620_v31 = vld [vmem:[%s8192_s8 + $0x1a0] sm:$0xff] }
 0x428   : > { %v2848_v62 = vpop.f32.mrf.mxu1  ;;  %v2961_v26 = vpop.f32.mrf.mxu0  ;;  %v7537_v38 = vadd.f32 %v2959_v40, %v2618_v0  ;;  %v2623_v0 = vld [vmem:[%s8192_s8 + $0x1b8] sm:$0xff] }
 0x429   : > { %8233 = vst [vmem:[#allocation3_spill] sm:$0xff] %v7523_v23  ;;  %v7525_v32 = vadd.f32 %v2848_v62, %v2617_v1  ;;  %3031 = vmax.xlane.f32.xlu0 %v3030_v33  ;;  %v3034_v16 = vmax.f32 %v3033_v22, %v7513_v56  ;;  %v2622_v1 = vld [vmem:[%s8192_s8 + $0x1b0] sm:$0xff]  ;;  %v7545_v62 = vadd.f32 %v2961_v26, %v2619_v4 }
 0x42a   : > { %v2850_v37 = vpop.f32.mrf.mxu1  ;;  %v2963_v9 = vpop.f32.mrf.mxu0  ;;  %8235 = vst [vmem:[#allocation9_spill] sm:$0xff] %v7537_v38 }
 0x42b   : > { %8234 = vst [vmem:[#allocation8_spill] sm:$0xff] %v7525_v32  ;;  %v3038_v44 = vmax.f32 %v7523_v23, %v7525_v32  ;;  %v3035_v36 = vmax.f32 %v3034_v16, %v7521_v14  ;;  %v7547_v56 = vadd.f32 %v2850_v37, %v2620_v31  ;;  %v2624_v16 = vld [vmem:[%s8192_s8 + $0x1c0] sm:$0xff]  ;;  %v2625_v37 = vld [vmem:[%s8192_s8 + $0x1c8] sm:$0xff]  ;;  %v7561_v26 = vadd.f32 %v2963_v9, %v2622_v1  ;;  %v2627_v1 = vld [vmem:[%s8192_s8 + $0x1d8] sm:$0xff] }
 0x42c   : > { %v2852_v22 = vpop.f32.mrf.mxu1  ;;  %v2965_v33 = vpop.f32.mrf.mxu0 }
 0x42d   : > { %8236 = vst [vmem:[#allocation10_spill] sm:$0xff] %v7547_v56  ;;  %v7549_v59 = vadd.f32 %v2852_v22, %v2621_v39  ;;  %3036 = vmax.xlane.f32.xlu1 %v3035_v36  ;;  %v3039_v40 = vmax.f32 %v3038_v44, %v7537_v38  ;;  %8238 = vst [vmem:[#allocation12_spill] sm:$0xff] %v7561_v26  ;;  %v2626_v39 = vld [vmem:[%s8192_s8 + $0x1d0] sm:$0xff]  ;;  %v7569_v22 = vadd.f32 %v2965_v33, %v2623_v0 }
 0x42e   : > { %v2856_v32 = vpop.f32.mrf.mxu1  ;;  %v2969_v23 = vpop.f32.mrf.mxu0 }
 0x42f   : > { %8237 = vst [vmem:[#allocation11_spill] sm:$0xff] %v7549_v59  ;;  %v3043_v4 = vmax.f32 %v7547_v56, %v7549_v59  ;;  %v3040_v31 = vmax.f32 %v3039_v40, %v7545_v62  ;;  %v7571_v38 = vadd.f32 %v2856_v32, %v2624_v16  ;;  %v2628_v40 = vld [vmem:[%s8192_s8 + $0x1e0] sm:$0xff]  ;;  %v2629_v32 = vld [vmem:[%s8192_s8 + $0x1e8] sm:$0xff]  ;;  %v7585_v33 = vadd.f32 %v2969_v23, %v2626_v39  ;;  %v2631_v39 = vld [vmem:[%s8192_s8 + $0x1f8] sm:$0xff] }
 0x430   : > { %v2858_v44 = vpop.f32.mrf.mxu1  ;;  %v2971_v36 = vpop.f32.mrf.mxu0 }
 0x431   : > { %8239 = vst [vmem:[#allocation13_spill] sm:$0xff] %v7571_v38  ;;  %v7573_v14 = vadd.f32 %v2858_v44, %v2625_v37  ;;  %3041 = vmax.xlane.f32.xlu0 %v3040_v31  ;;  %v3044_v9 = vmax.f32 %v3043_v4, %v7561_v26  ;;  %v2630_v37 = vld [vmem:[%s8192_s8 + $0x1f0] sm:$0xff]  ;;  %v7593_v31 = vadd.f32 %v2971_v36, %v2627_v1 }
 0x432   : > { %v2860_v59 = vpop.f32.mrf.mxu1  ;;  %v2973_v56 = vpop.f32.mrf.mxu0 }
 0x433   : > { %8240 = vst [vmem:[#allocation14_spill] sm:$0xff] %v7573_v14  ;;  %v3048_v0 = vmax.f32 %v7571_v38, %v7573_v14  ;;  %v3045_v16 = vmax.f32 %v3044_v9, %v7569_v22  ;;  %v7595_v44 = vadd.f32 %v2860_v59, %v2628_v40  ;;  %v7603_v9 = vadd.f32 %v2973_v56, %v2630_v37 }
 0x434   : > { %v2862_v4 = vpop.f32.mrf.mxu1  ;;  %v2975_v14 = vpop.f32.mrf.mxu0 }
 0x435   : > { %v7597_v26 = vadd.f32 %v2862_v4, %v2629_v32  ;;  %3046 = vmax.xlane.f32.xlu1 %v3045_v16  ;;  %v3049_v23 = vmax.f32 %v3048_v0, %v7585_v33  ;;  %v7608_v1 = vadd.f32 %v2975_v14, %v2631_v39 }
 0x437   : > { %8241 = vst [vmem:[#allocation15_spill] sm:$0xff] %v7597_v26  ;;  %v3053_v38 = vmax.f32 %v7595_v44, %v7597_v26  ;;  %v3050_v36 = vmax.f32 %v3049_v23, %v7593_v31 }
 0x439   : > { %3051 = vmax.xlane.f32.xlu0 %v3050_v36  ;;  %v3054_v59 = vmax.f32 %v3053_v38, %v7603_v9 }
 0x43b   : > { %v3055_v40 = vmax.f32 %v3054_v59, %v7608_v1 }
 0x43d   : > { %3056 = vmax.xlane.f32.xlu1 %v3055_v40 }
 0x48a   : > { %v2982_v32 = vpop.xlane.xlu0 %2981 }
 0x48b   : > { %v3058_v0 = vsub.f32 %v7237_v20, %v2982_v32  ;;  %v3059_v16 = vsub.f32 %v7239_v12, %v2982_v32  ;;  %v3060_v56 = vsub.f32 %v7250_v60, %v2982_v32  ;;  %v3061_v37 = vsub.f32 %v7257_v48, %v2982_v32 }
 0x48d   : > { %v3122_v4 = vmul.f32 1.442695, %v3058_v0  ;;  %v3124_v26 = vmul.f32 1.442695, %v3059_v16  ;;  %v3126_v23 = vmul.f32 1.442695, %v3060_v56 }
 0x48e   : > { %v3128_v14 = vmul.f32 1.442695, %v3061_v37  ;;  %v2987_v39 = vpop.xlane.xlu1 %2986 }
 0x48f   : > { %5684 = vpow2.f32 %v3122_v4  ;;  %v3062_v38 = vsub.f32 %v7259_v34, %v2987_v39  ;;  %v3063_v36 = vsub.f32 %v7261_v41, %v2987_v39  ;;  %v3064_v59 = vsub.f32 %v7273_v27, %v2987_v39 }
 0x490   : > { %5686 = vpow2.f32 %v3124_v26  ;;  %v3065_v20 = vsub.f32 %v7281_v25, %v2987_v39 }
 0x491   : > { %5688 = vpow2.f32 %v3126_v23  ;;  %v3130_v12 = vmul.f32 1.442695, %v3062_v38  ;;  %v3132_v60 = vmul.f32 1.442695, %v3063_v36  ;;  %v3134_v40 = vmul.f32 1.442695, %v3064_v59 }
 0x492   : > { %5690 = vpow2.f32 %v3128_v14  ;;  %v3136_v48 = vmul.f32 1.442695, %v3065_v20  ;;  %v2992_v32 = vpop.xlane.xlu0 %2991 }
 0x493   : > { %5692 = vpow2.f32 %v3130_v12  ;;  %v3066_v0 = vsub.f32 %v7283_v53, %v2992_v32  ;;  %v3067_v16 = vsub.f32 %v7285_v17, %v2992_v32  ;;  %v3068_v34 = vsub.f32 %v7297_v7, %v2992_v32 }
 0x494   : > { %5694 = vpow2.f32 %v3132_v60  ;;  %v3069_v41 = vsub.f32 %v7305_v15, %v2992_v32 }
 0x495   : > { %5696 = vpow2.f32 %v3134_v40  ;;  %v3138_v27 = vmul.f32 1.442695, %v3066_v0  ;;  %v3140_v25 = vmul.f32 1.442695, %v3067_v16  ;;  %v3142_v26 = vmul.f32 1.442695, %v3068_v34 }
 0x496   : > { %5698 = vpow2.f32 %v3136_v48  ;;  %v3144_v56 = vmul.f32 1.442695, %v3069_v41  ;;  %v2997_v37 = vpop.xlane.xlu0 %2996 }
 0x497   : > { %5700 = vpow2.f32 %v3138_v27  ;;  %v3070_v4 = vsub.f32 %v7307_v11, %v2997_v37  ;;  %v3071_v23 = vsub.f32 %v7309_v28, %v2997_v37  ;;  %v3072_v53 = vsub.f32 %v7321_v57, %v2997_v37 }
 0x498   : > { %5702 = vpow2.f32 %v3140_v25  ;;  %v3073_v17 = vsub.f32 %v7329_v52, %v2997_v37 }
 0x499   : > { %5704 = vpow2.f32 %v3142_v26  ;;  %v3146_v7 = vmul.f32 1.442695, %v3070_v4  ;;  %v3148_v15 = vmul.f32 1.442695, %v3071_v23  ;;  %v3150_v14 = vmul.f32 1.442695, %v3072_v53 }
 0x49a   : > { %5706 = vpow2.f32 %v3144_v56  ;;  %v3152_v39 = vmul.f32 1.442695, %v3073_v17  ;;  %v3002_v38 = vpop.xlane.xlu0 %3001 }
 0x49b   : > { %5708 = vpow2.f32 %v3146_v7  ;;  %v3074_v36 = vsub.f32 %v7331_v45, %v3002_v38  ;;  %v3075_v59 = vsub.f32 %v7333_v13, %v3002_v38  ;;  %v3076_v11 = vsub.f32 %v7345_v46, %v3002_v38 }
 0x49c   : > { %v5685_v28 = vpop.eup %5684  ;;  %5710 = vpow2.f32 %v3148_v15  ;;  %v3077_v57 = vsub.f32 %v7353_v5, %v3002_v38 }
 0x49d   : > { %v5687_v20 = vpop.eup %5686  ;;  %5712 = vpow2.f32 %v3150_v14  ;;  %v3154_v52 = vmul.f32 1.442695, %v3074_v36  ;;  %v3156_v12 = vmul.f32 1.442695, %v3075_v59  ;;  %v3158_v60 = vmul.f32 1.442695, %v3076_v11 }
 0x49e   : > { %v5689_v40 = vpop.eup %5688  ;;  %5714 = vpow2.f32 %v3152_v39  ;;  %v3160_v48 = vmul.f32 1.442695, %v3077_v57  ;;  %v3007_v32 = vpop.xlane.xlu1 %3006 }
 0x49f   : > { %v5691_v0 = vpop.eup %5690  ;;  %5716 = vpow2.f32 %v3154_v52  ;;  %v3078_v45 = vsub.f32 %v7355_v3, %v3007_v32  ;;  %v3079_v13 = vsub.f32 %v7357_v35, %v3007_v32  ;;  %v3080_v46 = vsub.f32 %v7369_v63, %v3007_v32 }
 0x4a0   : > { %v5693_v16 = vpop.eup %5692  ;;  %5718 = vpow2.f32 %v3156_v12  ;;  %v3081_v5 = vsub.f32 %v7377_v47, %v3007_v32  ;;  %v5878_v12 = vld [vmem:[%s8191_s7 + $0xb8] sm:$0xff]  }
 0x4a1   : > { %v5695_v34 = vpop.eup %5694  ;;  %5720 = vpow2.f32 %v3158_v60  ;;  %v3162_v41 = vmul.f32 1.442695, %v3078_v45  ;;  %v3164_v27 = vmul.f32 1.442695, %v3079_v13  ;;  %v3166_v25 = vmul.f32 1.442695, %v3080_v46 }
 0x4a2   : > { %v5697_v26 = vpop.eup %5696  ;;  %5722 = vpow2.f32 %v3160_v48  ;;  %v3168_v56 = vmul.f32 1.442695, %v3081_v5  ;;  %v3012_v37 = vpop.xlane.xlu0 %3011  ;;  %v7636_v4 = vpack.c.bf16 %v5695_v34, %v5687_v20  ;;  %v7638_v3 = vpack.c.bf16 %v5693_v16, %v5685_v28  ;;  %v5877_v20 = vld [vmem:[%s8191_s7 + $0x70] sm:$0xff]  }
 0x4a3   : > { %v5699_v35 = vpop.eup %5698  ;;  %5724 = vpow2.f32 %v3162_v41  ;;  %v3082_v63 = vsub.f32 %v7379_v54, %v3012_v37  ;;  %v3083_v23 = vsub.f32 %v7381_v30, %v3012_v37  ;;  %v3084_v47 = vsub.f32 %v7393_v24, %v3012_v37  ;;  %v5876_v24 = vld [vmem:[%s8191_s7 + $0x38] sm:$0xff]  }
 0x4a4   : > { %v5701_v53 = vpop.eup %5700  ;;  %5726 = vpow2.f32 %v3164_v27  ;;  %v3085_v17 = vsub.f32 %v7401_v55, %v3012_v37  ;;  %3314 = vmatprep.mubr.bf16.mxu1 %v7636_v4  ;;  %v7645_v7 = vpack.c.bf16 %v5699_v35, %v5691_v0  ;;  %v7647_v15 = vpack.c.bf16 %v5697_v26, %v5689_v40  ;;  %v5881_v27 = vld [vmem:[%s8191_s7 + $0x68] sm:$0xff]  }
 0x4a5   : > { %v5703_v14 = vpop.eup %5702  ;;  %5728 = vpow2.f32 %v3166_v25  ;;  %v3170_v39 = vmul.f32 1.442695, %v3082_v63  ;;  %v3172_v38 = vmul.f32 1.442695, %v3083_v23  ;;  %v3174_v36 = vmul.f32 1.442695, %v3084_v47  ;;  %3315 = vmatmul.mubr.bf16.vlgmr.msra.gmra.mxu1 %v7638_v3 }
 0x4a6   : > { %v5705_v54 = vpop.eup %5704  ;;  %5730 = vpow2.f32 %v3168_v56  ;;  %v3176_v30 = vmul.f32 1.442695, %v3085_v17  ;;  %3411 = vmatprep.mubr.bf16.mxu0 %v7645_v7  ;;  %5074 = vmatpush3.bf16.msra.mxu1 %v5876_v24  ;;  %v3017_v55 = vpop.xlane.xlu1 %3016  ;;  %v5884_v17 = vld [vmem:[%s8191_s7 + $0x28] sm:$0xff]  }
 0x4a7   : > { %v5707_v59 = vpop.eup %5706  ;;  %5732 = vpow2.f32 %v3170_v39  ;;  %3412 = vmatmul.mubr.bf16.vlgmr.msra.gmra.mxu0 %v7647_v15  ;;  %v3086_v11 = vsub.f32 %v7403_v58, %v3017_v55  ;;  %v3087_v28 = vsub.f32 %v7405_v42, %v3017_v55  ;;  %v3088_v57 = vsub.f32 %v7417_v29, %v3017_v55  ;;  %5075 = vmatprep.subr.bf16.mxu1 %v5877_v20  ;;  %v5879_v29 = vld [vmem:[%s8191_s7 + $0xf0] sm:$0xff]  }
 0x4a8   : > { %v5709_v52 = vpop.eup %5708  ;;  %5734 = vpow2.f32 %v3172_v38  ;;  %5138 = vmatpush3.bf16.msra.mxu0 %v5878_v12  ;;  %v3089_v60 = vsub.f32 %v7425_v19, %v3017_v55  ;;  %v5880_v19 = vld [vmem:[%s8191_s7 + $0x30] sm:$0xff]   ;;  %v5886_v55 = vld [vmem:[%s8191_s7 + $0xa8] sm:$0xff]   ;;  %v5888_v12 = vld [vmem:[%s8191_s7 + $0x20] sm:$0xff]  }
 0x4a9   : > { %v5711_v40 = vpop.eup %5710  ;;  %5736 = vpow2.f32 %v3174_v36  ;;  %v3178_v58 = vmul.f32 1.442695, %v3086_v11  ;;  %v3180_v42 = vmul.f32 1.442695, %v3087_v28  ;;  %v3182_v48 = vmul.f32 1.442695, %v3088_v57  ;;  %5139 = vmatprep.subr.bf16.mxu0 %v5879_v29 }
 0x4aa   : > { %v5713_v32 = vpop.eup %5712  ;;  %5738 = vpow2.f32 %v3176_v30  ;;  %v3184_v0 = vmul.f32 1.442695, %v3089_v60  ;;  %v3022_v45 = vpop.xlane.xlu0 %3021  ;;  %v7668_v13 = vpack.c.bf16 %v5711_v40, %v5703_v14  ;;  %v7670_v46 = vpack.c.bf16 %v5709_v52, %v5701_v53  ;;  %5076 = vmatpush3.bf16.msra.mxu1 %v5880_v19 }
 0x4ab   : > { %v5715_v16 = vpop.eup %5714  ;;  %5740 = vpow2.f32 %v3178_v58  ;;  %v3090_v5 = vsub.f32 %v7427_v49, %v3022_v45  ;;  %v3091_v34 = vsub.f32 %v7429_v10, %v3022_v45  ;;  %v3092_v41 = vsub.f32 %v7441_v51, %v3022_v45  ;;  %5077 = vmatprep.subr.bf16.mxu1 %v5881_v27  ;;  %v5882_v49 = vld [vmem:[%s8191_s7 + $0xb0] sm:$0xff]  }
 0x4ac   : > { %v5717_v25 = vpop.eup %5716  ;;  %5742 = vpow2.f32 %v3180_v42  ;;  %v3093_v26 = vsub.f32 %v7449_v21, %v3022_v45  ;;  %3322 = vmatprep.mubr.bf16.mxu1 %v7668_v13  ;;  %v7683_v56 = vpack.c.bf16 %v5715_v16, %v5707_v59  ;;  %v7685_v37 = vpack.c.bf16 %v5713_v32, %v5705_v54  ;;  %5140 = vmatpush3.bf16.msra.mxu0 %v5882_v49  ;;  %v5883_v21 = vld [vmem:[%s8191_s7 + $0xe8] sm:$0xff]   ;;  %v5885_v54 = vld [vmem:[%s8191_s7 + $0x60] sm:$0xff]   ;;  %v8242_v32 = vld [vmem:[#allocation5_spill] sm:$0xff] }
 0x4ad   : > { %v5719_v10 = vpop.eup %5718  ;;  %5744 = vpow2.f32 %v3182_v48  ;;  %v3186_v51 = vmul.f32 1.442695, %v3090_v5  ;;  %v3188_v35 = vmul.f32 1.442695, %v3091_v34  ;;  %v3190_v63 = vmul.f32 1.442695, %v3092_v41  ;;  %3323 = vmatmul.mubr.bf16.gmra.mxu1 %v7670_v46  ;;  %5141 = vmatprep.subr.bf16.mxu0 %v5883_v21 }
 0x4ae   : > { %v5721_v23 = vpop.eup %5720  ;;  %5746 = vpow2.f32 %v3184_v0  ;;  %v3192_v47 = vmul.f32 1.442695, %v3093_v26  ;;  %3419 = vmatprep.mubr.bf16.mxu0 %v7683_v56  ;;  %v3027_v53 = vpop.xlane.xlu1 %3026  ;;  %5078 = vmatpush3.bf16.msra.mxu1 %v5884_v17  ;;  %v5889_v48 = vld [vmem:[%s8191_s7 + $0x58] sm:$0xff]   ;;  %v8245_v21 = vld [vmem:[#allocation2_spill] sm:$0xff]  ;;  %v8246_v17 = vld [vmem:[#allocation4_spill] sm:$0xff] }
 0x4af   : > { %v5723_v14 = vpop.eup %5722  ;;  %5748 = vpow2.f32 %v3186_v51  ;;  %3420 = vmatmul.mubr.bf16.gmra.mxu0 %v7685_v37  ;;  %v3094_v39 = vsub.f32 %v7451_v8, %v3027_v53  ;;  %v3095_v38 = vsub.f32 %v7453_v61, %v3027_v53  ;;  %v3096_v36 = vsub.f32 %v7465_v50, %v3027_v53  ;;  %5079 = vmatprep.subr.bf16.mxu1 %v5885_v54  ;;  %v5887_v50 = vld [vmem:[%s8191_s7 + $0xe0] sm:$0xff]   ;;  %v5891_v34 = vld [vmem:[%s8191_s7 + $0xd8] sm:$0xff]  }
 0x4b0   : > { %v5725_v30 = vpop.eup %5724  ;;  %5750 = vpow2.f32 %v3188_v35  ;;  %v3097_v24 = vsub.f32 %v7473_v6, %v3027_v53  ;;  %5142 = vmatpush3.bf16.msra.mxu0 %v5886_v55  ;;  %v5892_v26 = vld [vmem:[%s8191_s7 + $0x18] sm:$0xff]   ;;  %v8244_v35 = vld [vmem:[#allocation6_spill] sm:$0xff] }
 0x4b1   : > { %v5727_v59 = vpop.eup %5726  ;;  %5752 = vpow2.f32 %v3190_v63  ;;  %v3194_v8 = vmul.f32 1.442695, %v3094_v39  ;;  %v3196_v61 = vmul.f32 1.442695, %v3095_v38  ;;  %v3198_v11 = vmul.f32 1.442695, %v3096_v36  ;;  %5143 = vmatprep.subr.bf16.mxu0 %v5887_v50 }
 0x4b2   : > { %v5729_v28 = vpop.eup %5728  ;;  %5754 = vpow2.f32 %v3192_v47  ;;  %v3200_v57 = vmul.f32 1.442695, %v3097_v24  ;;  %v3032_v20 = vpop.xlane.xlu0 %3031  ;;  %v7712_v6 = vpack.c.bf16 %v5727_v59, %v5719_v10  ;;  %v7714_v52 = vpack.c.bf16 %v5725_v30, %v5717_v25  ;;  %5080 = vmatpush3.bf16.msra.mxu1 %v5888_v12  ;;  %v8243_v10 = vld [vmem:[#allocation7_spill] sm:$0xff]  ;;  %v5893_v47 = vld [vmem:[%s8191_s7 + $0x50] sm:$0xff]   ;;  %v5894_v39 = vld [vmem:[%s8191_s7 + $0x98] sm:$0xff]  }
 0x4b3   : > { %v5731_v60 = vpop.eup %5730  ;;  %5756 = vpow2.f32 %v3194_v8  ;;  %v3098_v40 = vsub.f32 %v7475_v18, %v3032_v20  ;;  %v3099_v58 = vsub.f32 %v7477_v43, %v3032_v20  ;;  %v3100_v42 = vsub.f32 %v7489_v2, %v3032_v20  ;;  %5081 = vmatprep.subr.bf16.mxu1 %v5889_v48  ;;  %v5890_v18 = vld [vmem:[%s8191_s7 + $0xa0] sm:$0xff]   ;;  %v5895_v24 = vld [vmem:[%s8191_s7 + $0xd0] sm:$0xff]  }
 0x4b4   : > { %v5733_v29 = vpop.eup %5732  ;;  %5758 = vpow2.f32 %v3196_v61  ;;  %v3101_v0 = vsub.f32 %v8242_v32, %v3032_v20  ;;  %3330 = vmatprep.mubr.bf16.mxu1 %v7712_v6  ;;  %v7727_v45 = vpack.c.bf16 %v5731_v60, %v5723_v14  ;;  %v7729_v19 = vpack.c.bf16 %v5729_v28, %v5721_v23  ;;  %5144 = vmatpush3.bf16.msra.mxu0 %v5890_v18  ;;  %v5896_v50 = vld [vmem:[%s8191_s7 + $0x10] sm:$0xff]  }
 0x4b5   : > { %v5735_v43 = vpop.eup %5734  ;;  %5760 = vpow2.f32 %v3198_v11  ;;  %v3202_v2 = vmul.f32 1.442695, %v3098_v40  ;;  %v3204_v16 = vmul.f32 1.442695, %v3099_v58  ;;  %v3206_v5 = vmul.f32 1.442695, %v3100_v42  ;;  %3331 = vmatmul.mubr.bf16.gmra.mxu1 %v7714_v52  ;;  %5145 = vmatprep.subr.bf16.mxu0 %v5891_v34 }
 0x4b6   : > { %v5737_v41 = vpop.eup %5736  ;;  %5762 = vpow2.f32 %v3200_v57  ;;  %v3208_v27 = vmul.f32 1.442695, %v3101_v0  ;;  %3427 = vmatprep.mubr.bf16.mxu0 %v7727_v45  ;;  %v3037_v25 = vpop.xlane.xlu1 %3036  ;;  %5082 = vmatpush3.bf16.msra.mxu1 %v5892_v26  ;;  %v8247_v57 = vld [vmem:[#allocation3_spill] sm:$0xff]  ;;  %v8248_v12 = vld [vmem:[#allocation8_spill] sm:$0xff]  ;;  %v8249_v40 = vld [vmem:[#allocation9_spill] sm:$0xff] }
 0x4b7   : > { %v5739_v49 = vpop.eup %5738  ;;  %5764 = vpow2.f32 %v3202_v2  ;;  %3428 = vmatmul.mubr.bf16.gmra.mxu0 %v7729_v19  ;;  %v3102_v51 = vsub.f32 %v8243_v10, %v3037_v25  ;;  %v3103_v63 = vsub.f32 %v8244_v35, %v3037_v25  ;;  %v3104_v23 = vsub.f32 %v8245_v21, %v3037_v25  ;;  %5083 = vmatprep.subr.bf16.mxu1 %v5893_v47  ;;  %v5897_v42 = vld [vmem:[%s8191_s7 + $0x48] sm:$0xff]   ;;  %v5898_v18 = vld [vmem:[%s8191_s7 + $0x90] sm:$0xff]  }
 0x4b8   : > { %v5741_v53 = vpop.eup %5740  ;;  %5766 = vpow2.f32 %v3204_v16  ;;  %v3105_v14 = vsub.f32 %v8246_v17, %v3037_v25  ;;  %5146 = vmatpush3.bf16.msra.mxu0 %v5894_v39  ;;  %v5900_v25 = vld [vmem:[%s8191_s7 + $0x8] sm:$0xff]  }
 0x4b9   : > { %v5743_v38 = vpop.eup %5742  ;;  %5768 = vpow2.f32 %v3206_v5  ;;  %v3210_v36 = vmul.f32 1.442695, %v3102_v51  ;;  %v3212_v54 = vmul.f32 1.442695, %v3103_v63  ;;  %v3214_v30 = vmul.f32 1.442695, %v3104_v23  ;;  %5147 = vmatprep.subr.bf16.mxu0 %v5895_v24 }
 0x4ba   : > { %v5745_v55 = vpop.eup %5744  ;;  %5770 = vpow2.f32 %v3208_v27  ;;  %v3216_v59 = vmul.f32 1.442695, %v3105_v14  ;;  %v3042_v8 = vpop.xlane.xlu0 %3041  ;;  %v7756_v61 = vpack.c.bf16 %v5743_v38, %v5735_v43  ;;  %v7758_v11 = vpack.c.bf16 %v5741_v53, %v5733_v29  ;;  %5084 = vmatpush3.bf16.msra.mxu1 %v5896_v50  ;;  %v8251_v51 = vld [vmem:[#allocation11_spill] sm:$0xff]  ;;  %v8252_v63 = vld [vmem:[#allocation12_spill] sm:$0xff]  ;;  %v5901_v23 = vld [vmem:[%s8191_s7 + $0x40] sm:$0xff]  }
 0x4bb   : > { %v5747_v28 = vpop.eup %5746  ;;  %5772 = vpow2.f32 %v3210_v36  ;;  %v3106_v20 = vsub.f32 %v8247_v57, %v3042_v8  ;;  %v3107_v60 = vsub.f32 %v8248_v12, %v3042_v8  ;;  %v3108_v58 = vsub.f32 %v8249_v40, %v3042_v8  ;;  %5085 = vmatprep.subr.bf16.mxu1 %v5897_v42  ;;  %v5902_v17 = vld [vmem:[%s8191_s7 + $0x88] sm:$0xff]  }
 0x4bc   : > { %v5749_v48 = vpop.eup %5748  ;;  %5774 = vpow2.f32 %v3212_v54  ;;  %v3109_v29 = vsub.f32 %v7545_v62, %v3042_v8  ;;  %3338 = vmatprep.mubr.bf16.mxu1 %v7756_v61  ;;  %v7771_v32 = vpack.c.bf16 %v5747_v28, %v5739_v49  ;;  %v7773_v0 = vpack.c.bf16 %v5745_v55, %v5737_v41  ;;  %5148 = vmatpush3.bf16.msra.mxu0 %v5898_v18  ;;  %v5899_v62 = vld [vmem:[%s8191_s7 + $0xc8] sm:$0xff]   ;;  %v8250_v49 = vld [vmem:[#allocation10_spill] sm:$0xff]  ;;  %v8253_v28 = vld [vmem:[#allocation13_spill] sm:$0xff] }
 0x4bd   : > { %v5751_v43 = vpop.eup %5750  ;;  %5776 = vpow2.f32 %v3214_v30  ;;  %v3218_v2 = vmul.f32 1.442695, %v3106_v20  ;;  %v3220_v16 = vmul.f32 1.442695, %v3107_v60  ;;  %v3222_v5 = vmul.f32 1.442695, %v3108_v58  ;;  %3339 = vmatmul.mubr.bf16.gmra.mxu1 %v7758_v11  ;;  %5149 = vmatprep.subr.bf16.mxu0 %v5899_v62 }
 0x4be   : > { %v5753_v34 = vpop.eup %5752  ;;  %5778 = vpow2.f32 %v3216_v59  ;;  %v3224_v41 = vmul.f32 1.442695, %v3109_v29  ;;  %3435 = vmatprep.mubr.bf16.mxu0 %v7771_v32  ;;  %v3047_v27 = vpop.xlane.xlu1 %3046  ;;  %5086 = vmatpush3.bf16.msra.mxu1 %v5900_v25  ;;  %v5903_v54 = vld [vmem:[%s8191_s7 + $0xc0] sm:$0xff]  }
 0x4bf   : > { %v5755_v26 = vpop.eup %5754  ;;  %5780 = vpow2.f32 %v3218_v2  ;;  %3436 = vmatmul.mubr.bf16.gmra.mxu0 %v7773_v0  ;;  %v3110_v10 = vsub.f32 %v8250_v49, %v3047_v27  ;;  %v3111_v35 = vsub.f32 %v8251_v51, %v3047_v27  ;;  %v3112_v21 = vsub.f32 %v8252_v63, %v3047_v27  ;;  %5087 = vmatprep.subr.bf16.mxu1 %v5901_v23  ;;  %v5904_v8 = vld [vmem:[%s8191_s7] sm:$0xff]  }
 0x4c0   : > { %v5757_v47 = vpop.eup %5756  ;;  %5782 = vpow2.f32 %v3220_v16  ;;  %v3113_v53 = vsub.f32 %v7569_v22, %v3047_v27  ;;  %5150 = vmatpush3.bf16.msra.mxu0 %v5902_v17  ;;  %v8254_v20 = vld [vmem:[#allocation14_spill] sm:$0xff] }
 0x4c1   : > { %v5759_v14 = vpop.eup %5758  ;;  %5784 = vpow2.f32 %v3222_v5  ;;  %v3226_v39 = vmul.f32 1.442695, %v3110_v10  ;;  %v3228_v38 = vmul.f32 1.442695, %v3111_v35  ;;  %v3230_v36 = vmul.f32 1.442695, %v3112_v21  ;;  %5151 = vmatprep.subr.bf16.mxu0 %v5903_v54 }
 0x4c2   : > { %v5761_v30 = vpop.eup %5760  ;;  %5786 = vpow2.f32 %v3224_v41  ;;  %v3232_v24 = vmul.f32 1.442695, %v3113_v53  ;;  %v3052_v55 = vpop.xlane.xlu0 %3051  ;;  %v7800_v22 = vpack.c.bf16 %v5759_v14, %v5751_v43  ;;  %v7802_v59 = vpack.c.bf16 %v5757_v47, %v5749_v48  ;;  %5088 = vmatpush3.bf16.msra.mxu1 %v5904_v8  ;;  %v5905_v29 = vld [vmem:[%s8191_s7 + $0x80] sm:$0xff]   ;;  %v8255_v41 = vld [vmem:[#allocation15_spill] sm:$0xff] }
 0x4c3   : > { %v5763_v50 = vpop.eup %5762  ;;  %5788 = vpow2.f32 %v3226_v39  ;;  %v3114_v57 = vsub.f32 %v8253_v28, %v3052_v55  ;;  %v3115_v12 = vsub.f32 %v8254_v20, %v3052_v55  ;;  %v3116_v60 = vsub.f32 %v7585_v33, %v3052_v55 }
 0x4c4   : > { %v5765_v40 = vpop.eup %5764  ;;  %5790 = vpow2.f32 %v3228_v38  ;;  %v3117_v58 = vsub.f32 %v7593_v31, %v3052_v55  ;;  %3346 = vmatprep.mubr.bf16.mxu1 %v7800_v22  ;;  %v7812_v42 = vpack.c.bf16 %v5763_v50, %v5755_v26  ;;  %v7814_v48 = vpack.c.bf16 %v5761_v30, %v5753_v34  ;;  %5152 = vmatpush3.bf16.msra.mxu0 %v5905_v29 }
 0x4c5   : > { %v5767_v18 = vpop.eup %5766  ;;  %5792 = vpow2.f32 %v3230_v36  ;;  %v3234_v43 = vmul.f32 1.442695, %v3114_v57  ;;  %v3236_v2 = vmul.f32 1.442695, %v3115_v12  ;;  %v3238_v33 = vmul.f32 1.442695, %v3116_v60  ;;  %3347 = vmatmul.mubr.bf16.gmra.mxu1 %v7802_v59 }
 0x4c6   : > { %v5769_v16 = vpop.eup %5768  ;;  %5794 = vpow2.f32 %v3232_v24  ;;  %v3240_v31 = vmul.f32 1.442695, %v3117_v58  ;;  %3443 = vmatprep.mubr.bf16.mxu0 %v7812_v42  ;;  %v3057_v5 = vpop.xlane.xlu1 %3056 }
 0x4c7   : > { %v5771_v62 = vpop.eup %5770  ;;  %5796 = vpow2.f32 %v3234_v43  ;;  %3444 = vmatmul.mubr.bf16.gmra.mxu0 %v7814_v48  ;;  %v3118_v34 = vsub.f32 %v7595_v44, %v3057_v5  ;;  %v3119_v27 = vsub.f32 %v8255_v41, %v3057_v5  ;;  %v3120_v25 = vsub.f32 %v7603_v9, %v3057_v5 }
 0x4c8   : > { %v5773_v26 = vpop.eup %5772  ;;  %5798 = vpow2.f32 %v3236_v2  ;;  %v3121_v49 = vsub.f32 %v7608_v1, %v3057_v5 }
 0x4c9   : > { %v5775_v10 = vpop.eup %5774  ;;  %5800 = vpow2.f32 %v3238_v33  ;;  %v3242_v51 = vmul.f32 1.442695, %v3118_v34  ;;  %v3244_v35 = vmul.f32 1.442695, %v3119_v27  ;;  %v3246_v63 = vmul.f32 1.442695, %v3120_v25 }
 0x4ca   : > { %v5777_v21 = vpop.eup %5776  ;;  %5802 = vpow2.f32 %v3240_v31  ;;  %v3248_v23 = vmul.f32 1.442695, %v3121_v49  ;;  %v7826_v47 = vpack.c.bf16 %v5775_v10, %v5767_v18  ;;  %v7828_v53 = vpack.c.bf16 %v5773_v26, %v5765_v40 }
 0x4cb   : > { %v5779_v44 = vpop.eup %5778  ;;  %5804 = vpow2.f32 %v3242_v51  ;;  %v7830_v17 = vpack.c.bf16 %v5777_v21, %v5769_v16 }
 0x4cc   : > { %v5781_v9 = vpop.eup %5780  ;;  %5806 = vpow2.f32 %v3244_v35  ;;  %3354 = vmatprep.mubr.bf16.mxu1 %v7826_v47  ;;  %v3273_v1 = vpack.c.bf16 %v5779_v44, %v5771_v62 }
 0x4cd   : > { %v5783_v14 = vpop.eup %5782  ;;  %5808 = vpow2.f32 %v3246_v63  ;;  %3355 = vmatmul.mubr.bf16.gmra.mxu1 %v7828_v53 }
 0x4ce   : > { %v5785_v39 = vpop.eup %5784  ;;  %5810 = vpow2.f32 %v3248_v23  ;;  %3451 = vmatprep.mubr.bf16.mxu0 %v3273_v1 }
 0x4cf   : > { %v5787_v38 = vpop.eup %5786  ;;  %3452 = vmatmul.mubr.bf16.gmra.mxu0 %v7830_v17 }
 0x4d0   : > { %v5789_v36 = vpop.eup %5788 }
 0x4d1   : > { %v5791_v54 = vpop.eup %5790  ;;  %v3274_v30 = vpack.c.bf16 %v5789_v36, %v5781_v9 }
 0x4d2   : > { %v5793_v24 = vpop.eup %5792  ;;  %v3275_v55 = vpack.c.bf16 %v5791_v54, %v5783_v14 }
 0x4d3   : > { %v5795_v8 = vpop.eup %5794  ;;  %v3276_v50 = vpack.c.bf16 %v5793_v24, %v5785_v39 }
 0x4d4   : > { %v5797_v28 = vpop.eup %5796  ;;  %3362 = vmatprep.mubr.bf16.mxu1 %v3275_v55  ;;  %v3277_v57 = vpack.c.bf16 %v5795_v8, %v5787_v38 }
 0x4d5   : > { %v5799_v20 = vpop.eup %5798  ;;  %3363 = vmatmul.mubr.bf16.gmra.mxu1 %v3274_v30 }
 0x4d6   : > { %v5801_v12 = vpop.eup %5800  ;;  %3459 = vmatprep.mubr.bf16.mxu0 %v3277_v57 }
 0x4d7   : > { %v5803_v60 = vpop.eup %5802  ;;  %3460 = vmatmul.mubr.bf16.gmra.mxu0 %v3276_v50 }
 0x4d8   : > { %v5805_v40 = vpop.eup %5804 }
 0x4d9   : > { %v5807_v58 = vpop.eup %5806  ;;  %v3278_v29 = vpack.c.bf16 %v5805_v40, %v5797_v28 }
 0x4da   : > { %v5809_v18 = vpop.eup %5808  ;;  %v3279_v43 = vpack.c.bf16 %v5807_v58, %v5799_v20 }
 0x4db   : > { %v5811_v2 = vpop.eup %5810  ;;  %v3280_v33 = vpack.c.bf16 %v5809_v18, %v5801_v12 }
 0x4dc   : > { %3370 = vmatprep.mubr.bf16.mxu1 %v3279_v43  ;;  %v3281_v16 = vpack.c.bf16 %v5811_v2, %v5803_v60 }
 0x4dd   : > { %3371 = vmatmul.mubr.bf16.gmra.mxu1 %v3278_v29 }
 0x4de   : > { %3467 = vmatprep.mubr.bf16.mxu0 %v3281_v16  ;;  %3508 = vmatprep.mubr.bf16.mxu1 %v7636_v4  ;;  %v5556_v4 = vld [vmem:[%s8196_s12 + $0x18] sm:$0xff]  }
 0x4df   : > { %3468 = vmatmul.mubr.bf16.gmra.mxu0 %v3280_v33  ;;  %5429 = vmatprep.subr.bf16.mxu1 %v5556_v4 }
 0x4e0   : > { %3605 = vmatprep.mubr.bf16.mxu0 %v7645_v7  ;;  %v5558_v7 = vld [vmem:[%s8196_s12 + $0x8] sm:$0xff]  }
 0x4e5   : > { %3509 = vmatmul.mubr.bf16.vlgmr.msra.gmra.mxu1 %v7638_v3  ;;  %v5557_v3 = vld [vmem:[%s8196_s12 + $0x10] sm:$0xff]  }
 0x4e6   : > { %3516 = vmatprep.mubr.bf16.mxu1 %v7668_v13  ;;  %5430 = vmatpush3.bf16.msra.mxu1 %v5556_v4 }
 0x4e7   : > { %3606 = vmatmul.mubr.bf16.vlgmr.msra.gmra.mxu0 %v7647_v15  ;;  %5431 = vmatprep.subr.bf16.mxu1 %v5557_v3  ;;  %v5559_v15 = vld [vmem:[%s8196_s12] sm:$0xff]  }
 0x4e8   : > { %3613 = vmatprep.mubr.bf16.mxu0 %v7683_v56 }
 0x4ea   : > { %5432 = vmatpush3.bf16.msra.mxu1 %v5557_v3 }
 0x4eb   : > { %5433 = vmatprep.subr.bf16.mxu1 %v5558_v7 }
 0x4ed   : > { %3517 = vmatmul.mubr.bf16.gmra.mxu1 %v7670_v46 }
 0x4ee   : > { %3524 = vmatprep.mubr.bf16.mxu1 %v7712_v6  ;;  %5434 = vmatpush3.bf16.msra.mxu1 %v5558_v7 }
 0x4ef   : > { %3614 = vmatmul.mubr.bf16.gmra.mxu0 %v7685_v37  ;;  %5435 = vmatprep.subr.bf16.mxu1 %v5559_v15 }
 0x4f0   : > { %3621 = vmatprep.mubr.bf16.mxu0 %v7727_v45 }
 0x4f2   : > { %5436 = vmatpush3.bf16.msra.mxu1 %v5559_v15 }
 0x4f5   : > { %3525 = vmatmul.mubr.bf16.gmra.mxu1 %v7714_v52 }
 0x4f6   : > { %3532 = vmatprep.mubr.bf16.mxu1 %v7756_v61 }
 0x4f7   : > { %3622 = vmatmul.mubr.bf16.gmra.mxu0 %v7729_v19 }
 0x4f8   : > { %3629 = vmatprep.mubr.bf16.mxu0 %v7771_v32 }
 0x4fd   : > { %3533 = vmatmul.mubr.bf16.gmra.mxu1 %v7758_v11 }
 0x4fe   : > { %3540 = vmatprep.mubr.bf16.mxu1 %v7800_v22 }
 0x4ff   : > { %3630 = vmatmul.mubr.bf16.gmra.mxu0 %v7773_v0 }
 0x500   : > { %3637 = vmatprep.mubr.bf16.mxu0 %v7812_v42 }
 0x505   : > { %3541 = vmatmul.mubr.bf16.gmra.mxu1 %v7802_v59 }
 0x506   : > { %3548 = vmatprep.mubr.bf16.mxu1 %v7826_v47 }
 0x507   : > { %3638 = vmatmul.mubr.bf16.gmra.mxu0 %v7814_v48 }
 0x508   : > { %3645 = vmatprep.mubr.bf16.mxu0 %v3273_v1 }
 0x50d   : > { %3549 = vmatmul.mubr.bf16.gmra.mxu1 %v7828_v53 }
 0x50e   : > { %3556 = vmatprep.mubr.bf16.mxu1 %v3275_v55 }
 0x50f   : > { %3646 = vmatmul.mubr.bf16.gmra.mxu0 %v7830_v17 }
 0x510   : > { %3653 = vmatprep.mubr.bf16.mxu0 %v3277_v57 }
 0x515   : > { %3557 = vmatmul.mubr.bf16.gmra.mxu1 %v3274_v30 }
 0x516   : > { %3564 = vmatprep.mubr.bf16.mxu1 %v3279_v43 }
 0x517   : > { %3654 = vmatmul.mubr.bf16.gmra.mxu0 %v3276_v50 }
 0x518   : > { %3661 = vmatprep.mubr.bf16.mxu0 %v3281_v16 }
 0x51d   : > { %3565 = vmatmul.mubr.bf16.gmra.mxu1 %v3278_v29 }
 0x51f   : > { %3662 = vmatmul.mubr.bf16.gmra.mxu0 %v3280_v33 }
 0x565   : > { %v4961_v13 = vpop.f32.mrf.mxu1 }
 0x567   : > { %v5025_v46 = vpop.f32.mrf.mxu0  ;;  %v4962_v56 = vpop.f32.mrf.mxu1 }
 0x568   : > { %v4963_v37 = vadd.f32 %v4962_v56, %v4961_v13 }
 0x569   : > { %v5026_v6 = vpop.f32.mrf.mxu0  ;;  %v4964_v52 = vpop.f32.mrf.mxu1 }
 0x56a   : > { %v5027_v45 = vadd.f32 %v5026_v6, %v5025_v46 }
 0x56b   : > { %v5028_v19 = vpop.f32.mrf.mxu0  ;;  %v4965_v61 = vpop.f32.mrf.mxu1 }
 0x56c   : > { %v7870_v11 = vadd.f32 %v5027_v45, %v4963_v37  ;;  %v4966_v32 = vadd.f32 %v4965_v61, %v4964_v52 }
 0x56d   : > { %v5029_v0 = vpop.f32.mrf.mxu0  ;;  %v4967_v22 = vpop.f32.mrf.mxu1 }
 0x56e   : > { %v5030_v59 = vadd.f32 %v5029_v0, %v5028_v19 }
 0x56f   : > { %v5031_v42 = vpop.f32.mrf.mxu0  ;;  %v4968_v48 = vpop.f32.mrf.mxu1 }
 0x570   : > { %v7872_v31 = vadd.f32 %v5030_v59, %v4966_v32  ;;  %v4969_v5 = vadd.f32 %v4968_v48, %v4967_v22 }
 0x571   : > { %v5032_v62 = vpop.f32.mrf.mxu0  ;;  %v4970_v34 = vpop.f32.mrf.mxu1 }
 0x572   : > { %v5033_v41 = vadd.f32 %v5032_v62, %v5031_v42 }
 0x573   : > { %v5034_v27 = vpop.f32.mrf.mxu0  ;;  %v4971_v25 = vpop.f32.mrf.mxu1 }
 0x574   : > { %v7874_v26 = vadd.f32 %v5033_v41, %v4969_v5  ;;  %v4972_v49 = vadd.f32 %v4971_v25, %v4970_v34 }
 0x575   : > { %v5035_v10 = vpop.f32.mrf.mxu0  ;;  %v4973_v51 = vpop.f32.mrf.mxu1 }
 0x576   : > { %v5036_v35 = vadd.f32 %v5035_v10, %v5034_v27 }
 0x577   : > { %v5037_v63 = vpop.f32.mrf.mxu0  ;;  %v4974_v21 = vpop.f32.mrf.mxu1 }
 0x578   : > { %v7876_v23 = vadd.f32 %v5036_v35, %v4972_v49  ;;  %v4975_v47 = vadd.f32 %v4974_v21, %v4973_v51 }
 0x579   : > { %v5038_v53 = vpop.f32.mrf.mxu0  ;;  %v4976_v44 = vpop.f32.mrf.mxu1 }
 0x57a   : > { %v5039_v17 = vadd.f32 %v5038_v53, %v5037_v63 }
 0x57b   : > { %v5040_v9 = vpop.f32.mrf.mxu0  ;;  %v4977_v1 = vpop.f32.mrf.mxu1 }
 0x57c   : > { %v7878_v14 = vadd.f32 %v5039_v17, %v4975_v47  ;;  %v4978_v39 = vadd.f32 %v4977_v1, %v4976_v44 }
 0x57d   : > { %v5041_v38 = vpop.f32.mrf.mxu0  ;;  %v4979_v36 = vpop.f32.mrf.mxu1 }
 0x57e   : > { %v5042_v54 = vadd.f32 %v5041_v38, %v5040_v9 }
 0x57f   : > { %v5043_v30 = vpop.f32.mrf.mxu0  ;;  %v4980_v24 = vpop.f32.mrf.mxu1 }
 0x580   : > { %v7880_v55 = vadd.f32 %v5042_v54, %v4978_v39  ;;  %v4981_v8 = vadd.f32 %v4980_v24, %v4979_v36 }
 0x581   : > { %v5044_v50 = vpop.f32.mrf.mxu0  ;;  %v4982_v28 = vpop.f32.mrf.mxu1 }
 0x582   : > { %v5045_v57 = vadd.f32 %v5044_v50, %v5043_v30 }
 0x583   : > { %v5046_v20 = vpop.f32.mrf.mxu0  ;;  %v4983_v12 = vpop.f32.mrf.mxu1 }
 0x584   : > { %v7882_v60 = vadd.f32 %v5045_v57, %v4981_v8  ;;  %v4984_v40 = vadd.f32 %v4983_v12, %v4982_v28 }
 0x585   : > { %v5047_v58 = vpop.f32.mrf.mxu0  ;;  %v4985_v29 = vpop.f32.mrf.mxu1 }
 0x586   : > { %v5048_v18 = vadd.f32 %v5047_v58, %v5046_v20 }
 0x587   : > { %v5049_v43 = vpop.f32.mrf.mxu0  ;;  %v4986_v2 = vpop.f32.mrf.mxu1 }
 0x588   : > { %v7884_v33 = vadd.f32 %v5048_v18, %v4984_v40  ;;  %v4987_v16 = vadd.f32 %v4986_v2, %v4985_v29 }
 0x589   : > { %v5050_v4 = vpop.f32.mrf.mxu0  ;;  %v4988_v3 = vpop.f32.mrf.mxu1 }
 0x58a   : > { %v5051_v7 = vadd.f32 %v5050_v4, %v5049_v43 }
 0x58b   : > { %v5052_v15 = vpop.f32.mrf.mxu0  ;;  %v4989_v13 = vpop.f32.mrf.mxu1 }
 0x58c   : > { %v7886_v46 = vadd.f32 %v5051_v7, %v4987_v16  ;;  %v4990_v56 = vadd.f32 %v4989_v13, %v4988_v3 }
 0x58d   : > { %v5053_v37 = vpop.f32.mrf.mxu0  ;;  %v4991_v6 = vpop.f32.mrf.mxu1 }
 0x58e   : > { %v5054_v52 = vadd.f32 %v5053_v37, %v5052_v15 }
 0x58f   : > { %v5055_v45 = vpop.f32.mrf.mxu0  ;;  %v4992_v19 = vpop.f32.mrf.mxu1 }
 0x590   : > { %v7888_v61 = vadd.f32 %v5054_v52, %v4990_v56  ;;  %v4993_v32 = vadd.f32 %v4992_v19, %v4991_v6 }
 0x591   : > { %v5056_v0 = vpop.f32.mrf.mxu0  ;;  %v4994_v22 = vpop.f32.mrf.mxu1 }
 0x592   : > { %v5057_v59 = vadd.f32 %v5056_v0, %v5055_v45 }
 0x593   : > { %v5058_v42 = vpop.f32.mrf.mxu0  ;;  %v4995_v48 = vpop.f32.mrf.mxu1 }
 0x594   : > { %v7890_v5 = vadd.f32 %v5057_v59, %v4993_v32  ;;  %v4996_v62 = vadd.f32 %v4995_v48, %v4994_v22 }
 0x595   : > { %v5059_v34 = vpop.f32.mrf.mxu0  ;;  %v4997_v41 = vpop.f32.mrf.mxu1 }
 0x596   : > { %v5060_v27 = vadd.f32 %v5059_v34, %v5058_v42 }
 0x597   : > { %v5061_v25 = vpop.f32.mrf.mxu0  ;;  %v4998_v49 = vpop.f32.mrf.mxu1 }
 0x598   : > { %v7892_v10 = vadd.f32 %v5060_v27, %v4996_v62  ;;  %v4999_v51 = vadd.f32 %v4998_v49, %v4997_v41 }
 0x599   : > { %v5062_v35 = vpop.f32.mrf.mxu0  ;;  %v5000_v63 = vpop.f32.mrf.mxu1 }
 0x59a   : > { %v5063_v21 = vadd.f32 %v5062_v35, %v5061_v25 }
 0x59b   : > { %v5064_v47 = vpop.f32.mrf.mxu0  ;;  %v5001_v53 = vpop.f32.mrf.mxu1 }
 0x59c   : > { %v7894_v44 = vadd.f32 %v5063_v21, %v4999_v51  ;;  %v5002_v17 = vadd.f32 %v5001_v53, %v5000_v63 }
 0x59d   : > { %v5065_v9 = vpop.f32.mrf.mxu0  ;;  %v5003_v1 = vpop.f32.mrf.mxu1 }
 0x59e   : > { %v5066_v39 = vadd.f32 %v5065_v9, %v5064_v47 }
 0x59f   : > { %v5067_v38 = vpop.f32.mrf.mxu0  ;;  %v5004_v36 = vpop.f32.mrf.mxu1 }
 0x5a0   : > { %v7896_v54 = vadd.f32 %v5066_v39, %v5002_v17  ;;  %v5005_v30 = vadd.f32 %v5004_v36, %v5003_v1 }
 0x5a1   : > { %v5068_v24 = vpop.f32.mrf.mxu0  ;;  %v5006_v8 = vpop.f32.mrf.mxu1 }
 0x5a2   : > { %v5069_v50 = vadd.f32 %v5068_v24, %v5067_v38 }
 0x5a3   : > { %v5070_v28 = vpop.f32.mrf.mxu0  ;;  %v5007_v57 = vpop.f32.mrf.mxu1 }
 0x5a4   : > { %v7898_v20 = vadd.f32 %v5069_v50, %v5005_v30  ;;  %v5008_v12 = vadd.f32 %v5007_v57, %v5006_v8 }
 0x5a5   : > { %v5071_v40 = vpop.f32.mrf.mxu0  ;;  %v5089_v58 = vpop.f32.mrf.mxu1 }
 0x5a6   : > { %v5072_v29 = vadd.f32 %v5071_v40, %v5070_v28 }
 0x5a7   : > { %v5153_v18 = vpop.f32.mrf.mxu0  ;;  %v5090_v43 = vpop.f32.mrf.mxu1 }
 0x5a8   : > { %v7900_v2 = vadd.f32 %v5072_v29, %v5008_v12  ;;  %v5091_v16 = vadd.f32 %v5090_v43, %v5089_v58 }
 0x5a9   : > { %v5154_v4 = vpop.f32.mrf.mxu0  ;;  %v5092_v3 = vpop.f32.mrf.mxu1 }
 0x5aa   : > { %v5155_v7 = vadd.f32 %v5154_v4, %v5153_v18 }
 0x5ab   : > { %v5156_v15 = vpop.f32.mrf.mxu0  ;;  %v5093_v13 = vpop.f32.mrf.mxu1 }
 0x5ac   : > { %v3608_v56 = vadd.f32 %v5155_v7, %v5091_v16  ;;  %v5094_v37 = vadd.f32 %v5093_v13, %v5092_v3 }
 0x5ad   : > { %v5157_v6 = vpop.f32.mrf.mxu0  ;;  %v5095_v52 = vpop.f32.mrf.mxu1 }
 0x5ae   : > { %v5158_v45 = vadd.f32 %v5157_v6, %v5156_v15  ;;  %5812 = vrcp.f32 %v3608_v56 }
 0x5af   : > { %v5159_v19 = vpop.f32.mrf.mxu0  ;;  %v5096_v32 = vpop.f32.mrf.mxu1 }
 0x5b0   : > { %v3611_v0 = vadd.f32 %v5158_v45, %v5094_v37  ;;  %v5097_v22 = vadd.f32 %v5096_v32, %v5095_v52 }
 0x5b1   : > { %v5160_v59 = vpop.f32.mrf.mxu0  ;;  %v5098_v42 = vpop.f32.mrf.mxu1 }
 0x5b2   : > { %5814 = vrcp.f32 %v3611_v0  ;;  %v5161_v48 = vadd.f32 %v5160_v59, %v5159_v19 }
 0x5b3   : > { %v5162_v62 = vpop.f32.mrf.mxu0  ;;  %v5099_v34 = vpop.f32.mrf.mxu1 }
 0x5b4   : > { %v3616_v41 = vadd.f32 %v5161_v48, %v5097_v22  ;;  %v5100_v27 = vadd.f32 %v5099_v34, %v5098_v42 }
 0x5b5   : > { %v5163_v25 = vpop.f32.mrf.mxu0  ;;  %v5101_v49 = vpop.f32.mrf.mxu1 }
 0x5b6   : > { %v5164_v51 = vadd.f32 %v5163_v25, %v5162_v62  ;;  %5816 = vrcp.f32 %v3616_v41 }
 0x5b7   : > { %v5165_v35 = vpop.f32.mrf.mxu0  ;;  %v5102_v63 = vpop.f32.mrf.mxu1 }
 0x5b8   : > { %v3619_v21 = vadd.f32 %v5164_v51, %v5100_v27  ;;  %v5103_v47 = vadd.f32 %v5102_v63, %v5101_v49 }
 0x5b9   : > { %v5166_v53 = vpop.f32.mrf.mxu0  ;;  %v5104_v17 = vpop.f32.mrf.mxu1 }
 0x5ba   : > { %5818 = vrcp.f32 %v3619_v21  ;;  %v5167_v9 = vadd.f32 %v5166_v53, %v5165_v35 }
 0x5bb   : > { %v5168_v1 = vpop.f32.mrf.mxu0  ;;  %v5105_v39 = vpop.f32.mrf.mxu1 }
 0x5bc   : > { %v5813_v38 = vpop.eup %5812  ;;  %v3624_v36 = vadd.f32 %v5167_v9, %v5103_v47  ;;  %v5106_v30 = vadd.f32 %v5105_v39, %v5104_v17 }
 0x5bd   : > { %v5169_v24 = vpop.f32.mrf.mxu0  ;;  %v5107_v8 = vpop.f32.mrf.mxu1  ;;  %v3686_v40 = vmul.f32 %v5813_v38, %v7870_v11 }
 0x5be   : > { %v5170_v50 = vadd.f32 %v5169_v24, %v5168_v1  ;;  %5820 = vrcp.f32 %v3624_v36 }
 0x5bf   : > { %v5815_v28 = vpop.eup %5814  ;;  %v5171_v57 = vpop.f32.mrf.mxu0 }
 0x5c0   : > { %v5108_v12 = vpop.f32.mrf.mxu1  ;;  %v3627_v58 = vadd.f32 %v5170_v50, %v5106_v30  ;;  %v3687_v18 = vmul.f32 %v5815_v28, %v7872_v31 }
 0x5c1   : > { %v5109_v29 = vadd.f32 %v5108_v12, %v5107_v8  ;;  %v5172_v43 = vpop.f32.mrf.mxu0 }
 0x5c2   : > { %v5110_v16 = vpop.f32.mrf.mxu1  ;;  %5822 = vrcp.f32 %v3627_v58  ;;  %v5173_v4 = vadd.f32 %v5172_v43, %v5171_v57  ;;  %v3702_v3 = vpack.c.bf16 %v3687_v18, %v3686_v40 }
 0x5c3   : > { %v5174_v7 = vpop.f32.mrf.mxu0  ;;  %v5817_v37 = vpop.eup %5816 }
 0x5c4   : > { %v5111_v15 = vpop.f32.mrf.mxu1  ;;  %v3632_v13 = vadd.f32 %v5173_v4, %v5109_v29  ;;  %5437 = vmatprep.mubr.msk.bf16.mxu1 %vm528_vm0, %v3702_v3  ;;  %v3688_v31 = vmul.f32 %v5817_v37, %v7874_v26 }
 0x5c5   : > { %v5112_v56 = vadd.f32 %v5111_v15, %v5110_v16  ;;  %v5175_v6 = vpop.f32.mrf.mxu0 }
 0x5c6   : > { %v5113_v52 = vpop.f32.mrf.mxu1  ;;  %v5176_v11 = vadd.f32 %v5175_v6, %v5174_v7  ;;  %5824 = vrcp.f32 %v3632_v13 }
 0x5c7   : > { %v5819_v45 = vpop.eup %5818  ;;  %v5177_v19 = vpop.f32.mrf.mxu0 }
 0x5c8   : > { %v5114_v32 = vpop.f32.mrf.mxu1  ;;  %v3689_v0 = vmul.f32 %v5819_v45, %v7876_v23  ;;  %v3635_v22 = vadd.f32 %v5176_v11, %v5112_v56 }
 0x5c9   : > { %v5115_v59 = vadd.f32 %v5114_v32, %v5113_v52  ;;  %v5178_v42 = vpop.f32.mrf.mxu0 }
 0x5ca   : > { %v5116_v48 = vpop.f32.mrf.mxu1  ;;  %v3703_v62 = vpack.c.bf16 %v3689_v0, %v3688_v31  ;;  %5826 = vrcp.f32 %v3635_v22  ;;  %v5179_v34 = vadd.f32 %v5178_v42, %v5177_v19 }
 0x5cb   : > { %v5180_v41 = vpop.f32.mrf.mxu0  ;;  %v5821_v51 = vpop.eup %5820 }
 0x5cc   : > { %v5117_v27 = vpop.f32.mrf.mxu1  ;;  %v3640_v25 = vadd.f32 %v5179_v34, %v5115_v59  ;;  %5438 = vmatmul.mubr.msk.bf16.vlgmr.msra.gmra.mxu1 %vm528_vm0, %v3703_v62  ;;  %v3690_v9 = vmul.f32 %v5821_v51, %v7878_v14 }
 0x5cd   : > { %v5118_v49 = vadd.f32 %v5117_v27, %v5116_v48  ;;  %v5181_v35 = vpop.f32.mrf.mxu0 }
 0x5ce   : > { %v5119_v63 = vpop.f32.mrf.mxu1  ;;  %v5182_v21 = vadd.f32 %v5181_v35, %v5180_v41  ;;  %5828 = vrcp.f32 %v3640_v25 }
 0x5cf   : > { %v5823_v26 = vpop.eup %5822  ;;  %v5183_v23 = vpop.f32.mrf.mxu0 }
 0x5d0   : > { %v5120_v47 = vpop.f32.mrf.mxu1  ;;  %v3643_v53 = vadd.f32 %v5182_v21, %v5118_v49  ;;  %v3691_v1 = vmul.f32 %v5823_v26, %v7880_v55 }
 0x5d1   : > { %v5121_v17 = vadd.f32 %v5120_v47, %v5119_v63  ;;  %v5184_v39 = vpop.f32.mrf.mxu0 }
 0x5d2   : > { %v5122_v38 = vpop.f32.mrf.mxu1  ;;  %5830 = vrcp.f32 %v3643_v53  ;;  %v5185_v36 = vadd.f32 %v5184_v39, %v5183_v23  ;;  %v3704_v30 = vpack.c.bf16 %v3691_v1, %v3690_v9 }
 0x5d3   : > { %v5186_v24 = vpop.f32.mrf.mxu0  ;;  %v5825_v50 = vpop.eup %5824 }
 0x5d4   : > { %v5123_v8 = vpop.f32.mrf.mxu1  ;;  %v3648_v28 = vadd.f32 %v5185_v36, %v5121_v17  ;;  %5441 = vmatprep.mubr.msk.bf16.mxu1 %vm528_vm0, %v3704_v30  ;;  %v3692_v55 = vmul.f32 %v5825_v50, %v7882_v60 }
 0x5d5   : > { %v5124_v57 = vadd.f32 %v5123_v8, %v5122_v38  ;;  %v5187_v12 = vpop.f32.mrf.mxu0  ;;  %v5566_v8 = vld [vmem:[%s8197_s13 + $0x10] ss:$8 sps:$4 sm:$0xff]  }
 0x5d6   : > { %v5125_v40 = vpop.f32.mrf.mxu1  ;;  %v5188_v58 = vadd.f32 %v5187_v12, %v5186_v24  ;;  %5832 = vrcp.f32 %v3648_v28  ;;  %v5560_v24 = vld [vmem:[%s8197_s13 + $0x30] ss:$8 sps:$4 sm:$0xff]  }
 0x5d7   : > { %v5827_v29 = vpop.eup %5826  ;;  %v5189_v18 = vpop.f32.mrf.mxu0 }
 0x5d8   : > { %v5126_v14 = vpop.f32.mrf.mxu1  ;;  %v3651_v43 = vadd.f32 %v5188_v58, %v5124_v57  ;;  %v3693_v4 = vmul.f32 %v5827_v29, %v7884_v33  ;;  %v5906_v57 = vld [vmem:[%s6029_s23 + $0x10] sm:$0xff] }
 0x5d9   : > { %v5127_v16 = vadd.f32 %v5126_v14, %v5125_v40  ;;  %v5190_v3 = vpop.f32.mrf.mxu0  ;;  %v5907_v40 = vld [vmem:[%s6029_s23] sm:$0xff] }
 0x5da   : > { %v5128_v7 = vpop.f32.mrf.mxu1  ;;  %5834 = vrcp.f32 %v3651_v43  ;;  %v5191_v15 = vadd.f32 %v5190_v3, %v5189_v18  ;;  %v3705_v13 = vpack.c.bf16 %v3693_v4, %v3692_v55  ;;  %v5908_v55 = vld [vmem:[%s6029_s23 + $0x18] sm:$0xff] }
 0x5db   : > { %v5192_v56 = vpop.f32.mrf.mxu0  ;;  %v5829_v6 = vpop.eup %5828 }
 0x5dc   : > { %v5129_v37 = vpop.f32.mrf.mxu1  ;;  %v3656_v52 = vadd.f32 %v5191_v15, %v5127_v16  ;;  %5442 = vmatmul.mubr.msk.bf16.gmra.mxu1 %vm528_vm0, %v3705_v13  ;;  %v3694_v33 = vmul.f32 %v5829_v6, %v7886_v46  ;;  %v5909_v16 = vld [vmem:[%s6029_s23 + $0x8] sm:$0xff] }
 0x5dd   : > { %v5130_v11 = vadd.f32 %v5129_v37, %v5128_v7  ;;  %v5193_v45 = vpop.f32.mrf.mxu0 }
 0x5de   : > { %v5131_v19 = vpop.f32.mrf.mxu1  ;;  %v5194_v60 = vadd.f32 %v5193_v45, %v5192_v56  ;;  %5836 = vrcp.f32 %v3656_v52  ;;  %v5910_v45 = vld [vmem:[%s6029_s23 + $0x30] sm:$0xff] }
 0x5df   : > { %v5831_v32 = vpop.eup %5830  ;;  %v5195_v31 = vpop.f32.mrf.mxu0 }
 0x5e0   : > { %v5132_v0 = vpop.f32.mrf.mxu1  ;;  %v3659_v22 = vadd.f32 %v5194_v60, %v5130_v11  ;;  %v3695_v42 = vmul.f32 %v5831_v32, %v7888_v61  ;;  %v5911_v60 = vld [vmem:[%s6029_s23 + $0x20] sm:$0xff] }
 0x5e1   : > { %v5133_v59 = vadd.f32 %v5132_v0, %v5131_v19  ;;  %v5196_v48 = vpop.f32.mrf.mxu0 }
 0x5e2   : > { %v5134_v62 = vpop.f32.mrf.mxu1  ;;  %5838 = vrcp.f32 %v3659_v22  ;;  %v5197_v34 = vadd.f32 %v5196_v48, %v5195_v31  ;;  %v3706_v41 = vpack.c.bf16 %v3695_v42, %v3694_v33  ;;  %v5912_v22 = vld [vmem:[%s6029_s23 + $0x38] sm:$0xff]  ;;  %v5913_v42 = vld [vmem:[%s6029_s23 + $0x28] sm:$0xff] }
 0x5e3   : > { %v5198_v27 = vpop.f32.mrf.mxu0  ;;  %v5833_v35 = vpop.eup %5832 }
 0x5e4   : > { %v5135_v25 = vpop.f32.mrf.mxu1  ;;  %v3664_v49 = vadd.f32 %v5197_v34, %v5133_v59  ;;  %5445 = vmatprep.mubr.msk.bf16.mxu1 %vm528_vm0, %v3706_v41  ;;  %v3696_v23 = vmul.f32 %v5833_v35, %v7890_v5 }
 0x5e5   : > { %v5136_v51 = vadd.f32 %v5135_v25, %v5134_v62  ;;  %v5199_v63 = vpop.f32.mrf.mxu0 }
 0x5e6   : > { %v5200_v21 = vadd.f32 %v5199_v63, %v5198_v27  ;;  %5840 = vrcp.f32 %v3664_v49 }
 0x5e7   : > { %v5835_v46 = vpop.eup %5834 }
 0x5e8   : > { %v3667_v26 = vadd.f32 %v5200_v21, %v5136_v51  ;;  %v3697_v61 = vmul.f32 %v5835_v46, %v7892_v10  ;;  %v5914_v21 = vld [vmem:[%s6029_s23 + $0x50] sm:$0xff] }
 0x5ea   : > { %5842 = vrcp.f32 %v3667_v26  ;;  %v3707_v47 = vpack.c.bf16 %v3697_v61, %v3696_v23  ;;  %v5915_v26 = vld [vmem:[%s6029_s23 + $0x40] sm:$0xff] }
 0x5eb   : > { %v5837_v53 = vpop.eup %5836 }
 0x5ec   : > { %5446 = vmatmul.mubr.msk.bf16.gmra.mxu1 %vm528_vm0, %v3707_v47  ;;  %v3698_v9 = vmul.f32 %v5837_v53, %v7894_v44  ;;  %v5562_v44 = vld [vmem:[%s8197_s13 + $0x34] ss:$8 sps:$4 sm:$0xff]  }
 0x5ed   : > { %4095 = vmatprep.subr.bf16.mxu0 %v5562_v44 }
 0x5ee   : > { %4096 = vmatpush1.bf16.msra.mxu0 %v5560_v24 }
 0x5ef   : > { %v5839_v17 = vpop.eup %5838 }
 0x5f0   : > { %v3699_v1 = vmul.f32 %v5839_v17, %v7896_v54  ;;  %v5565_v54 = vld [vmem:[%s8197_s13 + $0x24] ss:$8 sps:$4 sm:$0xff]   ;;  %v5916_v17 = vld [vmem:[%s6029_s23 + $0x58] sm:$0xff] }
 0x5f1   : > { %4097 = vmatprep.subr.bf16.mxu0 %v5565_v54 }
 0x5f2   : > { %v3708_v39 = vpack.c.bf16 %v3699_v1, %v3698_v9  ;;  %v5917_v1 = vld [vmem:[%s6029_s23 + $0x48] sm:$0xff] }
 0x5f3   : > { %v5841_v38 = vpop.eup %5840 }
 0x5f4   : > { %5449 = vmatprep.mubr.msk.bf16.mxu1 %vm528_vm0, %v3708_v39  ;;  %v3700_v30 = vmul.f32 %v5841_v38, %v7898_v20  ;;  %v5563_v20 = vld [vmem:[%s8197_s13 + $0x20] ss:$8 sps:$4 sm:$0xff]  }
 0x5f5   : > { %4098 = vmatpush1.bf16.msra.mxu0 %v5563_v20  ;;  %v5932_v20 = vmov 0  }
 0x5f6   : > { %4119 = vmatprep.mubr.bf16.mxu0 %v5932_v20 }
 0x5f7   : > { %v5843_v36 = vpop.eup %5842 }
 0x5f8   : > { %v3701_v5 = vmul.f32 %v5843_v36, %v7900_v2  ;;  %v5568_v2 = vld [vmem:[%s8197_s13 + $0x14] ss:$8 sps:$4 sm:$0xff]  }
 0x5f9   : > { %4099 = vmatprep.subr.bf16.mxu0 %v5568_v2 }
 0x5fa   : > { %v3709_v10 = vpack.c.bf16 %v3701_v5, %v3700_v30  ;;  %4100 = vmatpush1.bf16.msra.mxu0 %v5566_v8  ;;  %v5571_v30 = vld [vmem:[%s8197_s13 + $0x4] ss:$8 sps:$4 sm:$0xff]   ;;  %v5569_v5 = vld [vmem:[%s8197_s13] ss:$8 sps:$4 sm:$0xff]  }
 0x5fb   : > { %4101 = vmatprep.subr.bf16.mxu0 %v5571_v30 }
 0x5fc   : > { %5450 = vmatmul.mubr.msk.bf16.gmra.mxu1 %vm528_vm0, %v3709_v10 }
 0x5fe   : > { %4102 = vmatpush1.bf16.msra.mxu0 %v5569_v5 }
 0x68c   : > { %v5439_v50 = vpop.f32.mrf.mxu1 }
 0x68d   : > { %v7945_v12 = vadd.f32 %v5906_v57, %v5439_v50 }
 0x68e   : > { %v3800_v28 = vpop.f32.mrf.mxu1 }
 0x68f   : > { %v7948_v58 = vadd.f32 %v5907_v40, %v3800_v28  ;;  %v3881_v7 = vmul.f32 %v7945_v12, %v7945_v12  ;;  %v5918_v28 = vld [vmem:[%s6029_s23 + $0x70] sm:$0xff]  ;;  %v5919_v40 = vld [vmem:[%s6029_s23 + $0x60] sm:$0xff] }
 0x690   : > { %v5440_v29 = vpop.f32.mrf.mxu1 }
 0x691   : > { %v3879_v18 = vmul.f32 %v7948_v58, %v7948_v58  ;;  %v7953_v43 = vadd.f32 %v5908_v55, %v5440_v29  ;;  %v3901_v13 = vsel %vm528_vm0, %v3881_v7, 0.0  ;;  %v5921_v7 = vld [vmem:[%s6029_s23 + $0x68] sm:$0xff] }
 0x692   : > { %v3803_v14 = vpop.f32.mrf.mxu1 }
 0x693   : > { %v7956_v4 = vadd.f32 %v5909_v16, %v3803_v14  ;;  %v3895_v3 = vsel %vm528_vm0, %v3879_v18, 0.0  ;;  %v3882_v37 = vmul.f32 %v7953_v43, %v7953_v43  ;;  %v5920_v16 = vld [vmem:[%s6029_s23 + $0x78] sm:$0xff] }
 0x694   : > { %3896 = vadd.xlane.f32.xlu0 %v3895_v3 }
 0x695   : > { %v3880_v15 = vmul.f32 %v7956_v4, %v7956_v4  ;;  %v3904_v6 = vsel %vm528_vm0, %v3882_v37, 0.0 }
 0x697   : > { %v3898_v56 = vsel %vm528_vm0, %v3880_v15, 0.0 }
 0x698   : > { %3902 = vadd.xlane.f32.xlu0 %v3901_v13  ;;  %3899 = vadd.xlane.f32.xlu1 %v3898_v56 }
 0x69c   : > { %3905 = vadd.xlane.f32.xlu1 %v3904_v6  ;;  %v5443_v52 = vpop.f32.mrf.mxu1 }
 0x69d   : > { %v7969_v19 = vadd.f32 %v5910_v45, %v5443_v52 }
 0x69e   : > { %v3816_v11 = vpop.f32.mrf.mxu1 }
 0x69f   : > { %v7972_v32 = vadd.f32 %v5911_v60, %v3816_v11  ;;  %v3885_v34 = vmul.f32 %v7969_v19, %v7969_v19  ;;  %v5572_v60 = vld [vmem:[%s8198_s14 + $0x78] sm:$0xff]  }
 0x6a0   : > { %v5444_v31 = vpop.f32.mrf.mxu1  ;;  %5213 = vmatprep.subr.bf16.mxu1 %v5572_v60 }
 0x6a1   : > { %v3883_v0 = vmul.f32 %v7972_v32, %v7972_v32  ;;  %v7977_v59 = vadd.f32 %v5912_v22, %v5444_v31  ;;  %v3913_v27 = vsel %vm528_vm0, %v3885_v34, 0.0  ;;  %v5573_v31 = vld [vmem:[%s8198_s14 + $0x38] sm:$0xff]   ;;  %v5576_v22 = vld [vmem:[%s8198_s14 + $0x68] sm:$0xff]   ;;  %v5579_v34 = vld [vmem:[%s8198_s14 + $0x20] sm:$0xff]  }
 0x6a2   : > { %v3819_v33 = vpop.f32.mrf.mxu1  ;;  %5214 = vmatpush3.bf16.msra.mxu1 %v5573_v31 }
 0x6a3   : > { %v7980_v48 = vadd.f32 %v5913_v42, %v3819_v33  ;;  %v3907_v62 = vsel %vm528_vm0, %v3883_v0, 0.0  ;;  %v3886_v49 = vmul.f32 %v7977_v59, %v7977_v59  ;;  %v5574_v0 = vld [vmem:[%s8198_s14 + $0x70] sm:$0xff]   ;;  %v5577_v42 = vld [vmem:[%s8198_s14 + $0x28] sm:$0xff]  }
 0x6a4   : > { %3908 = vadd.xlane.f32.xlu0 %v3907_v62  ;;  %v5575_v33 = vld [vmem:[%s8198_s14 + $0x30] sm:$0xff]   ;;  %5215 = vmatprep.subr.bf16.mxu1 %v5574_v0  ;;  %v5578_v62 = vld [vmem:[%s8198_s14 + $0x60] sm:$0xff]  }
 0x6a5   : > { %v3884_v41 = vmul.f32 %v7980_v48, %v7980_v48  ;;  %v3916_v51 = vsel %vm528_vm0, %v3886_v49, 0.0 }
 0x6a6   : > { %5216 = vmatpush3.bf16.msra.mxu1 %v5575_v33 }
 0x6a7   : > { %v3910_v25 = vsel %vm528_vm0, %v3884_v41, 0.0  ;;  %5217 = vmatprep.subr.bf16.mxu1 %v5576_v22  ;;  %v5580_v41 = vld [vmem:[%s8198_s14 + $0x58] sm:$0xff]  }
 0x6a8   : > { %3914 = vadd.xlane.f32.xlu0 %v3913_v27  ;;  %3911 = vadd.xlane.f32.xlu1 %v3910_v25  ;;  %v5581_v27 = vld [vmem:[%s8198_s14 + $0x18] sm:$0xff]  }
 0x6aa   : > { %5218 = vmatpush3.bf16.msra.mxu1 %v5577_v42 }
 0x6ab   : > { %5219 = vmatprep.subr.bf16.mxu1 %v5578_v62 }
 0x6ac   : > { %3917 = vadd.xlane.f32.xlu1 %v3916_v51  ;;  %v5447_v35 = vpop.f32.mrf.mxu1 }
 0x6ad   : > { %v7993_v46 = vadd.f32 %v5914_v21, %v5447_v35 }
 0x6ae   : > { %v3832_v63 = vpop.f32.mrf.mxu1  ;;  %5220 = vmatpush3.bf16.msra.mxu1 %v5579_v34 }
 0x6af   : > { %v7996_v23 = vadd.f32 %v5915_v26, %v3832_v63  ;;  %v3889_v36 = vmul.f32 %v7993_v46, %v7993_v46  ;;  %5221 = vmatprep.subr.bf16.mxu1 %v5580_v41 }
 0x6b0   : > { %v5448_v61 = vpop.f32.mrf.mxu1 }
 0x6b1   : > { %v3887_v47 = vmul.f32 %v7996_v23, %v7996_v23  ;;  %v8001_v9 = vadd.f32 %v5916_v17, %v5448_v61  ;;  %v3925_v24 = vsel %vm528_vm0, %v3889_v36, 0.0 }
 0x6b2   : > { %v3835_v53 = vpop.f32.mrf.mxu1  ;;  %5222 = vmatpush3.bf16.msra.mxu1 %v5581_v27 }
 0x6b3   : > { %v8004_v39 = vadd.f32 %v5917_v1, %v3835_v53  ;;  %v3919_v38 = vsel %vm528_vm0, %v3887_v47, 0.0  ;;  %v3890_v54 = vmul.f32 %v8001_v9, %v8001_v9 }
 0x6b4   : > { %3920 = vadd.xlane.f32.xlu0 %v3919_v38 }
 0x6b5   : > { %v3888_v10 = vmul.f32 %v8004_v39, %v8004_v39  ;;  %v3928_v2 = vsel %vm528_vm0, %v3890_v54, 0.0 }
 0x6b7   : > { %v3922_v44 = vsel %vm528_vm0, %v3888_v10, 0.0 }
 0x6b8   : > { %3926 = vadd.xlane.f32.xlu0 %v3925_v24  ;;  %3923 = vadd.xlane.f32.xlu1 %v3922_v44 }
 0x6bc   : > { %3929 = vadd.xlane.f32.xlu1 %v3928_v2  ;;  %v5451_v8 = vpop.f32.mrf.mxu1 }
 0x6bd   : > { %v8024_v57 = vadd.f32 %v5918_v28, %v5451_v8 }
 0x6be   : > { %v3848_v50 = vpop.f32.mrf.mxu1 }
 0x6bf   : > { %v8027_v29 = vadd.f32 %v5919_v40, %v3848_v50  ;;  %v3893_v56 = vmul.f32 %v8024_v57, %v8024_v57 }
 0x6c0   : > { %v5452_v18 = vpop.f32.mrf.mxu1 }
 0x6c1   : > { %v3891_v14 = vmul.f32 %v8027_v29, %v8027_v29  ;;  %v8032_v3 = vadd.f32 %v5920_v16, %v5452_v18  ;;  %v3937_v6 = vsel %vm528_vm0, %v3893_v56, 0.0 }
 0x6c2   : > { %v3851_v55 = vpop.f32.mrf.mxu1 }
 0x6c3   : > { %v8035_v15 = vadd.f32 %v5921_v7, %v3851_v55  ;;  %v3931_v13 = vsel %vm528_vm0, %v3891_v14, 0.0  ;;  %v3894_v11 = vmul.f32 %v8032_v3, %v8032_v3 }
 0x6c4   : > { %3932 = vadd.xlane.f32.xlu0 %v3931_v13 }
 0x6c5   : > { %v3892_v37 = vmul.f32 %v8035_v15, %v8035_v15  ;;  %v3940_v45 = vsel %vm528_vm0, %v3894_v11, 0.0 }
 0x6c7   : > { %v3934_v52 = vsel %vm528_vm0, %v3892_v37, 0.0 }
 0x6c8   : > { %3938 = vadd.xlane.f32.xlu0 %v3937_v6  ;;  %3935 = vadd.xlane.f32.xlu1 %v3934_v52 }
 0x6cc   : > { %3941 = vadd.xlane.f32.xlu1 %v3940_v45 }
 0x71d   : > { %v3897_v25 = vpop.xlane.xlu0 %3896 }
 0x71e   : > { %v3943_v49 = vmul.f32 0.015625, %v3897_v25 }
 0x720   : > { %v3959_v51 = vadd.f32 1.1920929e-07, %v3943_v49 }
 0x721   : > { %v3900_v35 = vpop.xlane.xlu1 %3899  ;;  %v3903_v63 = vpop.xlane.xlu0 %3902 }
 0x722   : > { %v3944_v21 = vmul.f32 0.015625, %v3900_v35  ;;  %5844 = vrsqrt.f32 %v3959_v51  ;;  %v3945_v61 = vmul.f32 0.015625, %v3903_v63 }
 0x724   : > { %v3960_v26 = vadd.f32 1.1920929e-07, %v3944_v21  ;;  %v3961_v1 = vadd.f32 1.1920929e-07, %v3945_v61 }
 0x725   : > { %v3906_v47 = vpop.xlane.xlu1 %3905 }
 0x726   : > { %v3946_v53 = vmul.f32 0.015625, %v3906_v47  ;;  %5846 = vrsqrt.f32 %v3960_v26 }
 0x728   : > { %v3962_v17 = vadd.f32 1.1920929e-07, %v3946_v53 }
 0x72a   : > { %5848 = vrsqrt.f32 %v3962_v17 }
 0x72b   : > { %5850 = vrsqrt.f32 %v3961_v1 }
 0x72d   : > { %v3909_v38 = vpop.xlane.xlu0 %3908 }
 0x72e   : > { %v3947_v36 = vmul.f32 0.015625, %v3909_v38 }
 0x72f   : > { %v5845_v10 = vpop.eup %5844 }
 0x730   : > { %v3963_v30 = vadd.f32 1.1920929e-07, %v3947_v36  ;;  %v3991_v8 = vmul.f32 %v5845_v10, %v7948_v58 }
 0x731   : > { %v3912_v5 = vpop.xlane.xlu1 %3911  ;;  %v3915_v24 = vpop.xlane.xlu0 %3914 }
 0x732   : > { %v3948_v44 = vmul.f32 0.015625, %v3912_v5  ;;  %5852 = vrsqrt.f32 %v3963_v30  ;;  %v3949_v28 = vmul.f32 0.015625, %v3915_v24 }
 0x733   : > { %v5847_v54 = vpop.eup %5846 }
 0x734   : > { %v3964_v2 = vadd.f32 1.1920929e-07, %v3948_v44  ;;  %v3992_v50 = vmul.f32 %v5847_v54, %v7956_v4  ;;  %v3965_v7 = vadd.f32 1.1920929e-07, %v3949_v28 }
 0x735   : > { %v3918_v40 = vpop.xlane.xlu1 %3917 }
 0x736   : > { %v3950_v18 = vmul.f32 0.015625, %v3918_v40  ;;  %v4007_v14 = vpack.c.bf16 %v3992_v50, %v3991_v8  ;;  %5854 = vrsqrt.f32 %v3964_v2 }
 0x737   : > { %v5849_v55 = vpop.eup %5848 }
 0x738   : > { %v3966_v16 = vadd.f32 1.1920929e-07, %v3950_v18  ;;  %4769 = vmatmul.mubr.msk.bf16.vlgmr.msra.gmra.mxu0 %vm528_vm0, %v4007_v14  ;;  %v5851_v13 = vpop.eup %5850  ;;  %v3994_v56 = vmul.f32 %v5849_v55, %v7953_v43 }
 0x739   : > { %4129 = vmatprep.mubr.bf16.mxu0 %v5932_v20  ;;  %v3993_v6 = vmul.f32 %v5851_v13, %v7945_v12 }
 0x73a   : > { %5856 = vrsqrt.f32 %v3966_v16 }
 0x73b   : > { %5858 = vrsqrt.f32 %v3965_v7  ;;  %v4008_v11 = vpack.c.bf16 %v3994_v56, %v3993_v6 }
 0x73d   : > { %v3921_v37 = vpop.xlane.xlu0 %3920 }
 0x73e   : > { %v3951_v52 = vmul.f32 0.015625, %v3921_v37 }
 0x73f   : > { %v5853_v31 = vpop.eup %5852 }
 0x740   : > { %v3967_v45 = vadd.f32 1.1920929e-07, %v3951_v52  ;;  %4770 = vmatmul.mubr.msk.bf16.gmra.mxu0 %vm528_vm0, %v4008_v11  ;;  %v3995_v41 = vmul.f32 %v5853_v31, %v7972_v32 }
 0x741   : > { %v3924_v60 = vpop.xlane.xlu1 %3923  ;;  %v3927_v0 = vpop.xlane.xlu0 %3926  ;;  %4139 = vmatprep.mubr.bf16.mxu0 %v5932_v20 }
 0x742   : > { %v3952_v33 = vmul.f32 0.015625, %v3924_v60  ;;  %5860 = vrsqrt.f32 %v3967_v45  ;;  %v3953_v62 = vmul.f32 0.015625, %v3927_v0 }
 0x743   : > { %v5855_v22 = vpop.eup %5854 }
 0x744   : > { %v3968_v42 = vadd.f32 1.1920929e-07, %v3952_v33  ;;  %v3996_v27 = vmul.f32 %v5855_v22, %v7980_v48  ;;  %v3969_v63 = vadd.f32 1.1920929e-07, %v3953_v62  ;;  %v5582_v22 = vld [vmem:[%s8198_s14 + $0x50] sm:$0xff]   ;;  %v5585_v62 = vld [vmem:[%s8198_s14 + $0x8] sm:$0xff]  }
 0x745   : > { %v3930_v34 = vpop.xlane.xlu1 %3929  ;;  %5223 = vmatprep.subr.bf16.mxu1 %v5582_v22 }
 0x746   : > { %v3954_v25 = vmul.f32 0.015625, %v3930_v34  ;;  %5862 = vrsqrt.f32 %v3968_v42  ;;  %v4009_v49 = vpack.c.bf16 %v3996_v27, %v3995_v41  ;;  %v5583_v42 = vld [vmem:[%s8198_s14 + $0x10] sm:$0xff]   ;;  %v5586_v34 = vld [vmem:[%s8198_s14 + $0x40] sm:$0xff]  }
 0x747   : > { %v5857_v51 = vpop.eup %5856  ;;  %5224 = vmatpush3.bf16.msra.mxu1 %v5583_v42  ;;  %v5587_v41 = vld [vmem:[%s8198_s14] sm:$0xff]  }
 0x748   : > { %v3970_v35 = vadd.f32 1.1920929e-07, %v3954_v25  ;;  %4771 = vmatmul.mubr.msk.bf16.gmra.mxu0 %vm528_vm0, %v4009_v49  ;;  %v5859_v21 = vpop.eup %5858  ;;  %v3998_v26 = vmul.f32 %v5857_v51, %v7977_v59 }
 0x749   : > { %4149 = vmatprep.mubr.bf16.mxu0 %v5932_v20  ;;  %v3997_v47 = vmul.f32 %v5859_v21, %v7969_v19 }
 0x74a   : > { %5864 = vrsqrt.f32 %v3970_v35 }
 0x74b   : > { %5866 = vrsqrt.f32 %v3969_v63  ;;  %v4010_v17 = vpack.c.bf16 %v3998_v26, %v3997_v47 }
 0x74d   : > { %v3933_v61 = vpop.xlane.xlu0 %3932 }
 0x74e   : > { %v3955_v53 = vmul.f32 0.015625, %v3933_v61 }
 0x74f   : > { %v5861_v36 = vpop.eup %5860 }
 0x750   : > { %v3971_v1 = vadd.f32 1.1920929e-07, %v3955_v53  ;;  %4772 = vmatmul.mubr.msk.bf16.gmra.mxu0 %vm528_vm0, %v4010_v17  ;;  %v3999_v2 = vmul.f32 %v5861_v36, %v7996_v23 }
 0x751   : > { %v3936_v38 = vpop.xlane.xlu1 %3935  ;;  %v3939_v30 = vpop.xlane.xlu0 %3938  ;;  %4159 = vmatprep.mubr.bf16.mxu0 %v5932_v20 }
 0x752   : > { %v3956_v5 = vmul.f32 0.015625, %v3936_v38  ;;  %5868 = vrsqrt.f32 %v3971_v1  ;;  %v3957_v44 = vmul.f32 0.015625, %v3939_v30 }
 0x753   : > { %v5863_v10 = vpop.eup %5862 }
 0x754   : > { %v3972_v24 = vadd.f32 1.1920929e-07, %v3956_v5  ;;  %v4000_v8 = vmul.f32 %v5863_v10, %v8004_v39  ;;  %v3973_v14 = vadd.f32 1.1920929e-07, %v3957_v44 }
 0x755   : > { %v3942_v54 = vpop.xlane.xlu1 %3941 }
 0x756   : > { %v3958_v50 = vmul.f32 0.015625, %v3942_v54  ;;  %5870 = vrsqrt.f32 %v3972_v24  ;;  %v4011_v28 = vpack.c.bf16 %v4000_v8, %v3999_v2 }
 0x757   : > { %v5865_v40 = vpop.eup %5864 }
 0x758   : > { %v3974_v18 = vadd.f32 1.1920929e-07, %v3958_v50  ;;  %4773 = vmatmul.mubr.msk.bf16.gmra.mxu0 %vm528_vm0, %v4011_v28  ;;  %v5867_v55 = vpop.eup %5866  ;;  %v4002_v16 = vmul.f32 %v5865_v40, %v8001_v9 }
 0x759   : > { %4169 = vmatprep.mubr.bf16.mxu0 %v5932_v20  ;;  %v4001_v7 = vmul.f32 %v5867_v55, %v7993_v46 }
 0x75a   : > { %5872 = vrsqrt.f32 %v3974_v18 }
 0x75b   : > { %5874 = vrsqrt.f32 %v3973_v14  ;;  %v4012_v13 = vpack.c.bf16 %v4002_v16, %v4001_v7 }
 0x75f   : > { %v5869_v56 = vpop.eup %5868 }
 0x760   : > { %4774 = vmatmul.mubr.msk.bf16.gmra.mxu0 %vm528_vm0, %v4012_v13  ;;  %v4003_v6 = vmul.f32 %v5869_v56, %v8027_v29 }
 0x761   : > { %4179 = vmatprep.mubr.bf16.mxu0 %v5932_v20 }
 0x763   : > { %v5871_v37 = vpop.eup %5870 }
 0x764   : > { %v4004_v52 = vmul.f32 %v5871_v37, %v8035_v15 }
 0x766   : > { %v4013_v11 = vpack.c.bf16 %v4004_v52, %v4003_v6 }
 0x767   : > { %v5873_v45 = vpop.eup %5872 }
 0x768   : > { %4775 = vmatmul.mubr.msk.bf16.gmra.mxu0 %vm528_vm0, %v4013_v11  ;;  %v5875_v60 = vpop.eup %5874  ;;  %v4006_v31 = vmul.f32 %v5873_v45, %v8032_v3 }
 0x769   : > { %4189 = vmatprep.mubr.bf16.mxu0 %v5932_v20  ;;  %v4005_v0 = vmul.f32 %v5875_v60, %v8024_v57  ;;  %v5584_v20 = vld [vmem:[%s8198_s14 + $0x48] sm:$0xff]  }
 0x76a   : > { %5225 = vmatprep.subr.bf16.mxu1 %v5584_v20 }
 0x76b   : > { %v4014_v33 = vpack.c.bf16 %v4006_v31, %v4005_v0  ;;  %5226 = vmatpush3.bf16.msra.mxu1 %v5585_v62 }
 0x76c   : > { %5227 = vmatprep.subr.bf16.mxu1 %v5586_v34 }
 0x76f   : > { %5228 = vmatpush3.bf16.msra.mxu1 %v5587_v41 }
 0x770   : > { %4776 = vmatmul.mubr.msk.bf16.gmra.mxu0 %vm528_vm0, %v4014_v33 }
 0x7f8   : > { %v4121_v27 = vpop.f32.mrf.mxu0 }
 0x7f9   : > { %v4200_v63 = vmax.f32 %v4121_v27, 0.0 }
 0x7fa   : > { %v4123_v25 = vpop.f32.mrf.mxu0 }
 0x7fb   : > { %v4201_v51 = vmax.f32 %v4123_v25, 0.0  ;;  %v4232_v1 = vmul.f32 %v4200_v63, %v4200_v63 }
 0x7fc   : > { %v4125_v49 = vpop.f32.mrf.mxu0 }
 0x7fd   : > { %v4202_v35 = vmax.f32 %v4125_v49, 0.0  ;;  %v4233_v53 = vmul.f32 %v4201_v51, %v4201_v51 }
 0x7fe   : > { %v4127_v21 = vpop.f32.mrf.mxu0 }
 0x7ff   : > { %v4203_v26 = vmax.f32 %v4127_v21, 0.0  ;;  %v4234_v61 = vmul.f32 %v4202_v35, %v4202_v35 }
 0x800   : > { %v4131_v47 = vpop.f32.mrf.mxu0 }
 0x801   : > { %v4235_v17 = vmul.f32 %v4203_v26, %v4203_v26  ;;  %v4264_v30 = vpack.c.bf16 %v4234_v61, %v4232_v1  ;;  %v4204_v44 = vmax.f32 %v4131_v47, 0.0 }
 0x802   : > { %v4133_v38 = vpop.f32.mrf.mxu0 }
 0x803   : > { %v4265_v36 = vpack.c.bf16 %v4235_v17, %v4233_v53  ;;  %v4205_v10 = vmax.f32 %v4133_v38, 0.0  ;;  %v4236_v18 = vmul.f32 %v4204_v44, %v4204_v44 }
 0x804   : > { %v4135_v5 = vpop.f32.mrf.mxu0 }
 0x805   : > { %v4206_v24 = vmax.f32 %v4135_v5, 0.0  ;;  %4440 = vmatprep.mubr.bf16.mxu1 %v4265_v36  ;;  %v4237_v28 = vmul.f32 %v4205_v10, %v4205_v10 }
 0x806   : > { %v4137_v54 = vpop.f32.mrf.mxu0  ;;  %4441 = vmatmul.mubr.bf16.vlgmr.msra.gmra.mxu1 %v4264_v30 }
 0x807   : > { %v4207_v2 = vmax.f32 %v4137_v54, 0.0  ;;  %v4238_v8 = vmul.f32 %v4206_v24, %v4206_v24 }
 0x808   : > { %v4141_v50 = vpop.f32.mrf.mxu0 }
 0x809   : > { %v4239_v40 = vmul.f32 %v4207_v2, %v4207_v2  ;;  %v4266_v16 = vpack.c.bf16 %v4238_v8, %v4236_v18  ;;  %v4208_v37 = vmax.f32 %v4141_v50, 0.0 }
 0x80a   : > { %v4143_v14 = vpop.f32.mrf.mxu0 }
 0x80b   : > { %v4267_v55 = vpack.c.bf16 %v4239_v40, %v4237_v28  ;;  %v4209_v13 = vmax.f32 %v4143_v14, 0.0  ;;  %v4240_v0 = vmul.f32 %v4208_v37, %v4208_v37 }
 0x80c   : > { %v4145_v7 = vpop.f32.mrf.mxu0 }
 0x80d   : > { %v4210_v56 = vmax.f32 %v4145_v7, 0.0  ;;  %4448 = vmatprep.mubr.bf16.mxu1 %v4267_v55  ;;  %v4241_v60 = vmul.f32 %v4209_v13, %v4209_v13 }
 0x80e   : > { %v4147_v6 = vpop.f32.mrf.mxu0  ;;  %4449 = vmatmul.mubr.bf16.gmra.mxu1 %v4266_v16 }
 0x80f   : > { %v4211_v52 = vmax.f32 %v4147_v6, 0.0  ;;  %v4242_v11 = vmul.f32 %v4210_v56, %v4210_v56 }
 0x810   : > { %v4151_v45 = vpop.f32.mrf.mxu0 }
 0x811   : > { %v4243_v31 = vmul.f32 %v4211_v52, %v4211_v52  ;;  %v4268_v42 = vpack.c.bf16 %v4242_v11, %v4240_v0  ;;  %v4212_v41 = vmax.f32 %v4151_v45, 0.0 }
 0x812   : > { %v4153_v33 = vpop.f32.mrf.mxu0 }
 0x813   : > { %v4269_v22 = vpack.c.bf16 %v4243_v31, %v4241_v60  ;;  %v4213_v62 = vmax.f32 %v4153_v33, 0.0  ;;  %v4244_v21 = vmul.f32 %v4212_v41, %v4212_v41 }
 0x814   : > { %v4155_v20 = vpop.f32.mrf.mxu0 }
 0x815   : > { %v4214_v34 = vmax.f32 %v4155_v20, 0.0  ;;  %4456 = vmatprep.mubr.bf16.mxu1 %v4269_v22  ;;  %v4245_v35 = vmul.f32 %v4213_v62, %v4213_v62 }
 0x816   : > { %v4157_v27 = vpop.f32.mrf.mxu0  ;;  %4457 = vmatmul.mubr.bf16.gmra.mxu1 %v4268_v42 }
 0x817   : > { %v4215_v25 = vmax.f32 %v4157_v27, 0.0  ;;  %v4246_v49 = vmul.f32 %v4214_v34, %v4214_v34 }
 0x818   : > { %v4161_v51 = vpop.f32.mrf.mxu0 }
 0x819   : > { %v4247_v63 = vmul.f32 %v4215_v25, %v4215_v25  ;;  %v4270_v47 = vpack.c.bf16 %v4246_v49, %v4244_v21  ;;  %v4216_v38 = vmax.f32 %v4161_v51, 0.0 }
 0x81a   : > { %v4163_v26 = vpop.f32.mrf.mxu0 }
 0x81b   : > { %v4271_v61 = vpack.c.bf16 %v4247_v63, %v4245_v35  ;;  %v4217_v17 = vmax.f32 %v4163_v26, 0.0  ;;  %v4248_v54 = vmul.f32 %v4216_v38, %v4216_v38 }
 0x81c   : > { %v4165_v53 = vpop.f32.mrf.mxu0 }
 0x81d   : > { %v4218_v1 = vmax.f32 %v4165_v53, 0.0  ;;  %4464 = vmatprep.mubr.bf16.mxu1 %v4271_v61  ;;  %v4249_v24 = vmul.f32 %v4217_v17, %v4217_v17 }
 0x81e   : > { %v4167_v36 = vpop.f32.mrf.mxu0  ;;  %4465 = vmatmul.mubr.bf16.gmra.mxu1 %v4270_v47 }
 0x81f   : > { %v4219_v30 = vmax.f32 %v4167_v36, 0.0  ;;  %v4250_v5 = vmul.f32 %v4218_v1, %v4218_v1 }
 0x820   : > { %v4171_v10 = vpop.f32.mrf.mxu0 }
 0x821   : > { %v4251_v44 = vmul.f32 %v4219_v30, %v4219_v30  ;;  %v4272_v50 = vpack.c.bf16 %v4250_v5, %v4248_v54  ;;  %v4220_v14 = vmax.f32 %v4171_v10, 0.0 }
 0x822   : > { %v4173_v2 = vpop.f32.mrf.mxu0 }
 0x823   : > { %v4273_v8 = vpack.c.bf16 %v4251_v44, %v4249_v24  ;;  %v4221_v40 = vmax.f32 %v4173_v2, 0.0  ;;  %v4252_v6 = vmul.f32 %v4220_v14, %v4220_v14 }
 0x824   : > { %v4175_v28 = vpop.f32.mrf.mxu0 }
 0x825   : > { %v4222_v18 = vmax.f32 %v4175_v28, 0.0  ;;  %4472 = vmatprep.mubr.bf16.mxu1 %v4273_v8  ;;  %v4253_v56 = vmul.f32 %v4221_v40, %v4221_v40 }
 0x826   : > { %v4177_v55 = vpop.f32.mrf.mxu0  ;;  %4473 = vmatmul.mubr.bf16.gmra.mxu1 %v4272_v50 }
 0x827   : > { %v4223_v16 = vmax.f32 %v4177_v55, 0.0  ;;  %v4254_v7 = vmul.f32 %v4222_v18, %v4222_v18 }
 0x828   : > { %v4181_v13 = vpop.f32.mrf.mxu0 }
 0x829   : > { %v4255_v37 = vmul.f32 %v4223_v16, %v4223_v16  ;;  %v4274_v45 = vpack.c.bf16 %v4254_v7, %v4252_v6  ;;  %v4224_v33 = vmax.f32 %v4181_v13, 0.0 }
 0x82a   : > { %v4183_v52 = vpop.f32.mrf.mxu0 }
 0x82b   : > { %v4275_v11 = vpack.c.bf16 %v4255_v37, %v4253_v56  ;;  %v4225_v31 = vmax.f32 %v4183_v52, 0.0  ;;  %v4256_v27 = vmul.f32 %v4224_v33, %v4224_v33 }
 0x82c   : > { %v4185_v60 = vpop.f32.mrf.mxu0 }
 0x82d   : > { %v4226_v0 = vmax.f32 %v4185_v60, 0.0  ;;  %4480 = vmatprep.mubr.bf16.mxu1 %v4275_v11  ;;  %v4257_v34 = vmul.f32 %v4225_v31, %v4225_v31 }
 0x82e   : > { %v4187_v22 = vpop.f32.mrf.mxu0  ;;  %4481 = vmatmul.mubr.bf16.gmra.mxu1 %v4274_v45 }
 0x82f   : > { %v4227_v42 = vmax.f32 %v4187_v22, 0.0  ;;  %v4258_v20 = vmul.f32 %v4226_v0, %v4226_v0 }
 0x830   : > { %v4191_v62 = vpop.f32.mrf.mxu0 }
 0x831   : > { %v4259_v41 = vmul.f32 %v4227_v42, %v4227_v42  ;;  %v4276_v51 = vpack.c.bf16 %v4258_v20, %v4256_v27  ;;  %v4228_v26 = vmax.f32 %v4191_v62, 0.0 }
 0x832   : > { %v4193_v25 = vpop.f32.mrf.mxu0 }
 0x833   : > { %v4277_v49 = vpack.c.bf16 %v4259_v41, %v4257_v34  ;;  %v4229_v63 = vmax.f32 %v4193_v25, 0.0  ;;  %v4260_v38 = vmul.f32 %v4228_v26, %v4228_v26 }
 0x834   : > { %v4195_v35 = vpop.f32.mrf.mxu0 }
 0x835   : > { %v4230_v21 = vmax.f32 %v4195_v35, 0.0  ;;  %4488 = vmatprep.mubr.bf16.mxu1 %v4277_v49  ;;  %v4261_v17 = vmul.f32 %v4229_v63, %v4229_v63 }
 0x836   : > { %v4197_v61 = vpop.f32.mrf.mxu0  ;;  %4489 = vmatmul.mubr.bf16.gmra.mxu1 %v4276_v51 }
 0x837   : > { %v4231_v47 = vmax.f32 %v4197_v61, 0.0  ;;  %v4262_v53 = vmul.f32 %v4230_v21, %v4230_v21 }
 0x839   : > { %v4263_v1 = vmul.f32 %v4231_v47, %v4231_v47  ;;  %v4278_v30 = vpack.c.bf16 %v4262_v53, %v4260_v38 }
 0x83b   : > { %v4279_v36 = vpack.c.bf16 %v4263_v1, %v4261_v17 }
 0x83d   : > { %4496 = vmatprep.mubr.bf16.mxu1 %v4279_v36 }
 0x83e   : > { %4497 = vmatmul.mubr.bf16.gmra.mxu1 %v4278_v30 }
 0x8c6   : > { %v5229_v5 = vpop.f32.mrf.mxu1 }
 0x8c8   : > { %v5230_v10 = vpop.f32.mrf.mxu1 }
 0x8c9   : > { %v5231_v24 = vadd.f32 %v5230_v10, %v5229_v5 }
 0x8ca   : > { %v5232_v44 = vpop.f32.mrf.mxu1 }
 0x8cb   : > { %v4505_v54 = vadd.f32 %v5231_v24, %v7948_v58 }
 0x8cc   : > { %v5233_v2 = vpop.f32.mrf.mxu1 }
 0x8cd   : > { %4521 = vst.msk [vmem:[%s8131_s16] sm:$0xff] %vm528_vm0, %v4505_v54  ;;  %v5234_v8 = vadd.f32 %v5233_v2, %v5232_v44 }
 0x8ce   : > { %v5235_v50 = vpop.f32.mrf.mxu1 }
 0x8cf   : > { %v4506_v28 = vadd.f32 %v5234_v8, %v7956_v4 }
 0x8d0   : > { %v5236_v40 = vpop.f32.mrf.mxu1 }
 0x8d1   : > { %4522 = vst.msk [vmem:[%s8131_s16 + $0x8] sm:$0xff] %vm528_vm0, %v4506_v28  ;;  %v5237_v18 = vadd.f32 %v5236_v40, %v5235_v50 }
 0x8d2   : > { %v5238_v14 = vpop.f32.mrf.mxu1 }
 0x8d3   : > { %v4507_v55 = vadd.f32 %v5237_v18, %v7945_v12 }
 0x8d4   : > { %v5239_v16 = vpop.f32.mrf.mxu1 }
 0x8d5   : > { %4523 = vst.msk [vmem:[%s8131_s16 + $0x10] sm:$0xff] %vm528_vm0, %v4507_v55  ;;  %v5240_v58 = vadd.f32 %v5239_v16, %v5238_v14 }
 0x8d6   : > { %v5241_v7 = vpop.f32.mrf.mxu1 }
 0x8d7   : > { %v4508_v13 = vadd.f32 %v5240_v58, %v7953_v43 }
 0x8d8   : > { %v5242_v56 = vpop.f32.mrf.mxu1 }
 0x8d9   : > { %4524 = vst.msk [vmem:[%s8131_s16 + $0x18] sm:$0xff] %vm528_vm0, %v4508_v13  ;;  %v5243_v4 = vadd.f32 %v5242_v56, %v5241_v7 }
 0x8da   : > { %v5244_v37 = vpop.f32.mrf.mxu1 }
 0x8db   : > { %v4509_v6 = vadd.f32 %v5243_v4, %v7972_v32 }
 0x8dc   : > { %v5245_v52 = vpop.f32.mrf.mxu1 }
 0x8dd   : > { %4525 = vst.msk [vmem:[%s8131_s16 + $0x20] sm:$0xff] %vm528_vm0, %v4509_v6  ;;  %v5246_v12 = vadd.f32 %v5245_v52, %v5244_v37 }
 0x8de   : > { %v5247_v11 = vpop.f32.mrf.mxu1 }
 0x8df   : > { %v4510_v45 = vadd.f32 %v5246_v12, %v7980_v48 }
 0x8e0   : > { %v5248_v60 = vpop.f32.mrf.mxu1 }
 0x8e1   : > { %4526 = vst.msk [vmem:[%s8131_s16 + $0x28] sm:$0xff] %vm528_vm0, %v4510_v45  ;;  %v5249_v43 = vadd.f32 %v5248_v60, %v5247_v11 }
 0x8e2   : > { %v5250_v31 = vpop.f32.mrf.mxu1 }
 0x8e3   : > { %v4511_v0 = vadd.f32 %v5249_v43, %v7969_v19 }
 0x8e4   : > { %v5251_v33 = vpop.f32.mrf.mxu1 }
 0x8e5   : > { %4527 = vst.msk [vmem:[%s8131_s16 + $0x30] sm:$0xff] %vm528_vm0, %v4511_v0  ;;  %v5252_v32 = vadd.f32 %v5251_v33, %v5250_v31 }
 0x8e6   : > { %v5253_v22 = vpop.f32.mrf.mxu1 }
 0x8e7   : > { %v4512_v42 = vadd.f32 %v5252_v32, %v7977_v59 }
 0x8e8   : > { %v5254_v20 = vpop.f32.mrf.mxu1 }
 0x8e9   : > { %4528 = vst.msk [vmem:[%s8131_s16 + $0x38] sm:$0xff] %vm528_vm0, %v4512_v42  ;;  %v5255_v48 = vadd.f32 %v5254_v20, %v5253_v22 }
 0x8ea   : > { %v5256_v62 = vpop.f32.mrf.mxu1 }
 0x8eb   : > { %v4513_v34 = vadd.f32 %v5255_v48, %v7996_v23 }
 0x8ec   : > { %v5257_v41 = vpop.f32.mrf.mxu1 }
 0x8ed   : > { %4529 = vst.msk [vmem:[%s8131_s16 + $0x40] sm:$0xff] %vm528_vm0, %v4513_v34  ;;  %v5258_v19 = vadd.f32 %v5257_v41, %v5256_v62 }
 0x8ee   : > { %v5259_v27 = vpop.f32.mrf.mxu1 }
 0x8ef   : > { %v4514_v25 = vadd.f32 %v5258_v19, %v8004_v39 }
 0x8f0   : > { %v5260_v49 = vpop.f32.mrf.mxu1 }
 0x8f1   : > { %4530 = vst.msk [vmem:[%s8131_s16 + $0x48] sm:$0xff] %vm528_vm0, %v4514_v25  ;;  %v5261_v59 = vadd.f32 %v5260_v49, %v5259_v27 }
 0x8f2   : > { %v5262_v51 = vpop.f32.mrf.mxu1 }
 0x8f3   : > { %v4515_v35 = vadd.f32 %v5261_v59, %v7993_v46 }
 0x8f4   : > { %v5263_v63 = vpop.f32.mrf.mxu1 }
 0x8f5   : > { %4531 = vst.msk [vmem:[%s8131_s16 + $0x50] sm:$0xff] %vm528_vm0, %v4515_v35  ;;  %v5264_v23 = vadd.f32 %v5263_v63, %v5262_v51 }
 0x8f6   : > { %v5265_v21 = vpop.f32.mrf.mxu1 }
 0x8f7   : > { %v4516_v26 = vadd.f32 %v5264_v23, %v8001_v9 }
 0x8f8   : > { %v5266_v61 = vpop.f32.mrf.mxu1 }
 0x8f9   : > { %4532 = vst.msk [vmem:[%s8131_s16 + $0x58] sm:$0xff] %vm528_vm0, %v4516_v26  ;;  %v5267_v39 = vadd.f32 %v5266_v61, %v5265_v21 }
 0x8fa   : > { %v5268_v47 = vpop.f32.mrf.mxu1 }
 0x8fb   : > { %v4517_v53 = vadd.f32 %v5267_v39, %v8027_v29 }
 0x8fc   : > { %v5269_v17 = vpop.f32.mrf.mxu1 }
 0x8fd   : > { %4533 = vst.msk [vmem:[%s8131_s16 + $0x60] sm:$0xff] %vm528_vm0, %v4517_v53  ;;  %v5270_v46 = vadd.f32 %v5269_v17, %v5268_v47 }
 0x8fe   : > { %v5271_v1 = vpop.f32.mrf.mxu1 }
 0x8ff   : > { %v4518_v38 = vadd.f32 %v5270_v46, %v8035_v15 }
 0x900   : > { %v5272_v36 = vpop.f32.mrf.mxu1 }
 0x901   : > { %4534 = vst.msk [vmem:[%s8131_s16 + $0x68] sm:$0xff] %vm528_vm0, %v4518_v38  ;;  %v5273_v9 = vadd.f32 %v5272_v36, %v5271_v1 }
 0x902   : > { %v5274_v30 = vpop.f32.mrf.mxu1 }
 0x903   : > { %v4519_v5 = vadd.f32 %v5273_v9, %v8024_v57 }
 0x904   : > { %v5275_v10 = vpop.f32.mrf.mxu1 }
 0x905   : > { %4535 = vst.msk [vmem:[%s8131_s16 + $0x70] sm:$0xff] %vm528_vm0, %v4519_v5  ;;  %v5276_v24 = vadd.f32 %v5275_v10, %v5274_v30 }
 0x907   : > { %v4520_v29 = vadd.f32 %v5276_v24, %v8032_v3 }
 0x909   : > { %4536 = vst.msk [vmem:[%s8131_s16 + $0x78] sm:$0xff] %vm528_vm0, %v4520_v29 }
 0x90a PF: > { %s25_s18 = sadd.s32 1, %s5928_s18  }
 0x90b   : > { %p22_p4 = scmp.ge.s32.totalorder %s25_s18, 4  }
 0x90d   :  { %24 = sbr.rel (!%p22_p4) target bundleno = 1 (0x1), region = 110 }

</bundles_post_ra>
